<compile_context>
chip_gen: v6e
topology: v6e:2x2x1
jax: 0.10.0
libtpu: 0.0.40
codegen_flags: <defaults>
</compile_context>

<pallas_src>
import functools

import numpy as np
import jax
import jax.numpy as jnp
from jax import lax
from jax.experimental import pallas as pl
from jax.experimental.pallas import tpu as pltpu

LEAKY_SLOPE = 0.01  # nn.LeakyReLU default negative_slope

# ---- static geometry (Encoder(state_size=[16,16,2], hidden=64, max_num=5, ...)) ----
IN_CH = 2
H_IN = W_IN = 16
C1, C2, C3, C4 = 64, 128, 256, 256
K1, K2 = 5, 3
S1, S2, S3 = 8, 4, 2                      # conv1/2/3 output spatial sizes (conv4 -> 1x1)
HIDDEN = 64
MAX_NUM = 5
ACTION_TYPE = 5
ACTION_SPACE = MAX_NUM * ACTION_TYPE      # 25
FEATURE = C4                              # conv4 output is (B, 256, 1, 1)
LSTM_IN = FEATURE + ACTION_SPACE + MAX_NUM
LSTM_AUX = ACTION_SPACE + MAX_NUM + HIDDEN  # 94: [pre_action | finish_tag | h0]
AUX_PAD = 128
COLS1_K = K1 * K1 * IN_CH                 # 50 conv1 patch columns
COLS1_K_PAD = 64                          # 50 data + 1 bias ones-column + zero pad


# ---------------------------------------------------------------------------
# The single fused kernel: conv1..conv4 -> LSTMCell -> Linear
# ---------------------------------------------------------------------------
def _encoder_kernel(cols1_ref, aux_ref, c0_ref, mask2_ref,
                    w1_ref, w2_ref, b2_ref, b3_ref, b4_ref,
                    waux_ref, blstm_ref, wout_ref,
                    w3_hbm, w4_hbm, wihf_hbm,
                    logits_ref, h1_ref, c1_ref,
                    cols2_ref, cols3_ref, cols4_ref,
                    w3_vmem, w4_vmem, wihf_vmem, sems,
                    *, batch):
    n_r3 = S3 * S3 * batch                     # rows of out3 / cols3        (8)
    n_r2 = K2 * K2 * n_r3                      # rows of out2 / cols2        (72)
    r2_pad = ((n_r2 + 15) // 16) * 16          # bf16 tile-aligned row stride in cols1 (80)

    # Kick off the big-weight DMAs immediately; they overlap conv1/conv2 compute.
    cp_w3 = pltpu.make_async_copy(w3_hbm, w3_vmem, sems.at[0]); cp_w3.start()
    cp_w4 = pltpu.make_async_copy(w4_hbm, w4_vmem, sems.at[1]); cp_w4.start()
    cp_wi = pltpu.make_async_copy(wihf_hbm, wihf_vmem, sems.at[2]); cp_wi.start()

    def lrelu(v):
        return jnp.where(v > 0, v, LEAKY_SLOPE * v)

    # conv1 (bias folded into the ones-column of cols1 / row 50 of w1).  One
    # (n_r2, C1) tap-chunk per conv2 tap: each chunk is matmul'd then written
    # as one full-height, lane-contiguous column block of cols2 — 9 stores
    # total, replacing the previous ~121 masked 2-row scatter stores.
    for t2 in range(K2 * K2):
        blk = cols1_ref[t2 * r2_pad:t2 * r2_pad + n_r2, :]
        a1 = lrelu(jnp.dot(blk, w1_ref[...], preferred_element_type=jnp.float32))
        cols2_ref[:, t2 * C1:(t2 + 1) * C1] = a1.astype(jnp.bfloat16)

    # conv2 (+ validity mask which realises conv3's zero padding / dead taps).
    a2 = jnp.dot(cols2_ref[...], w2_ref[...], preferred_element_type=jnp.float32)
    a2 = lrelu(a2 + b2_ref[...]) * mask2_ref[...]
    for t3 in range(K2 * K2):
        cols3_ref[:, t3 * C2:(t3 + 1) * C2] = (
            a2[t3 * n_r3:(t3 + 1) * n_r3, :].astype(jnp.bfloat16))

    # conv3 (its weight arrived via the async copy started at kernel entry).
    cp_w3.wait()
    a3 = jnp.dot(cols3_ref[...], w3_vmem[...], preferred_element_type=jnp.float32)
    a3 = lrelu(a3 + b3_ref[...])                       # (4*B, 256)
    for p3 in range(S3 * S3):
        cols4_ref[:, p3 * C3:(p3 + 1) * C3] = (
            a3[p3 * batch:(p3 + 1) * batch, :].astype(jnp.bfloat16))

    # conv4 (dense 1x1-output form: only the 4 non-padding taps; no activation).
    # Its 1x1 spatial output IS the NCHW-flattened feature (B, 256).
    cp_w4.wait()
    flat = jnp.dot(cols4_ref[...], w4_vmem[...],
                   preferred_element_type=jnp.float32) + b4_ref[...]

    # LSTMCell, PyTorch gate order (i, f, g, o).  [pre_action|finish_tag|h0]
    # were concatenated in the wrapper so the three skinny matmuls are one.
    cp_wi.wait()
    gates = jnp.dot(flat.astype(jnp.bfloat16), wihf_vmem[...],
                    preferred_element_type=jnp.float32)
    gates = gates + jnp.dot(aux_ref[...], waux_ref[...],
                            preferred_element_type=jnp.float32)
    gates = gates + blstm_ref[...]
    h = HIDDEN
    i_g = jax.nn.sigmoid(gates[:, 0:h])
    f_g = jax.nn.sigmoid(gates[:, h:2 * h])
    g_g = jnp.tanh(gates[:, 2 * h:3 * h])
    o_g = jax.nn.sigmoid(gates[:, 3 * h:4 * h])
    c_1 = f_g * c0_ref[...] + i_g * g_g
    h_1 = o_g * jnp.tanh(c_1)
    c1_ref[...] = c_1
    h1_ref[...] = h_1
    # output Linear (bias=False) folded into the same kernel.
    logits_ref[...] = jnp.dot(h_1.astype(jnp.bfloat16), wout_ref[...],
                              preferred_element_type=jnp.float32)


# ---------------------------------------------------------------------------
# Trace-time index plan: which conv1 output row feeds which expanded row.
# Row indexing:  r2 = (t3*4 + p3)*B + b  (rows of cols2/out2, t3 = conv3 tap,
# p3 = conv3 output position), r1 = t2*r2_pad + r2 (rows of cols1, t2 = conv2
# tap).  Rows whose chain touches padding (at conv2 or conv3 level) are zero.
# ---------------------------------------------------------------------------
def _expansion_plan(batch):
    n_r3 = S3 * S3 * batch
    n_r2 = K2 * K2 * n_r3
    r2_pad = ((n_r2 + 15) // 16) * 16
    n_r1 = K2 * K2 * r2_pad
    idx = np.zeros((n_r1,), np.int32)       # gather index into conv1 position rows
    valid1 = np.zeros((n_r1,), np.float32)  # 1 iff the row carries a real conv1 patch
    valid2 = np.zeros((n_r2,), np.float32)  # 1 iff the conv2 output position is real
    for t3 in range(K2 * K2):
        dy3, dx3 = divmod(t3, K2)
        for p3 in range(S3 * S3):
            y3, x3 = divmod(p3, S3)
            y2, x2 = 2 * y3 + dy3 - 1, 2 * x3 + dx3 - 1
            v2 = (0 <= y2 < S2) and (0 <= x2 < S2)
            for b in range(batch):
                r2 = (t3 * S3 * S3 + p3) * batch + b
                valid2[r2] = 1.0 if v2 else 0.0
                if not v2:
                    continue
                for t2 in range(K2 * K2):
                    dy2, dx2 = divmod(t2, K2)
                    y1, x1 = 2 * y2 + dy2 - 1, 2 * x2 + dx2 - 1
                    if 0 <= y1 < S1 and 0 <= x1 < S1:
                        r1 = t2 * r2_pad + r2
                        idx[r1] = (y1 * S1 + x1) * batch + b
                        valid1[r1] = 1.0
    return idx, valid1, valid2, n_r2, r2_pad


def _im2col_conv1_full(x_nhwc):
    """conv1 im2col over all 8x8 output positions; rows (y1, x1, b), cols (ky, kx, ci)."""
    b = x_nhwc.shape[0]
    k, s, p = K1, 2, 2
    xp = jnp.pad(x_nhwc, ((0, 0), (p, p), (p, p), (0, 0)))
    taps = []
    for ky in range(k):
        for kx in range(k):
            taps.append(xp[:, ky:ky + s * (S1 - 1) + 1:s,
                              kx:kx + s * (S1 - 1) + 1:s, :])
    cols = jnp.concatenate(taps, axis=-1)          # (B, S1, S1, 50)
    cols = jnp.transpose(cols, (1, 2, 0, 3))       # (S1, S1, B, 50)
    return cols.reshape(S1 * S1 * b, COLS1_K)


def _build_kernel_inputs(x_nchw, pre_action, finish_tag, h0):
    batch = x_nchw.shape[0]
    x = jnp.transpose(x_nchw, (0, 2, 3, 1))        # NCHW -> NHWC (XLA glue)
    cols1_full = _im2col_conv1_full(x)             # (S1*S1*B, 50) f32
    idx, valid1, valid2, _, _ = _expansion_plan(batch)
    v1 = jnp.asarray(valid1)[:, None]
    rows = cols1_full[jnp.asarray(idx)] * v1       # zero rows where the chain is padding
    cols1_exp = jnp.concatenate([rows, v1], axis=-1)          # (+ ones/bias column)
    cols1_exp = jnp.pad(cols1_exp, ((0, 0), (0, COLS1_K_PAD - COLS1_K - 1)))
    cols1_exp = cols1_exp.astype(jnp.bfloat16)
    aux = jnp.concatenate([pre_action, finish_tag, h0], axis=-1)   # (B, 94)
    aux = jnp.pad(aux, ((0, 0), (0, AUX_PAD - LSTM_AUX))).astype(jnp.bfloat16)
    mask2 = jnp.asarray(valid2)[:, None]           # (n_r2, 1) f32
    return cols1_exp, aux, mask2


def encoder_forward(kp, x_nchw, pre_action, finish_tag, h0, c0):
    batch = x_nchw.shape[0]
    n_r3 = S3 * S3 * batch
    n_r2 = K2 * K2 * n_r3
    cols1_exp, aux, mask2 = _build_kernel_inputs(x_nchw, pre_action, finish_tag, h0)

    kernel = functools.partial(_encoder_kernel, batch=batch)
    out_shape = (
        jax.ShapeDtypeStruct((batch, ACTION_SPACE), jnp.float32),  # logits
        jax.ShapeDtypeStruct((batch, HIDDEN), jnp.float32),        # h_1
        jax.ShapeDtypeStruct((batch, HIDDEN), jnp.float32),        # c_1
    )
    vmem_spec = pl.BlockSpec(memory_space=pltpu.MemorySpace.VMEM)
    any_spec = pl.BlockSpec(memory_space=pl.ANY)
    in_specs = [vmem_spec] * 12 + [any_spec] * 3   # last 3 = w3, w4, wih_flat (manual DMA)
    scratch = [
        pltpu.VMEM((n_r2, K2 * K2 * C1), jnp.bfloat16),   # cols2: (72, 576)
        pltpu.VMEM((n_r3, K2 * K2 * C2), jnp.bfloat16),   # cols3: (8, 1152)
        pltpu.VMEM((batch, S3 * S3 * C3), jnp.bfloat16),  # cols4: (2, 1024)
        pltpu.VMEM((K2 * K2 * C2, C3), jnp.bfloat16),     # w3 VMEM landing buffer
        pltpu.VMEM((S3 * S3 * C3, C4), jnp.bfloat16),     # w4 VMEM landing buffer
        pltpu.VMEM((FEATURE, 4 * HIDDEN), jnp.bfloat16),  # wih_flat VMEM landing buffer
        pltpu.SemaphoreType.DMA((3,)),
    ]
    # No grid: single invocation; everything stays resident in VMEM (~1.7 MB).
    return pl.pallas_call(
        kernel,
        out_shape=out_shape,
        in_specs=in_specs,
        scratch_shapes=scratch,
    )(cols1_exp, aux, c0, mask2,
      kp["w1"], kp["w2"], kp["b2"], kp["b3"], kp["b4"],
      kp["w_aux"], kp["b_lstm"], kp["w_out"],
      kp["w3"], kp["w4"], kp["wih_flat"])


# ---------------------------------------------------------------------------
# Parameters: module-layout f32 params + conversion to the fused-kernel layout
# ---------------------------------------------------------------------------
def init_params(key):
    def nrm(k, shape, fan_in):
        return jax.random.normal(k, shape, jnp.float32) / jnp.sqrt(float(fan_in))
    ks = jax.random.split(key, 12)
    return {
        "w1": nrm(ks[0], (K1, K1, IN_CH, C1), K1 * K1 * IN_CH),   # HWIO
        "b1": nrm(ks[1], (C1,), C1),
        "w2": nrm(ks[2], (K2, K2, C1, C2), K2 * K2 * C1),
        "b2": nrm(ks[3], (C2,), C2),
        "w3": nrm(ks[4], (K2, K2, C2, C3), K2 * K2 * C2),
        "b3": nrm(ks[5], (C3,), C3),
        "w4": nrm(ks[6], (K2, K2, C3, C4), K2 * K2 * C3),
        "b4": nrm(ks[7], (C4,), C4),
        "w_ih_t": nrm(ks[8], (LSTM_IN, 4 * HIDDEN), LSTM_IN),     # LSTMCell weight_ih^T (i|f|g|o)
        "w_hh_t": nrm(ks[9], (HIDDEN, 4 * HIDDEN), HIDDEN),       # LSTMCell weight_hh^T
        "b_lstm": nrm(ks[10], (1, 4 * HIDDEN), HIDDEN),           # b_ih + b_hh combined
        "w_out_t": nrm(ks[11], (HIDDEN, ACTION_SPACE), HIDDEN),   # Linear(bias=False)^T
    }


def prepare_kernel_params(p):
    """Module-layout f32 params -> fused-kernel layout (bf16 weights, f32 biases)."""
    bf = lambda w: w.astype(jnp.bfloat16)
    w1 = jnp.zeros((COLS1_K_PAD, C1), jnp.float32)
    w1 = w1.at[:COLS1_K].set(p["w1"].reshape(COLS1_K, C1))
    w1 = w1.at[COLS1_K].set(p["b1"])                      # bias row hit by the ones-column
    w_aux = jnp.concatenate([
        p["w_ih_t"][FEATURE:FEATURE + ACTION_SPACE],      # pre_action rows
        p["w_ih_t"][FEATURE + ACTION_SPACE:],             # finish_tag rows
        p["w_hh_t"],                                      # recurrent rows
        jnp.zeros((AUX_PAD - LSTM_AUX, 4 * HIDDEN), jnp.float32),
    ], axis=0)
    return {
        "w1": bf(w1),
        "w2": bf(p["w2"].reshape(K2 * K2 * C1, C2)),
        "b2": p["b2"].reshape(1, C2),
        "w3": bf(p["w3"].reshape(K2 * K2 * C2, C3)),
        "b3": p["b3"].reshape(1, C3),
        # conv4's 1x1 output only reads taps (1..2, 1..2): dense (1024, 256) form.
        "w4": bf(p["w4"][1:3, 1:3].reshape(S3 * S3 * C3, C4)),
        "b4": p["b4"].reshape(1, C4),
        "wih_flat": bf(p["w_ih_t"][:FEATURE]),
        "w_aux": bf(w_aux),
        "b_lstm": p["b_lstm"],
        "w_out": bf(p["w_out_t"]),
    }


# ---------------------------------------------------------------------------
# Pure-JAX reference (module semantics; weights rounded to bf16 like the kernel)
# ---------------------------------------------------------------------------
def encoder_forward_ref(p, x_nchw, pre_action, finish_tag, h0, c0):
    rd = lambda w: w.astype(jnp.bfloat16).astype(jnp.float32)
    x = jnp.transpose(x_nchw, (0, 2, 3, 1))

    def conv(inp, w, bias, stride, pad, leaky):
        y = lax.conv_general_dilated(
            inp, rd(w), (stride, stride), [(pad, pad), (pad, pad)],
            dimension_numbers=("NHWC", "HWIO", "NHWC")) + bias
        return jnp.where(y > 0, y, LEAKY_SLOPE * y) if leaky else y

    c1 = conv(x, p["w1"], rd(p["b1"]), 2, 2, True)   # kernel folds b1 into bf16 w1
    c2 = conv(c1, p["w2"], p["b2"], 2, 1, True)
    c3 = conv(c2, p["w3"], p["b3"], 2, 1, True)
    c4 = conv(c3, p["w4"], p["b4"], 2, 1, False)
    b = x.shape[0]
    flat = jnp.transpose(c4, (0, 3, 1, 2)).reshape(b, -1)      # NCHW flatten
    feature = jnp.concatenate([flat, pre_action, finish_tag], axis=-1)
    gates = feature @ rd(p["w_ih_t"]) + h0 @ rd(p["w_hh_t"]) + p["b_lstm"]
    hh = h0.shape[-1]
    i = jax.nn.sigmoid(gates[:, :hh])
    f = jax.nn.sigmoid(gates[:, hh:2 * hh])
    g = jnp.tanh(gates[:, 2 * hh:3 * hh])
    o = jax.nn.sigmoid(gates[:, 3 * hh:4 * hh])
    c1s = f * c0 + i * g
    h1 = o * jnp.tanh(c1s)
    logits = h1 @ rd(p["w_out_t"])
    return logits, h1, c1s


# ---------------------------------------------------------------------------
# Driver
# ---------------------------------------------------------------------------
if __name__ == "__main__":
    batch = 2
    key = jax.random.PRNGKey(0)
    k_p, k_x, k_a, k_f, k_h, k_c = jax.random.split(key, 6)
    params = init_params(k_p)
    kparams = prepare_kernel_params(params)

    x = jax.random.normal(k_x, (batch, IN_CH, H_IN, W_IN), jnp.float32)
    pre_action = jax.random.normal(k_a, (batch, ACTION_SPACE), jnp.float32)
    finish_tag = jax.random.normal(k_f, (batch, MAX_NUM), jnp.float32)
    h_0 = jax.random.normal(k_h, (batch, HIDDEN), jnp.float32)
    c_0 = jax.random.normal(k_c, (batch, HIDDEN), jnp.float32)

    fwd = jax.jit(encoder_forward)
    logits, h_1, c_1 = fwd(kparams, x, pre_action, finish_tag, h_0, c_0)
    jax.block_until_ready((logits, h_1, c_1))

    ref_logits, ref_h1, ref_c1 = encoder_forward_ref(
        params, x, pre_action, finish_tag, h_0, c_0)

    assert logits.shape == (batch, ACTION_SPACE)
    assert h_1.shape == (batch, HIDDEN) and c_1.shape == (batch, HIDDEN)
    # Kernel: bf16 weights + bf16 matmul operands with f32 accumulation.
    # Reference: the same bf16-rounded weights in pure f32 math, so the residual
    # difference is only bf16 activation rounding.
    assert jnp.allclose(logits, ref_logits, rtol=2e-2, atol=2e-2)
    assert jnp.allclose(h_1, ref_h1, rtol=2e-2, atol=2e-2)
    assert jnp.allclose(c_1, ref_c1, rtol=2e-2, atol=2e-2)

    print("KERNEL_OK")
</pallas_src>

<mosaic_0001>
module attributes {stable_mosaic.version = 11 : i64} {
  func.func @_encoder_kernel(%arg0: memref<720x64xbf16, #tpu.memory_space<vmem>>, %arg1: memref<2x128xbf16, #tpu.memory_space<vmem>>, %arg2: memref<2x64xf32, #tpu.memory_space<vmem>>, %arg3: memref<72x1xf32, #tpu.memory_space<vmem>>, %arg4: memref<64x64xbf16, #tpu.memory_space<vmem>>, %arg5: memref<576x128xbf16, #tpu.memory_space<vmem>>, %arg6: memref<1x128xf32, #tpu.memory_space<vmem>>, %arg7: memref<1x256xf32, #tpu.memory_space<vmem>>, %arg8: memref<1x256xf32, #tpu.memory_space<vmem>>, %arg9: memref<128x256xbf16, #tpu.memory_space<vmem>>, %arg10: memref<1x256xf32, #tpu.memory_space<vmem>>, %arg11: memref<64x25xbf16, #tpu.memory_space<vmem>>, %arg12: memref<1152x256xbf16, #tpu.memory_space<any>>, %arg13: memref<1024x256xbf16, #tpu.memory_space<any>>, %arg14: memref<256x256xbf16, #tpu.memory_space<any>>, %arg15: memref<2x25xf32, #tpu.memory_space<vmem>>, %arg16: memref<2x64xf32, #tpu.memory_space<vmem>>, %arg17: memref<2x64xf32, #tpu.memory_space<vmem>>, %arg18: memref<72x576xbf16, #tpu.memory_space<vmem>>, %arg19: memref<8x1152xbf16, #tpu.memory_space<vmem>>, %arg20: memref<2x1024xbf16, #tpu.memory_space<vmem>>, %arg21: memref<1152x256xbf16, #tpu.memory_space<vmem>>, %arg22: memref<1024x256xbf16, #tpu.memory_space<vmem>>, %arg23: memref<256x256xbf16, #tpu.memory_space<vmem>>, %arg24: memref<3x!tpu.dma_semaphore, #tpu.memory_space<semaphore_mem>>) attributes {dimension_semantics = [], scalar_prefetch = 0 : i64, scratch_operands = 7 : i64, tpu.core_type = #tpu.core_type<tc>} {
    %c0_i32 = arith.constant 0 : i32
    %0 = tpu.memref_slice %arg24[%c0_i32] : memref<3x!tpu.dma_semaphore, #tpu.memory_space<semaphore_mem>> -> memref<1x!tpu.dma_semaphore, #tpu.memory_space<semaphore_mem>>
    %1 = tpu.memref_squeeze %0 : memref<1x!tpu.dma_semaphore, #tpu.memory_space<semaphore_mem>> -> memref<!tpu.dma_semaphore, #tpu.memory_space<semaphore_mem>>
    tpu.enqueue_dma source(%arg12 : memref<1152x256xbf16, #tpu.memory_space<any>>) target(%arg21 : memref<1152x256xbf16, #tpu.memory_space<vmem>>) target_semaphore(%1 : memref<!tpu.dma_semaphore, #tpu.memory_space<semaphore_mem>>)
    %c1_i32 = arith.constant 1 : i32
    %2 = tpu.memref_slice %arg24[%c1_i32] : memref<3x!tpu.dma_semaphore, #tpu.memory_space<semaphore_mem>> -> memref<1x!tpu.dma_semaphore, #tpu.memory_space<semaphore_mem>>
    %3 = tpu.memref_squeeze %2 : memref<1x!tpu.dma_semaphore, #tpu.memory_space<semaphore_mem>> -> memref<!tpu.dma_semaphore, #tpu.memory_space<semaphore_mem>>
    tpu.enqueue_dma source(%arg13 : memref<1024x256xbf16, #tpu.memory_space<any>>) target(%arg22 : memref<1024x256xbf16, #tpu.memory_space<vmem>>) target_semaphore(%3 : memref<!tpu.dma_semaphore, #tpu.memory_space<semaphore_mem>>)
    %c2_i32 = arith.constant 2 : i32
    %4 = tpu.memref_slice %arg24[%c2_i32] : memref<3x!tpu.dma_semaphore, #tpu.memory_space<semaphore_mem>> -> memref<1x!tpu.dma_semaphore, #tpu.memory_space<semaphore_mem>>
    %5 = tpu.memref_squeeze %4 : memref<1x!tpu.dma_semaphore, #tpu.memory_space<semaphore_mem>> -> memref<!tpu.dma_semaphore, #tpu.memory_space<semaphore_mem>>
    tpu.enqueue_dma source(%arg14 : memref<256x256xbf16, #tpu.memory_space<any>>) target(%arg23 : memref<256x256xbf16, #tpu.memory_space<vmem>>) target_semaphore(%5 : memref<!tpu.dma_semaphore, #tpu.memory_space<semaphore_mem>>)
    %c0 = arith.constant 0 : index
    %c0_0 = arith.constant 0 : index
    %6 = vector.load %arg0[%c0, %c0_0] : memref<720x64xbf16, #tpu.memory_space<vmem>>, vector<72x64xbf16>
    %c0_1 = arith.constant 0 : index
    %c0_2 = arith.constant 0 : index
    %7 = vector.load %arg4[%c0_1, %c0_2] : memref<64x64xbf16, #tpu.memory_space<vmem>>, vector<64x64xbf16>
    %cst = arith.constant dense<0.000000e+00> : vector<72x64xf32>
    %8 = tpu.matmul %6, %7, %cst {dimension_numbers = #tpu.dot_dimension_numbers<[1], [0], [0], [1], [0, 0, 1, 1], [], []>} : vector<72x64xbf16>, vector<64x64xbf16>, vector<72x64xf32> -> vector<72x64xf32>
    %cst_3 = arith.constant 0.000000e+00 : f32
    %9 = vector.broadcast %cst_3 : f32 to vector<72x64xf32>
    %10 = arith.cmpf ogt, %8, %9 : vector<72x64xf32>
    %cst_4 = arith.constant 0.00999999977 : f32
    %11 = vector.broadcast %cst_4 : f32 to vector<72x64xf32>
    %12 = arith.mulf %11, %8 : vector<72x64xf32>
    %13 = arith.select %10, %8, %12 : vector<72x64xi1>, vector<72x64xf32>
    %14 = arith.truncf %13 : vector<72x64xf32> to vector<72x64xbf16>
    %c0_5 = arith.constant 0 : index
    %c0_6 = arith.constant 0 : index
    %15 = vector.load %arg18[%c0_5, %c0_6] : memref<72x576xbf16, #tpu.memory_space<vmem>>, vector<72x64xbf16>
    tpu.vector_store %arg18[%c0_5, %c0_6], %14 {strides = array<i32>} : memref<72x576xbf16, #tpu.memory_space<vmem>>, vector<72x64xbf16>,
    %c80 = arith.constant 80 : index
    %c0_7 = arith.constant 0 : index
    %16 = vector.load %arg0[%c80, %c0_7] : memref<720x64xbf16, #tpu.memory_space<vmem>>, vector<72x64xbf16>
    %c0_8 = arith.constant 0 : index
    %c0_9 = arith.constant 0 : index
    %17 = vector.load %arg4[%c0_8, %c0_9] : memref<64x64xbf16, #tpu.memory_space<vmem>>, vector<64x64xbf16>
    %cst_10 = arith.constant dense<0.000000e+00> : vector<72x64xf32>
    %18 = tpu.matmul %16, %17, %cst_10 {dimension_numbers = #tpu.dot_dimension_numbers<[1], [0], [0], [1], [0, 0, 1, 1], [], []>} : vector<72x64xbf16>, vector<64x64xbf16>, vector<72x64xf32> -> vector<72x64xf32>
    %cst_11 = arith.constant 0.000000e+00 : f32
    %19 = vector.broadcast %cst_11 : f32 to vector<72x64xf32>
    %20 = arith.cmpf ogt, %18, %19 : vector<72x64xf32>
    %cst_12 = arith.constant 0.00999999977 : f32
    %21 = vector.broadcast %cst_12 : f32 to vector<72x64xf32>
    %22 = arith.mulf %21, %18 : vector<72x64xf32>
    %23 = arith.select %20, %18, %22 : vector<72x64xi1>, vector<72x64xf32>
    %24 = arith.truncf %23 : vector<72x64xf32> to vector<72x64xbf16>
    %c0_13 = arith.constant 0 : index
    %c64 = arith.constant 64 : index
    %25 = vector.load %arg18[%c0_13, %c64] : memref<72x576xbf16, #tpu.memory_space<vmem>>, vector<72x64xbf16>
    tpu.vector_store %arg18[%c0_13, %c64], %24 {strides = array<i32>} : memref<72x576xbf16, #tpu.memory_space<vmem>>, vector<72x64xbf16>,
    %c160 = arith.constant 160 : index
    %c0_14 = arith.constant 0 : index
    %26 = vector.load %arg0[%c160, %c0_14] : memref<720x64xbf16, #tpu.memory_space<vmem>>, vector<72x64xbf16>
    %c0_15 = arith.constant 0 : index
    %c0_16 = arith.constant 0 : index
    %27 = vector.load %arg4[%c0_15, %c0_16] : memref<64x64xbf16, #tpu.memory_space<vmem>>, vector<64x64xbf16>
    %cst_17 = arith.constant dense<0.000000e+00> : vector<72x64xf32>
    %28 = tpu.matmul %26, %27, %cst_17 {dimension_numbers = #tpu.dot_dimension_numbers<[1], [0], [0], [1], [0, 0, 1, 1], [], []>} : vector<72x64xbf16>, vector<64x64xbf16>, vector<72x64xf32> -> vector<72x64xf32>
    %cst_18 = arith.constant 0.000000e+00 : f32
    %29 = vector.broadcast %cst_18 : f32 to vector<72x64xf32>
    %30 = arith.cmpf ogt, %28, %29 : vector<72x64xf32>
    %cst_19 = arith.constant 0.00999999977 : f32
    %31 = vector.broadcast %cst_19 : f32 to vector<72x64xf32>
    %32 = arith.mulf %31, %28 : vector<72x64xf32>
    %33 = arith.select %30, %28, %32 : vector<72x64xi1>, vector<72x64xf32>
    %34 = arith.truncf %33 : vector<72x64xf32> to vector<72x64xbf16>
    %c0_20 = arith.constant 0 : index
    %c128 = arith.constant 128 : index
    %35 = vector.load %arg18[%c0_20, %c128] : memref<72x576xbf16, #tpu.memory_space<vmem>>, vector<72x64xbf16>
    tpu.vector_store %arg18[%c0_20, %c128], %34 {strides = array<i32>} : memref<72x576xbf16, #tpu.memory_space<vmem>>, vector<72x64xbf16>,
    %c240 = arith.constant 240 : index
    %c0_21 = arith.constant 0 : index
    %36 = vector.load %arg0[%c240, %c0_21] : memref<720x64xbf16, #tpu.memory_space<vmem>>, vector<72x64xbf16>
    %c0_22 = arith.constant 0 : index
    %c0_23 = arith.constant 0 : index
    %37 = vector.load %arg4[%c0_22, %c0_23] : memref<64x64xbf16, #tpu.memory_space<vmem>>, vector<64x64xbf16>
    %cst_24 = arith.constant dense<0.000000e+00> : vector<72x64xf32>
    %38 = tpu.matmul %36, %37, %cst_24 {dimension_numbers = #tpu.dot_dimension_numbers<[1], [0], [0], [1], [0, 0, 1, 1], [], []>} : vector<72x64xbf16>, vector<64x64xbf16>, vector<72x64xf32> -> vector<72x64xf32>
    %cst_25 = arith.constant 0.000000e+00 : f32
    %39 = vector.broadcast %cst_25 : f32 to vector<72x64xf32>
    %40 = arith.cmpf ogt, %38, %39 : vector<72x64xf32>
    %cst_26 = arith.constant 0.00999999977 : f32
    %41 = vector.broadcast %cst_26 : f32 to vector<72x64xf32>
    %42 = arith.mulf %41, %38 : vector<72x64xf32>
    %43 = arith.select %40, %38, %42 : vector<72x64xi1>, vector<72x64xf32>
    %44 = arith.truncf %43 : vector<72x64xf32> to vector<72x64xbf16>
    %c0_27 = arith.constant 0 : index
    %c192 = arith.constant 192 : index
    %45 = vector.load %arg18[%c0_27, %c192] : memref<72x576xbf16, #tpu.memory_space<vmem>>, vector<72x64xbf16>
    tpu.vector_store %arg18[%c0_27, %c192], %44 {strides = array<i32>} : memref<72x576xbf16, #tpu.memory_space<vmem>>, vector<72x64xbf16>,
    %c320 = arith.constant 320 : index
    %c0_28 = arith.constant 0 : index
    %46 = vector.load %arg0[%c320, %c0_28] : memref<720x64xbf16, #tpu.memory_space<vmem>>, vector<72x64xbf16>
    %c0_29 = arith.constant 0 : index
    %c0_30 = arith.constant 0 : index
    %47 = vector.load %arg4[%c0_29, %c0_30] : memref<64x64xbf16, #tpu.memory_space<vmem>>, vector<64x64xbf16>
    %cst_31 = arith.constant dense<0.000000e+00> : vector<72x64xf32>
    %48 = tpu.matmul %46, %47, %cst_31 {dimension_numbers = #tpu.dot_dimension_numbers<[1], [0], [0], [1], [0, 0, 1, 1], [], []>} : vector<72x64xbf16>, vector<64x64xbf16>, vector<72x64xf32> -> vector<72x64xf32>
    %cst_32 = arith.constant 0.000000e+00 : f32
    %49 = vector.broadcast %cst_32 : f32 to vector<72x64xf32>
    %50 = arith.cmpf ogt, %48, %49 : vector<72x64xf32>
    %cst_33 = arith.constant 0.00999999977 : f32
    %51 = vector.broadcast %cst_33 : f32 to vector<72x64xf32>
    %52 = arith.mulf %51, %48 : vector<72x64xf32>
    %53 = arith.select %50, %48, %52 : vector<72x64xi1>, vector<72x64xf32>
    %54 = arith.truncf %53 : vector<72x64xf32> to vector<72x64xbf16>
    %c0_34 = arith.constant 0 : index
    %c256 = arith.constant 256 : index
    %55 = vector.load %arg18[%c0_34, %c256] : memref<72x576xbf16, #tpu.memory_space<vmem>>, vector<72x64xbf16>
    tpu.vector_store %arg18[%c0_34, %c256], %54 {strides = array<i32>} : memref<72x576xbf16, #tpu.memory_space<vmem>>, vector<72x64xbf16>,
    %c400 = arith.constant 400 : index
    %c0_35 = arith.constant 0 : index
    %56 = vector.load %arg0[%c400, %c0_35] : memref<720x64xbf16, #tpu.memory_space<vmem>>, vector<72x64xbf16>
    %c0_36 = arith.constant 0 : index
    %c0_37 = arith.constant 0 : index
    %57 = vector.load %arg4[%c0_36, %c0_37] : memref<64x64xbf16, #tpu.memory_space<vmem>>, vector<64x64xbf16>
    %cst_38 = arith.constant dense<0.000000e+00> : vector<72x64xf32>
    %58 = tpu.matmul %56, %57, %cst_38 {dimension_numbers = #tpu.dot_dimension_numbers<[1], [0], [0], [1], [0, 0, 1, 1], [], []>} : vector<72x64xbf16>, vector<64x64xbf16>, vector<72x64xf32> -> vector<72x64xf32>
    %cst_39 = arith.constant 0.000000e+00 : f32
    %59 = vector.broadcast %cst_39 : f32 to vector<72x64xf32>
    %60 = arith.cmpf ogt, %58, %59 : vector<72x64xf32>
    %cst_40 = arith.constant 0.00999999977 : f32
    %61 = vector.broadcast %cst_40 : f32 to vector<72x64xf32>
    %62 = arith.mulf %61, %58 : vector<72x64xf32>
    %63 = arith.select %60, %58, %62 : vector<72x64xi1>, vector<72x64xf32>
    %64 = arith.truncf %63 : vector<72x64xf32> to vector<72x64xbf16>
    %c0_41 = arith.constant 0 : index
    %c320_42 = arith.constant 320 : index
    %65 = vector.load %arg18[%c0_41, %c320_42] : memref<72x576xbf16, #tpu.memory_space<vmem>>, vector<72x64xbf16>
    tpu.vector_store %arg18[%c0_41, %c320_42], %64 {strides = array<i32>} : memref<72x576xbf16, #tpu.memory_space<vmem>>, vector<72x64xbf16>,
    %c480 = arith.constant 480 : index
    %c0_43 = arith.constant 0 : index
    %66 = vector.load %arg0[%c480, %c0_43] : memref<720x64xbf16, #tpu.memory_space<vmem>>, vector<72x64xbf16>
    %c0_44 = arith.constant 0 : index
    %c0_45 = arith.constant 0 : index
    %67 = vector.load %arg4[%c0_44, %c0_45] : memref<64x64xbf16, #tpu.memory_space<vmem>>, vector<64x64xbf16>
    %cst_46 = arith.constant dense<0.000000e+00> : vector<72x64xf32>
    %68 = tpu.matmul %66, %67, %cst_46 {dimension_numbers = #tpu.dot_dimension_numbers<[1], [0], [0], [1], [0, 0, 1, 1], [], []>} : vector<72x64xbf16>, vector<64x64xbf16>, vector<72x64xf32> -> vector<72x64xf32>
    %cst_47 = arith.constant 0.000000e+00 : f32
    %69 = vector.broadcast %cst_47 : f32 to vector<72x64xf32>
    %70 = arith.cmpf ogt, %68, %69 : vector<72x64xf32>
    %cst_48 = arith.constant 0.00999999977 : f32
    %71 = vector.broadcast %cst_48 : f32 to vector<72x64xf32>
    %72 = arith.mulf %71, %68 : vector<72x64xf32>
    %73 = arith.select %70, %68, %72 : vector<72x64xi1>, vector<72x64xf32>
    %74 = arith.truncf %73 : vector<72x64xf32> to vector<72x64xbf16>
    %c0_49 = arith.constant 0 : index
    %c384 = arith.constant 384 : index
    %75 = vector.load %arg18[%c0_49, %c384] : memref<72x576xbf16, #tpu.memory_space<vmem>>, vector<72x64xbf16>
    tpu.vector_store %arg18[%c0_49, %c384], %74 {strides = array<i32>} : memref<72x576xbf16, #tpu.memory_space<vmem>>, vector<72x64xbf16>,
    %c560 = arith.constant 560 : index
    %c0_50 = arith.constant 0 : index
    %76 = vector.load %arg0[%c560, %c0_50] : memref<720x64xbf16, #tpu.memory_space<vmem>>, vector<72x64xbf16>
    %c0_51 = arith.constant 0 : index
    %c0_52 = arith.constant 0 : index
    %77 = vector.load %arg4[%c0_51, %c0_52] : memref<64x64xbf16, #tpu.memory_space<vmem>>, vector<64x64xbf16>
    %cst_53 = arith.constant dense<0.000000e+00> : vector<72x64xf32>
    %78 = tpu.matmul %76, %77, %cst_53 {dimension_numbers = #tpu.dot_dimension_numbers<[1], [0], [0], [1], [0, 0, 1, 1], [], []>} : vector<72x64xbf16>, vector<64x64xbf16>, vector<72x64xf32> -> vector<72x64xf32>
    %cst_54 = arith.constant 0.000000e+00 : f32
    %79 = vector.broadcast %cst_54 : f32 to vector<72x64xf32>
    %80 = arith.cmpf ogt, %78, %79 : vector<72x64xf32>
    %cst_55 = arith.constant 0.00999999977 : f32
    %81 = vector.broadcast %cst_55 : f32 to vector<72x64xf32>
    %82 = arith.mulf %81, %78 : vector<72x64xf32>
    %83 = arith.select %80, %78, %82 : vector<72x64xi1>, vector<72x64xf32>
    %84 = arith.truncf %83 : vector<72x64xf32> to vector<72x64xbf16>
    %c0_56 = arith.constant 0 : index
    %c448 = arith.constant 448 : index
    %85 = vector.load %arg18[%c0_56, %c448] : memref<72x576xbf16, #tpu.memory_space<vmem>>, vector<72x64xbf16>
    tpu.vector_store %arg18[%c0_56, %c448], %84 {strides = array<i32>} : memref<72x576xbf16, #tpu.memory_space<vmem>>, vector<72x64xbf16>,
    %c640 = arith.constant 640 : index
    %c0_57 = arith.constant 0 : index
    %86 = vector.load %arg0[%c640, %c0_57] : memref<720x64xbf16, #tpu.memory_space<vmem>>, vector<72x64xbf16>
    %c0_58 = arith.constant 0 : index
    %c0_59 = arith.constant 0 : index
    %87 = vector.load %arg4[%c0_58, %c0_59] : memref<64x64xbf16, #tpu.memory_space<vmem>>, vector<64x64xbf16>
    %cst_60 = arith.constant dense<0.000000e+00> : vector<72x64xf32>
    %88 = tpu.matmul %86, %87, %cst_60 {dimension_numbers = #tpu.dot_dimension_numbers<[1], [0], [0], [1], [0, 0, 1, 1], [], []>} : vector<72x64xbf16>, vector<64x64xbf16>, vector<72x64xf32> -> vector<72x64xf32>
    %cst_61 = arith.constant 0.000000e+00 : f32
    %89 = vector.broadcast %cst_61 : f32 to vector<72x64xf32>
    %90 = arith.cmpf ogt, %88, %89 : vector<72x64xf32>
    %cst_62 = arith.constant 0.00999999977 : f32
    %91 = vector.broadcast %cst_62 : f32 to vector<72x64xf32>
    %92 = arith.mulf %91, %88 : vector<72x64xf32>
    %93 = arith.select %90, %88, %92 : vector<72x64xi1>, vector<72x64xf32>
    %94 = arith.truncf %93 : vector<72x64xf32> to vector<72x64xbf16>
    %c0_63 = arith.constant 0 : index
    %c512 = arith.constant 512 : index
    %95 = vector.load %arg18[%c0_63, %c512] : memref<72x576xbf16, #tpu.memory_space<vmem>>, vector<72x64xbf16>
    tpu.vector_store %arg18[%c0_63, %c512], %94 {strides = array<i32>} : memref<72x576xbf16, #tpu.memory_space<vmem>>, vector<72x64xbf16>,
    %c0_64 = arith.constant 0 : index
    %c0_65 = arith.constant 0 : index
    %96 = vector.load %arg18[%c0_64, %c0_65] : memref<72x576xbf16, #tpu.memory_space<vmem>>, vector<72x576xbf16>
    %c0_66 = arith.constant 0 : index
    %c0_67 = arith.constant 0 : index
    %97 = vector.load %arg5[%c0_66, %c0_67] : memref<576x128xbf16, #tpu.memory_space<vmem>>, vector<576x128xbf16>
    %cst_68 = arith.constant dense<0.000000e+00> : vector<72x128xf32>
    %98 = tpu.matmul %96, %97, %cst_68 {dimension_numbers = #tpu.dot_dimension_numbers<[1], [0], [0], [1], [0, 0, 1, 1], [], []>} : vector<72x576xbf16>, vector<576x128xbf16>, vector<72x128xf32> -> vector<72x128xf32>
    %c0_69 = arith.constant 0 : index
    %c0_70 = arith.constant 0 : index
    %99 = vector.load %arg6[%c0_69, %c0_70] : memref<1x128xf32, #tpu.memory_space<vmem>>, vector<1x128xf32>
    %100 = vector.broadcast %99 : vector<1x128xf32> to vector<72x128xf32>
    %101 = arith.addf %98, %100 : vector<72x128xf32>
    %cst_71 = arith.constant 0.000000e+00 : f32
    %102 = vector.broadcast %cst_71 : f32 to vector<72x128xf32>
    %103 = arith.cmpf ogt, %101, %102 : vector<72x128xf32>
    %cst_72 = arith.constant 0.00999999977 : f32
    %104 = vector.broadcast %cst_72 : f32 to vector<72x128xf32>
    %105 = arith.mulf %104, %101 : vector<72x128xf32>
    %106 = arith.select %103, %101, %105 : vector<72x128xi1>, vector<72x128xf32>
    %c0_73 = arith.constant 0 : index
    %c0_74 = arith.constant 0 : index
    %107 = vector.load %arg3[%c0_73, %c0_74] : memref<72x1xf32, #tpu.memory_space<vmem>>, vector<72x1xf32>
    %108 = vector.broadcast %107 : vector<72x1xf32> to vector<72x128xf32>
    %109 = arith.mulf %106, %108 : vector<72x128xf32>
    %110 = vector.extract_strided_slice %109 {offsets = [0, 0], sizes = [8, 128], strides = [1, 1]} : vector<72x128xf32> to vector<8x128xf32>
    %111 = arith.truncf %110 : vector<8x128xf32> to vector<8x128xbf16>
    %c0_75 = arith.constant 0 : index
    %c0_76 = arith.constant 0 : index
    %112 = vector.load %arg19[%c0_75, %c0_76] : memref<8x1152xbf16, #tpu.memory_space<vmem>>, vector<8x128xbf16>
    tpu.vector_store %arg19[%c0_75, %c0_76], %111 {strides = array<i32>} : memref<8x1152xbf16, #tpu.memory_space<vmem>>, vector<8x128xbf16>,
    %113 = vector.extract_strided_slice %109 {offsets = [8, 0], sizes = [8, 128], strides = [1, 1]} : vector<72x128xf32> to vector<8x128xf32>
    %114 = arith.truncf %113 : vector<8x128xf32> to vector<8x128xbf16>
    %c0_77 = arith.constant 0 : index
    %c128_78 = arith.constant 128 : index
    %115 = vector.load %arg19[%c0_77, %c128_78] : memref<8x1152xbf16, #tpu.memory_space<vmem>>, vector<8x128xbf16>
    tpu.vector_store %arg19[%c0_77, %c128_78], %114 {strides = array<i32>} : memref<8x1152xbf16, #tpu.memory_space<vmem>>, vector<8x128xbf16>,
    %116 = vector.extract_strided_slice %109 {offsets = [16, 0], sizes = [8, 128], strides = [1, 1]} : vector<72x128xf32> to vector<8x128xf32>
    %117 = arith.truncf %116 : vector<8x128xf32> to vector<8x128xbf16>
    %c0_79 = arith.constant 0 : index
    %c256_80 = arith.constant 256 : index
    %118 = vector.load %arg19[%c0_79, %c256_80] : memref<8x1152xbf16, #tpu.memory_space<vmem>>, vector<8x128xbf16>
    tpu.vector_store %arg19[%c0_79, %c256_80], %117 {strides = array<i32>} : memref<8x1152xbf16, #tpu.memory_space<vmem>>, vector<8x128xbf16>,
    %119 = vector.extract_strided_slice %109 {offsets = [24, 0], sizes = [8, 128], strides = [1, 1]} : vector<72x128xf32> to vector<8x128xf32>
    %120 = arith.truncf %119 : vector<8x128xf32> to vector<8x128xbf16>
    %c0_81 = arith.constant 0 : index
    %c384_82 = arith.constant 384 : index
    %121 = vector.load %arg19[%c0_81, %c384_82] : memref<8x1152xbf16, #tpu.memory_space<vmem>>, vector<8x128xbf16>
    tpu.vector_store %arg19[%c0_81, %c384_82], %120 {strides = array<i32>} : memref<8x1152xbf16, #tpu.memory_space<vmem>>, vector<8x128xbf16>,
    %122 = vector.extract_strided_slice %109 {offsets = [32, 0], sizes = [8, 128], strides = [1, 1]} : vector<72x128xf32> to vector<8x128xf32>
    %123 = arith.truncf %122 : vector<8x128xf32> to vector<8x128xbf16>
    %c0_83 = arith.constant 0 : index
    %c512_84 = arith.constant 512 : index
    %124 = vector.load %arg19[%c0_83, %c512_84] : memref<8x1152xbf16, #tpu.memory_space<vmem>>, vector<8x128xbf16>
    tpu.vector_store %arg19[%c0_83, %c512_84], %123 {strides = array<i32>} : memref<8x1152xbf16, #tpu.memory_space<vmem>>, vector<8x128xbf16>,
    %125 = vector.extract_strided_slice %109 {offsets = [40, 0], sizes = [8, 128], strides = [1, 1]} : vector<72x128xf32> to vector<8x128xf32>
    %126 = arith.truncf %125 : vector<8x128xf32> to vector<8x128xbf16>
    %c0_85 = arith.constant 0 : index
    %c640_86 = arith.constant 640 : index
    %127 = vector.load %arg19[%c0_85, %c640_86] : memref<8x1152xbf16, #tpu.memory_space<vmem>>, vector<8x128xbf16>
    tpu.vector_store %arg19[%c0_85, %c640_86], %126 {strides = array<i32>} : memref<8x1152xbf16, #tpu.memory_space<vmem>>, vector<8x128xbf16>,
    %128 = vector.extract_strided_slice %109 {offsets = [48, 0], sizes = [8, 128], strides = [1, 1]} : vector<72x128xf32> to vector<8x128xf32>
    %129 = arith.truncf %128 : vector<8x128xf32> to vector<8x128xbf16>
    %c0_87 = arith.constant 0 : index
    %c768 = arith.constant 768 : index
    %130 = vector.load %arg19[%c0_87, %c768] : memref<8x1152xbf16, #tpu.memory_space<vmem>>, vector<8x128xbf16>
    tpu.vector_store %arg19[%c0_87, %c768], %129 {strides = array<i32>} : memref<8x1152xbf16, #tpu.memory_space<vmem>>, vector<8x128xbf16>,
    %131 = vector.extract_strided_slice %109 {offsets = [56, 0], sizes = [8, 128], strides = [1, 1]} : vector<72x128xf32> to vector<8x128xf32>
    %132 = arith.truncf %131 : vector<8x128xf32> to vector<8x128xbf16>
    %c0_88 = arith.constant 0 : index
    %c896 = arith.constant 896 : index
    %133 = vector.load %arg19[%c0_88, %c896] : memref<8x1152xbf16, #tpu.memory_space<vmem>>, vector<8x128xbf16>
    tpu.vector_store %arg19[%c0_88, %c896], %132 {strides = array<i32>} : memref<8x1152xbf16, #tpu.memory_space<vmem>>, vector<8x128xbf16>,
    %134 = vector.extract_strided_slice %109 {offsets = [64, 0], sizes = [8, 128], strides = [1, 1]} : vector<72x128xf32> to vector<8x128xf32>
    %135 = arith.truncf %134 : vector<8x128xf32> to vector<8x128xbf16>
    %c0_89 = arith.constant 0 : index
    %c1024 = arith.constant 1024 : index
    %136 = vector.load %arg19[%c0_89, %c1024] : memref<8x1152xbf16, #tpu.memory_space<vmem>>, vector<8x128xbf16>
    tpu.vector_store %arg19[%c0_89, %c1024], %135 {strides = array<i32>} : memref<8x1152xbf16, #tpu.memory_space<vmem>>, vector<8x128xbf16>,
    %c0_i32_90 = arith.constant 0 : i32
    %137 = tpu.memref_slice %arg24[%c0_i32_90] : memref<3x!tpu.dma_semaphore, #tpu.memory_space<semaphore_mem>> -> memref<1x!tpu.dma_semaphore, #tpu.memory_space<semaphore_mem>>
    %138 = tpu.memref_squeeze %137 : memref<1x!tpu.dma_semaphore, #tpu.memory_space<semaphore_mem>> -> memref<!tpu.dma_semaphore, #tpu.memory_space<semaphore_mem>>
    tpu.wait_dma2 semaphore(%138 : memref<!tpu.dma_semaphore, #tpu.memory_space<semaphore_mem>>) src(%arg12 : memref<1152x256xbf16, #tpu.memory_space<any>>) dst(%arg21 : memref<1152x256xbf16, #tpu.memory_space<vmem>>)
    %c0_91 = arith.constant 0 : index
    %c0_92 = arith.constant 0 : index
    %139 = vector.load %arg19[%c0_91, %c0_92] : memref<8x1152xbf16, #tpu.memory_space<vmem>>, vector<8x1152xbf16>
    %c0_93 = arith.constant 0 : index
    %c0_94 = arith.constant 0 : index
    %140 = vector.load %arg21[%c0_93, %c0_94] : memref<1152x256xbf16, #tpu.memory_space<vmem>>, vector<1152x256xbf16>
    %cst_95 = arith.constant dense<0.000000e+00> : vector<8x256xf32>
    %141 = tpu.matmul %139, %140, %cst_95 {dimension_numbers = #tpu.dot_dimension_numbers<[1], [0], [0], [1], [0, 0, 1, 1], [], []>} : vector<8x1152xbf16>, vector<1152x256xbf16>, vector<8x256xf32> -> vector<8x256xf32>
    %c0_96 = arith.constant 0 : index
    %c0_97 = arith.constant 0 : index
    %142 = vector.load %arg7[%c0_96, %c0_97] : memref<1x256xf32, #tpu.memory_space<vmem>>, vector<1x256xf32>
    %143 = vector.broadcast %142 : vector<1x256xf32> to vector<8x256xf32>
    %144 = arith.addf %141, %143 : vector<8x256xf32>
    %cst_98 = arith.constant 0.000000e+00 : f32
    %145 = vector.broadcast %cst_98 : f32 to vector<8x256xf32>
    %146 = arith.cmpf ogt, %144, %145 : vector<8x256xf32>
    %cst_99 = arith.constant 0.00999999977 : f32
    %147 = vector.broadcast %cst_99 : f32 to vector<8x256xf32>
    %148 = arith.mulf %147, %144 : vector<8x256xf32>
    %149 = arith.select %146, %144, %148 : vector<8x256xi1>, vector<8x256xf32>
    %150 = vector.extract_strided_slice %149 {offsets = [0, 0], sizes = [2, 256], strides = [1, 1]} : vector<8x256xf32> to vector<2x256xf32>
    %151 = arith.truncf %150 : vector<2x256xf32> to vector<2x256xbf16>
    %c0_100 = arith.constant 0 : index
    %c0_101 = arith.constant 0 : index
    %152 = vector.load %arg20[%c0_100, %c0_101] : memref<2x1024xbf16, #tpu.memory_space<vmem>>, vector<2x256xbf16>
    tpu.vector_store %arg20[%c0_100, %c0_101], %151 {strides = array<i32>} : memref<2x1024xbf16, #tpu.memory_space<vmem>>, vector<2x256xbf16>,
    %153 = vector.extract_strided_slice %149 {offsets = [2, 0], sizes = [2, 256], strides = [1, 1]} : vector<8x256xf32> to vector<2x256xf32>
    %154 = arith.truncf %153 : vector<2x256xf32> to vector<2x256xbf16>
    %c0_102 = arith.constant 0 : index
    %c256_103 = arith.constant 256 : index
    %155 = vector.load %arg20[%c0_102, %c256_103] : memref<2x1024xbf16, #tpu.memory_space<vmem>>, vector<2x256xbf16>
    tpu.vector_store %arg20[%c0_102, %c256_103], %154 {strides = array<i32>} : memref<2x1024xbf16, #tpu.memory_space<vmem>>, vector<2x256xbf16>,
    %156 = vector.extract_strided_slice %149 {offsets = [4, 0], sizes = [2, 256], strides = [1, 1]} : vector<8x256xf32> to vector<2x256xf32>
    %157 = arith.truncf %156 : vector<2x256xf32> to vector<2x256xbf16>
    %c0_104 = arith.constant 0 : index
    %c512_105 = arith.constant 512 : index
    %158 = vector.load %arg20[%c0_104, %c512_105] : memref<2x1024xbf16, #tpu.memory_space<vmem>>, vector<2x256xbf16>
    tpu.vector_store %arg20[%c0_104, %c512_105], %157 {strides = array<i32>} : memref<2x1024xbf16, #tpu.memory_space<vmem>>, vector<2x256xbf16>,
    %159 = vector.extract_strided_slice %149 {offsets = [6, 0], sizes = [2, 256], strides = [1, 1]} : vector<8x256xf32> to vector<2x256xf32>
    %160 = arith.truncf %159 : vector<2x256xf32> to vector<2x256xbf16>
    %c0_106 = arith.constant 0 : index
    %c768_107 = arith.constant 768 : index
    %161 = vector.load %arg20[%c0_106, %c768_107] : memref<2x1024xbf16, #tpu.memory_space<vmem>>, vector<2x256xbf16>
    tpu.vector_store %arg20[%c0_106, %c768_107], %160 {strides = array<i32>} : memref<2x1024xbf16, #tpu.memory_space<vmem>>, vector<2x256xbf16>,
    %c1_i32_108 = arith.constant 1 : i32
    %162 = tpu.memref_slice %arg24[%c1_i32_108] : memref<3x!tpu.dma_semaphore, #tpu.memory_space<semaphore_mem>> -> memref<1x!tpu.dma_semaphore, #tpu.memory_space<semaphore_mem>>
    %163 = tpu.memref_squeeze %162 : memref<1x!tpu.dma_semaphore, #tpu.memory_space<semaphore_mem>> -> memref<!tpu.dma_semaphore, #tpu.memory_space<semaphore_mem>>
    tpu.wait_dma2 semaphore(%163 : memref<!tpu.dma_semaphore, #tpu.memory_space<semaphore_mem>>) src(%arg13 : memref<1024x256xbf16, #tpu.memory_space<any>>) dst(%arg22 : memref<1024x256xbf16, #tpu.memory_space<vmem>>)
    %c0_109 = arith.constant 0 : index
    %c0_110 = arith.constant 0 : index
    %164 = vector.load %arg20[%c0_109, %c0_110] : memref<2x1024xbf16, #tpu.memory_space<vmem>>, vector<2x1024xbf16>
    %c0_111 = arith.constant 0 : index
    %c0_112 = arith.constant 0 : index
    %165 = vector.load %arg22[%c0_111, %c0_112] : memref<1024x256xbf16, #tpu.memory_space<vmem>>, vector<1024x256xbf16>
    %cst_113 = arith.constant dense<0.000000e+00> : vector<2x256xf32>
    %166 = tpu.matmul %164, %165, %cst_113 {dimension_numbers = #tpu.dot_dimension_numbers<[1], [0], [0], [1], [0, 0, 1, 1], [], []>} : vector<2x1024xbf16>, vector<1024x256xbf16>, vector<2x256xf32> -> vector<2x256xf32>
    %c0_114 = arith.constant 0 : index
    %c0_115 = arith.constant 0 : index
    %167 = vector.load %arg8[%c0_114, %c0_115] : memref<1x256xf32, #tpu.memory_space<vmem>>, vector<1x256xf32>
    %168 = vector.broadcast %167 : vector<1x256xf32> to vector<2x256xf32>
    %169 = arith.addf %166, %168 : vector<2x256xf32>
    %c2_i32_116 = arith.constant 2 : i32
    %170 = tpu.memref_slice %arg24[%c2_i32_116] : memref<3x!tpu.dma_semaphore, #tpu.memory_space<semaphore_mem>> -> memref<1x!tpu.dma_semaphore, #tpu.memory_space<semaphore_mem>>
    %171 = tpu.memref_squeeze %170 : memref<1x!tpu.dma_semaphore, #tpu.memory_space<semaphore_mem>> -> memref<!tpu.dma_semaphore, #tpu.memory_space<semaphore_mem>>
    tpu.wait_dma2 semaphore(%171 : memref<!tpu.dma_semaphore, #tpu.memory_space<semaphore_mem>>) src(%arg14 : memref<256x256xbf16, #tpu.memory_space<any>>) dst(%arg23 : memref<256x256xbf16, #tpu.memory_space<vmem>>)
    %172 = arith.truncf %169 : vector<2x256xf32> to vector<2x256xbf16>
    %c0_117 = arith.constant 0 : index
    %c0_118 = arith.constant 0 : index
    %173 = vector.load %arg23[%c0_117, %c0_118] : memref<256x256xbf16, #tpu.memory_space<vmem>>, vector<256x256xbf16>
    %cst_119 = arith.constant dense<0.000000e+00> : vector<2x256xf32>
    %174 = tpu.matmul %172, %173, %cst_119 {dimension_numbers = #tpu.dot_dimension_numbers<[1], [0], [0], [1], [0, 0, 1, 1], [], []>} : vector<2x256xbf16>, vector<256x256xbf16>, vector<2x256xf32> -> vector<2x256xf32>
    %c0_120 = arith.constant 0 : index
    %c0_121 = arith.constant 0 : index
    %175 = vector.load %arg1[%c0_120, %c0_121] : memref<2x128xbf16, #tpu.memory_space<vmem>>, vector<2x128xbf16>
    %c0_122 = arith.constant 0 : index
    %c0_123 = arith.constant 0 : index
    %176 = vector.load %arg9[%c0_122, %c0_123] : memref<128x256xbf16, #tpu.memory_space<vmem>>, vector<128x256xbf16>
    %cst_124 = arith.constant dense<0.000000e+00> : vector<2x256xf32>
    %177 = tpu.matmul %175, %176, %cst_124 {dimension_numbers = #tpu.dot_dimension_numbers<[1], [0], [0], [1], [0, 0, 1, 1], [], []>} : vector<2x128xbf16>, vector<128x256xbf16>, vector<2x256xf32> -> vector<2x256xf32>
    %178 = arith.addf %174, %177 : vector<2x256xf32>
    %c0_125 = arith.constant 0 : index
    %c0_126 = arith.constant 0 : index
    %179 = vector.load %arg10[%c0_125, %c0_126] : memref<1x256xf32, #tpu.memory_space<vmem>>, vector<1x256xf32>
    %180 = vector.broadcast %179 : vector<1x256xf32> to vector<2x256xf32>
    %181 = arith.addf %178, %180 : vector<2x256xf32>
    %182 = vector.extract_strided_slice %181 {offsets = [0, 0], sizes = [2, 64], strides = [1, 1]} : vector<2x256xf32> to vector<2x64xf32>
    %183 = arith.negf %182 : vector<2x64xf32>
    %184 = math.exp %183 : vector<2x64xf32>
    %cst_127 = arith.constant 1.000000e+00 : f32
    %185 = vector.broadcast %cst_127 : f32 to vector<2x64xf32>
    %186 = arith.addf %185, %184 : vector<2x64xf32>
    %187 = arith.divf %185, %186 : vector<2x64xf32>
    %188 = vector.extract_strided_slice %181 {offsets = [0, 64], sizes = [2, 64], strides = [1, 1]} : vector<2x256xf32> to vector<2x64xf32>
    %189 = arith.negf %188 : vector<2x64xf32>
    %190 = math.exp %189 : vector<2x64xf32>
    %cst_128 = arith.constant 1.000000e+00 : f32
    %191 = vector.broadcast %cst_128 : f32 to vector<2x64xf32>
    %192 = arith.addf %191, %190 : vector<2x64xf32>
    %193 = arith.divf %191, %192 : vector<2x64xf32>
    %194 = vector.extract_strided_slice %181 {offsets = [0, 128], sizes = [2, 64], strides = [1, 1]} : vector<2x256xf32> to vector<2x64xf32>
    %195 = math.tanh %194 : vector<2x64xf32>
    %196 = vector.extract_strided_slice %181 {offsets = [0, 192], sizes = [2, 64], strides = [1, 1]} : vector<2x256xf32> to vector<2x64xf32>
    %197 = arith.negf %196 : vector<2x64xf32>
    %198 = math.exp %197 : vector<2x64xf32>
    %cst_129 = arith.constant 1.000000e+00 : f32
    %199 = vector.broadcast %cst_129 : f32 to vector<2x64xf32>
    %200 = arith.addf %199, %198 : vector<2x64xf32>
    %201 = arith.divf %199, %200 : vector<2x64xf32>
    %c0_130 = arith.constant 0 : index
    %c0_131 = arith.constant 0 : index
    %202 = vector.load %arg2[%c0_130, %c0_131] : memref<2x64xf32, #tpu.memory_space<vmem>>, vector<2x64xf32>
    %203 = arith.mulf %193, %202 : vector<2x64xf32>
    %204 = arith.mulf %187, %195 : vector<2x64xf32>
    %205 = arith.addf %203, %204 : vector<2x64xf32>
    %206 = math.tanh %205 : vector<2x64xf32>
    %207 = arith.mulf %201, %206 : vector<2x64xf32>
    %c0_132 = arith.constant 0 : index
    %c0_133 = arith.constant 0 : index
    %208 = vector.load %arg17[%c0_132, %c0_133] : memref<2x64xf32, #tpu.memory_space<vmem>>, vector<2x64xf32>
    tpu.vector_store %arg17[%c0_132, %c0_133], %205 {strides = array<i32>} : memref<2x64xf32, #tpu.memory_space<vmem>>, vector<2x64xf32>,
    %c0_134 = arith.constant 0 : index
    %c0_135 = arith.constant 0 : index
    %209 = vector.load %arg16[%c0_134, %c0_135] : memref<2x64xf32, #tpu.memory_space<vmem>>, vector<2x64xf32>
    tpu.vector_store %arg16[%c0_134, %c0_135], %207 {strides = array<i32>} : memref<2x64xf32, #tpu.memory_space<vmem>>, vector<2x64xf32>,
    %210 = arith.truncf %207 : vector<2x64xf32> to vector<2x64xbf16>
    %c0_136 = arith.constant 0 : index
    %c0_137 = arith.constant 0 : index
    %211 = vector.load %arg11[%c0_136, %c0_137] : memref<64x25xbf16, #tpu.memory_space<vmem>>, vector<64x25xbf16>
    %cst_138 = arith.constant dense<0.000000e+00> : vector<2x25xf32>
    %212 = tpu.matmul %210, %211, %cst_138 {dimension_numbers = #tpu.dot_dimension_numbers<[1], [0], [0], [1], [0, 0, 1, 1], [], []>} : vector<2x64xbf16>, vector<64x25xbf16>, vector<2x25xf32> -> vector<2x25xf32>
    %c0_139 = arith.constant 0 : index
    %c0_140 = arith.constant 0 : index
    %213 = vector.load %arg15[%c0_139, %c0_140] : memref<2x25xf32, #tpu.memory_space<vmem>>, vector<2x25xf32>
    tpu.vector_store %arg15[%c0_139, %c0_140], %212 {strides = array<i32>} : memref<2x25xf32, #tpu.memory_space<vmem>>, vector<2x25xf32>,
    return
  }
}

</mosaic_0001>

<bundles_post_ra>
// kernel: encoder_forward.1
= control target key start
LH: loop header
LB: loop body
LE: loop exit
PB: predicated region body
PF: predicated region fallthrough
CT: control target
= control target key end

     0   :  { %s11091_s0 = inlined_call_operand.vmem [shape: bf16[720,64], index: 0, kind: input, shape index: {}]   ;;  %s11092_s1 = inlined_call_operand.vmem [shape: bf16[2,128], index: 1, kind: input, shape index: {}]   ;;  %s11093_s2 = inlined_call_operand.vmem [shape: f32[2,64], index: 2, kind: input, shape index: {}]   ;;  %s11094_s3 = inlined_call_operand.vmem [shape: f32[72,1], index: 3, kind: input, shape index: {}]   ;;  %s11095_s4 = inlined_call_operand.vmem [shape: bf16[64,64], index: 4, kind: input, shape index: {}]   ;;  %s11096_s5 = inlined_call_operand.vmem [shape: bf16[576,128], index: 5, kind: input, shape index: {}]   ;;  %s11097_s6 = inlined_call_operand.vmem [shape: f32[1,128], index: 6, kind: input, shape index: {}]   ;;  %s11098_s7 = inlined_call_operand.vmem [shape: f32[1,256], index: 7, kind: input, shape index: {}]   ;;  %s11099_s8 = inlined_call_operand.vmem [shape: f32[1,256], index: 8, kind: input, shape index: {}]   ;;  %s11100_s9 = inlined_call_operand.vmem [shape: bf16[128,256], index: 9, kind: input, shape index: {}]   ;;  %s11101_s10 = inlined_call_operand.vmem [shape: f32[1,256], index: 10, kind: input, shape index: {}]   ;;  %s11102_s11 = inlined_call_operand.vmem [shape: bf16[64,25], index: 11, kind: input, shape index: {}]   ;;  %s11103_s12 = inlined_call_operand.vmem [shape: bf16[1152,256], index: 12, kind: input, shape index: {}]   ;;  %s11104_s13 = inlined_call_operand.vmem [shape: bf16[1024,256], index: 13, kind: input, shape index: {}]   ;;  %s11105_s14 = inlined_call_operand.vmem [shape: bf16[256,256], index: 14, kind: input, shape index: {}]   ;;  %s11106_s15 = inlined_call_operand.hbm [shape: f32[2,25], index: 15, kind: output, shape index: {0}]   ;;  %s11107_s16 = inlined_call_operand.hbm [shape: f32[2,64], index: 16, kind: output, shape index: {1}]   ;;  %s11108_s17 = inlined_call_operand.hbm [shape: f32[2,64], index: 17, kind: output, shape index: {2}]  }
   0x1   :  { %11393 = sst [smem:[#allocation300_spill]] %s11091_s0 }
   0x2   :  { %11394 = sst [smem:[#allocation301_spill]] %s11092_s1 }
   0x3   :  { %23 = vsyncpa [#allocation10], 0 }
   0x4   :  { %24 = vsyncpa [#allocation12], 0  ;;  %v8001_v0 = vld [vmem:[%s11103_s12] sm:$0xff]  ;;  %v8006_v1 = vld [vmem:[%s11103_s12 + $0x8] sm:$0xff] }
   0x5   :  { %11395 = vst [vmem:[#allocation22_spill] sm:$0xff] %v8001_v0  ;;  %11396 = vst [vmem:[#allocation23_spill] sm:$0xff] %v8006_v1  ;;  %v8011_v2 = vld [vmem:[%s11103_s12 + $0x10] sm:$0xff]  ;;  %v8016_v3 = vld [vmem:[%s11103_s12 + $0x18] sm:$0xff] }
   0x6   :  { %v8021_v4 = vld [vmem:[%s11103_s12 + $0x20] sm:$0xff]  ;;  %v8026_v5 = vld [vmem:[%s11103_s12 + $0x28] sm:$0xff]  ;;  %v8031_v6 = vld [vmem:[%s11103_s12 + $0x30] sm:$0xff] }
   0x7   :  { %v8036_v7 = vld [vmem:[%s11103_s12 + $0x38] sm:$0xff]  ;;  %v8041_v8 = vld [vmem:[%s11103_s12 + $0x40] sm:$0xff]  ;;  %v8046_v9 = vld [vmem:[%s11103_s12 + $0x48] sm:$0xff] }
   0x8   :  { %v8051_v10 = vld [vmem:[%s11103_s12 + $0x50] sm:$0xff]  ;;  %v8056_v11 = vld [vmem:[%s11103_s12 + $0x58] sm:$0xff]  ;;  %v8061_v12 = vld [vmem:[%s11103_s12 + $0x60] sm:$0xff] }
   0x9   :  { %v8066_v13 = vld [vmem:[%s11103_s12 + $0x68] sm:$0xff]  ;;  %v8071_v14 = vld [vmem:[%s11103_s12 + $0x70] sm:$0xff]  ;;  %v8076_v15 = vld [vmem:[%s11103_s12 + $0x78] sm:$0xff] }
   0xa   :  { %v8081_v16 = vld [vmem:[%s11103_s12 + $0x80] sm:$0xff]  ;;  %v8086_v17 = vld [vmem:[%s11103_s12 + $0x88] sm:$0xff]  ;;  %v8091_v18 = vld [vmem:[%s11103_s12 + $0x90] sm:$0xff] }
   0xb   :  { %11397 = vst [vmem:[#allocation24_spill] sm:$0xff] %v8081_v16  ;;  %11398 = vst [vmem:[#allocation25_spill] sm:$0xff] %v8086_v17  ;;  %v8096_v19 = vld [vmem:[%s11103_s12 + $0x98] sm:$0xff]  ;;  %v8101_v20 = vld [vmem:[%s11103_s12 + $0xa0] sm:$0xff] }
   0xc   :  { %11399 = vst [vmem:[#allocation26_spill] sm:$0xff] %v8091_v18  ;;  %11400 = vst [vmem:[#allocation27_spill] sm:$0xff] %v8096_v19  ;;  %v8106_v21 = vld [vmem:[%s11103_s12 + $0xa8] sm:$0xff]  ;;  %v8111_v22 = vld [vmem:[%s11103_s12 + $0xb0] sm:$0xff] }
   0xd   :  { %11401 = vst [vmem:[#allocation28_spill] sm:$0xff] %v8101_v20  ;;  %11402 = vst [vmem:[#allocation29_spill] sm:$0xff] %v8106_v21  ;;  %v8116_v23 = vld [vmem:[%s11103_s12 + $0xb8] sm:$0xff]  ;;  %v8121_v24 = vld [vmem:[%s11103_s12 + $0xc0] sm:$0xff] }
   0xe   :  { %11403 = vst [vmem:[#allocation30_spill] sm:$0xff] %v8111_v22  ;;  %11404 = vst [vmem:[#allocation31_spill] sm:$0xff] %v8116_v23  ;;  %v8126_v25 = vld [vmem:[%s11103_s12 + $0xc8] sm:$0xff]  ;;  %v8131_v26 = vld [vmem:[%s11103_s12 + $0xd0] sm:$0xff] }
   0xf   :  { %11405 = vst [vmem:[#allocation32_spill] sm:$0xff] %v8121_v24  ;;  %11406 = vst [vmem:[#allocation33_spill] sm:$0xff] %v8126_v25  ;;  %v8136_v27 = vld [vmem:[%s11103_s12 + $0xd8] sm:$0xff]  ;;  %v8141_v28 = vld [vmem:[%s11103_s12 + $0xe0] sm:$0xff] }
  0x10   :  { %11407 = vst [vmem:[#allocation34_spill] sm:$0xff] %v8131_v26  ;;  %11408 = vst [vmem:[#allocation35_spill] sm:$0xff] %v8136_v27  ;;  %v8146_v29 = vld [vmem:[%s11103_s12 + $0xe8] sm:$0xff]  ;;  %v8151_v30 = vld [vmem:[%s11103_s12 + $0xf0] sm:$0xff] }
  0x11   :  { %11409 = vst [vmem:[#allocation36_spill] sm:$0xff] %v8141_v28  ;;  %11410 = vst [vmem:[#allocation37_spill] sm:$0xff] %v8146_v29  ;;  %v8156_v31 = vld [vmem:[%s11103_s12 + $0xf8] sm:$0xff]  ;;  %v8161_v32 = vld [vmem:[%s11103_s12 + $0x100] sm:$0xff] }
  0x12   :  { %11411 = vst [vmem:[#allocation38_spill] sm:$0xff] %v8151_v30  ;;  %11412 = vst [vmem:[#allocation39_spill] sm:$0xff] %v8156_v31  ;;  %v8166_v33 = vld [vmem:[%s11103_s12 + $0x108] sm:$0xff]  ;;  %v8171_v34 = vld [vmem:[%s11103_s12 + $0x110] sm:$0xff] }
  0x13   :  { %11413 = vst [vmem:[#allocation40_spill] sm:$0xff] %v8161_v32  ;;  %11414 = vst [vmem:[#allocation41_spill] sm:$0xff] %v8166_v33  ;;  %v8176_v35 = vld [vmem:[%s11103_s12 + $0x118] sm:$0xff]  ;;  %v8181_v36 = vld [vmem:[%s11103_s12 + $0x120] sm:$0xff] }
  0x14   :  { %11415 = vst [vmem:[#allocation42_spill] sm:$0xff] %v8171_v34  ;;  %11416 = vst [vmem:[#allocation43_spill] sm:$0xff] %v8176_v35  ;;  %v8186_v37 = vld [vmem:[%s11103_s12 + $0x128] sm:$0xff]  ;;  %v8191_v38 = vld [vmem:[%s11103_s12 + $0x130] sm:$0xff] }
  0x15   :  { %v8196_v39 = vld [vmem:[%s11103_s12 + $0x138] sm:$0xff]  ;;  %v8201_v40 = vld [vmem:[%s11103_s12 + $0x140] sm:$0xff]  ;;  %v8206_v41 = vld [vmem:[%s11103_s12 + $0x148] sm:$0xff] }
  0x16   :  { %v8211_v42 = vld [vmem:[%s11103_s12 + $0x150] sm:$0xff]  ;;  %v8216_v43 = vld [vmem:[%s11103_s12 + $0x158] sm:$0xff]  ;;  %v8221_v44 = vld [vmem:[%s11103_s12 + $0x160] sm:$0xff] }
  0x17   :  { %v8226_v45 = vld [vmem:[%s11103_s12 + $0x168] sm:$0xff]  ;;  %v8231_v46 = vld [vmem:[%s11103_s12 + $0x170] sm:$0xff]  ;;  %v8236_v47 = vld [vmem:[%s11103_s12 + $0x178] sm:$0xff] }
  0x18   :  { %v8241_v48 = vld [vmem:[%s11103_s12 + $0x180] sm:$0xff]  ;;  %v8246_v49 = vld [vmem:[%s11103_s12 + $0x188] sm:$0xff]  ;;  %v8251_v50 = vld [vmem:[%s11103_s12 + $0x190] sm:$0xff] }
  0x19   :  { %11417 = vst [vmem:[#allocation44_spill] sm:$0xff] %v8241_v48  ;;  %11418 = vst [vmem:[#allocation45_spill] sm:$0xff] %v8246_v49  ;;  %v8256_v51 = vld [vmem:[%s11103_s12 + $0x198] sm:$0xff]  ;;  %v8261_v52 = vld [vmem:[%s11103_s12 + $0x1a0] sm:$0xff] }
  0x1a   :  { %11419 = vst [vmem:[#allocation46_spill] sm:$0xff] %v8251_v50  ;;  %11420 = vst [vmem:[#allocation47_spill] sm:$0xff] %v8256_v51  ;;  %v8266_v53 = vld [vmem:[%s11103_s12 + $0x1a8] sm:$0xff]  ;;  %v8271_v54 = vld [vmem:[%s11103_s12 + $0x1b0] sm:$0xff] }
  0x1b   :  { %11421 = vst [vmem:[#allocation48_spill] sm:$0xff] %v8261_v52  ;;  %11422 = vst [vmem:[#allocation49_spill] sm:$0xff] %v8266_v53  ;;  %v8276_v55 = vld [vmem:[%s11103_s12 + $0x1b8] sm:$0xff]  ;;  %v8281_v56 = vld [vmem:[%s11103_s12 + $0x1c0] sm:$0xff] }
  0x1c   :  { %11423 = vst [vmem:[#allocation50_spill] sm:$0xff] %v8271_v54  ;;  %11424 = vst [vmem:[#allocation51_spill] sm:$0xff] %v8276_v55  ;;  %v8286_v57 = vld [vmem:[%s11103_s12 + $0x1c8] sm:$0xff]  ;;  %v8291_v58 = vld [vmem:[%s11103_s12 + $0x1d0] sm:$0xff] }
  0x1d   :  { %11425 = vst [vmem:[#allocation52_spill] sm:$0xff] %v8281_v56  ;;  %11426 = vst [vmem:[#allocation53_spill] sm:$0xff] %v8286_v57  ;;  %v8296_v59 = vld [vmem:[%s11103_s12 + $0x1d8] sm:$0xff]  ;;  %v8301_v60 = vld [vmem:[%s11103_s12 + $0x1e0] sm:$0xff] }
  0x1e   :  { %11427 = vst [vmem:[#allocation54_spill] sm:$0xff] %v8291_v58  ;;  %11428 = vst [vmem:[#allocation55_spill] sm:$0xff] %v8296_v59  ;;  %v8306_v61 = vld [vmem:[%s11103_s12 + $0x1e8] sm:$0xff]  ;;  %v8311_v62 = vld [vmem:[%s11103_s12 + $0x1f0] sm:$0xff] }
  0x1f   :  { %11429 = vst [vmem:[#allocation56_spill] sm:$0xff] %v8301_v60  ;;  %11430 = vst [vmem:[#allocation57_spill] sm:$0xff] %v8306_v61  ;;  %v8316_v63 = vld [vmem:[%s11103_s12 + $0x1f8] sm:$0xff]  ;;  %v8321_v48 = vld [vmem:[%s11103_s12 + $0x200] sm:$0xff] }
  0x20   :  { %11431 = vst [vmem:[#allocation58_spill] sm:$0xff] %v8311_v62  ;;  %11432 = vst [vmem:[#allocation59_spill] sm:$0xff] %v8316_v63  ;;  %v8326_v49 = vld [vmem:[%s11103_s12 + $0x208] sm:$0xff]  ;;  %v8331_v16 = vld [vmem:[%s11103_s12 + $0x210] sm:$0xff] }
  0x21   :  { %11433 = vst [vmem:[#allocation60_spill] sm:$0xff] %v8321_v48  ;;  %11434 = vst [vmem:[#allocation61_spill] sm:$0xff] %v8326_v49  ;;  %v8336_v17 = vld [vmem:[%s11103_s12 + $0x218] sm:$0xff]  ;;  %v8341_v50 = vld [vmem:[%s11103_s12 + $0x220] sm:$0xff] }
  0x22   :  { %11435 = vst [vmem:[#allocation62_spill] sm:$0xff] %v8331_v16  ;;  %11436 = vst [vmem:[#allocation63_spill] sm:$0xff] %v8336_v17  ;;  %v8346_v48 = vld [vmem:[%s11103_s12 + $0x228] sm:$0xff]  ;;  %v8351_v49 = vld [vmem:[%s11103_s12 + $0x230] sm:$0xff] }
  0x23   :  { %11437 = vst [vmem:[#allocation64_spill] sm:$0xff] %v8341_v50  ;;  %11438 = vst [vmem:[#allocation65_spill] sm:$0xff] %v8346_v48  ;;  %v8356_v16 = vld [vmem:[%s11103_s12 + $0x238] sm:$0xff]  ;;  %v8361_v17 = vld [vmem:[%s11103_s12 + $0x240] sm:$0xff] }
  0x24   :  { %11439 = vst [vmem:[#allocation66_spill] sm:$0xff] %v8351_v49  ;;  %11440 = vst [vmem:[#allocation67_spill] sm:$0xff] %v8356_v16  ;;  %v8366_v50 = vld [vmem:[%s11103_s12 + $0x248] sm:$0xff]  ;;  %v8371_v48 = vld [vmem:[%s11103_s12 + $0x250] sm:$0xff] }
  0x25   :  { %11441 = vst [vmem:[#allocation68_spill] sm:$0xff] %v8361_v17  ;;  %11442 = vst [vmem:[#allocation69_spill] sm:$0xff] %v8366_v50  ;;  %v8376_v49 = vld [vmem:[%s11103_s12 + $0x258] sm:$0xff]  ;;  %v8381_v16 = vld [vmem:[%s11103_s12 + $0x260] sm:$0xff] }
  0x26   :  { %11443 = vst [vmem:[#allocation70_spill] sm:$0xff] %v8371_v48  ;;  %11444 = vst [vmem:[#allocation71_spill] sm:$0xff] %v8376_v49  ;;  %v8386_v17 = vld [vmem:[%s11103_s12 + $0x268] sm:$0xff]  ;;  %v8391_v50 = vld [vmem:[%s11103_s12 + $0x270] sm:$0xff] }
  0x27   :  { %11445 = vst [vmem:[#allocation72_spill] sm:$0xff] %v8381_v16  ;;  %11446 = vst [vmem:[#allocation73_spill] sm:$0xff] %v8386_v17  ;;  %v8396_v48 = vld [vmem:[%s11103_s12 + $0x278] sm:$0xff]  ;;  %v8401_v49 = vld [vmem:[%s11103_s12 + $0x280] sm:$0xff] }
  0x28   :  { %11447 = vst [vmem:[#allocation74_spill] sm:$0xff] %v8391_v50  ;;  %11448 = vst [vmem:[#allocation75_spill] sm:$0xff] %v8396_v48  ;;  %v8406_v16 = vld [vmem:[%s11103_s12 + $0x288] sm:$0xff]  ;;  %v8411_v17 = vld [vmem:[%s11103_s12 + $0x290] sm:$0xff] }
  0x29   :  { %11449 = vst [vmem:[#allocation76_spill] sm:$0xff] %v8401_v49  ;;  %11450 = vst [vmem:[#allocation77_spill] sm:$0xff] %v8406_v16  ;;  %v8416_v50 = vld [vmem:[%s11103_s12 + $0x298] sm:$0xff]  ;;  %v8421_v48 = vld [vmem:[%s11103_s12 + $0x2a0] sm:$0xff] }
  0x2a   :  { %11451 = vst [vmem:[#allocation78_spill] sm:$0xff] %v8411_v17  ;;  %11452 = vst [vmem:[#allocation79_spill] sm:$0xff] %v8416_v50  ;;  %v8426_v49 = vld [vmem:[%s11103_s12 + $0x2a8] sm:$0xff]  ;;  %v8431_v16 = vld [vmem:[%s11103_s12 + $0x2b0] sm:$0xff] }
  0x2b   :  { %11453 = vst [vmem:[#allocation80_spill] sm:$0xff] %v8421_v48  ;;  %11454 = vst [vmem:[#allocation81_spill] sm:$0xff] %v8426_v49  ;;  %v8436_v17 = vld [vmem:[%s11103_s12 + $0x2b8] sm:$0xff]  ;;  %v8441_v50 = vld [vmem:[%s11103_s12 + $0x2c0] sm:$0xff] }
  0x2c   :  { %11455 = vst [vmem:[#allocation82_spill] sm:$0xff] %v8431_v16  ;;  %11456 = vst [vmem:[#allocation83_spill] sm:$0xff] %v8436_v17  ;;  %v8446_v48 = vld [vmem:[%s11103_s12 + $0x2c8] sm:$0xff]  ;;  %v8451_v49 = vld [vmem:[%s11103_s12 + $0x2d0] sm:$0xff] }
  0x2d   :  { %11457 = vst [vmem:[#allocation84_spill] sm:$0xff] %v8441_v50  ;;  %11458 = vst [vmem:[#allocation85_spill] sm:$0xff] %v8446_v48  ;;  %v8456_v16 = vld [vmem:[%s11103_s12 + $0x2d8] sm:$0xff]  ;;  %v8461_v17 = vld [vmem:[%s11103_s12 + $0x2e0] sm:$0xff] }
  0x2e   :  { %11459 = vst [vmem:[#allocation86_spill] sm:$0xff] %v8451_v49  ;;  %11460 = vst [vmem:[#allocation87_spill] sm:$0xff] %v8456_v16  ;;  %v8466_v50 = vld [vmem:[%s11103_s12 + $0x2e8] sm:$0xff]  ;;  %v8471_v48 = vld [vmem:[%s11103_s12 + $0x2f0] sm:$0xff] }
  0x2f   :  { %11461 = vst [vmem:[#allocation88_spill] sm:$0xff] %v8461_v17  ;;  %11462 = vst [vmem:[#allocation89_spill] sm:$0xff] %v8466_v50  ;;  %v8476_v49 = vld [vmem:[%s11103_s12 + $0x2f8] sm:$0xff]  ;;  %v8481_v16 = vld [vmem:[%s11103_s12 + $0x300] sm:$0xff] }
  0x30   :  { %11463 = vst [vmem:[#allocation90_spill] sm:$0xff] %v8471_v48  ;;  %11464 = vst [vmem:[#allocation91_spill] sm:$0xff] %v8476_v49  ;;  %v8486_v17 = vld [vmem:[%s11103_s12 + $0x308] sm:$0xff]  ;;  %v8491_v50 = vld [vmem:[%s11103_s12 + $0x310] sm:$0xff] }
  0x31   :  { %11465 = vst [vmem:[#allocation92_spill] sm:$0xff] %v8481_v16  ;;  %11466 = vst [vmem:[#allocation93_spill] sm:$0xff] %v8486_v17  ;;  %v8496_v48 = vld [vmem:[%s11103_s12 + $0x318] sm:$0xff]  ;;  %v8501_v49 = vld [vmem:[%s11103_s12 + $0x320] sm:$0xff] }
  0x32   :  { %11467 = vst [vmem:[#allocation94_spill] sm:$0xff] %v8491_v50  ;;  %11468 = vst [vmem:[#allocation95_spill] sm:$0xff] %v8496_v48  ;;  %v8506_v16 = vld [vmem:[%s11103_s12 + $0x328] sm:$0xff]  ;;  %v8511_v17 = vld [vmem:[%s11103_s12 + $0x330] sm:$0xff] }
  0x33   :  { %11469 = vst [vmem:[#allocation96_spill] sm:$0xff] %v8501_v49  ;;  %11470 = vst [vmem:[#allocation97_spill] sm:$0xff] %v8506_v16  ;;  %v8516_v50 = vld [vmem:[%s11103_s12 + $0x338] sm:$0xff]  ;;  %v8521_v48 = vld [vmem:[%s11103_s12 + $0x340] sm:$0xff] }
  0x34   :  { %11471 = vst [vmem:[#allocation98_spill] sm:$0xff] %v8511_v17  ;;  %11472 = vst [vmem:[#allocation99_spill] sm:$0xff] %v8516_v50  ;;  %v8526_v49 = vld [vmem:[%s11103_s12 + $0x348] sm:$0xff]  ;;  %v8531_v16 = vld [vmem:[%s11103_s12 + $0x350] sm:$0xff] }
  0x35   :  { %11473 = vst [vmem:[#allocation100_spill] sm:$0xff] %v8521_v48  ;;  %11474 = vst [vmem:[#allocation101_spill] sm:$0xff] %v8526_v49  ;;  %v8536_v17 = vld [vmem:[%s11103_s12 + $0x358] sm:$0xff]  ;;  %v8541_v50 = vld [vmem:[%s11103_s12 + $0x360] sm:$0xff] }
  0x36   :  { %11475 = vst [vmem:[#allocation102_spill] sm:$0xff] %v8531_v16  ;;  %11476 = vst [vmem:[#allocation103_spill] sm:$0xff] %v8536_v17  ;;  %v8546_v48 = vld [vmem:[%s11103_s12 + $0x368] sm:$0xff]  ;;  %v8551_v49 = vld [vmem:[%s11103_s12 + $0x370] sm:$0xff] }
  0x37   :  { %11477 = vst [vmem:[#allocation104_spill] sm:$0xff] %v8541_v50  ;;  %11478 = vst [vmem:[#allocation105_spill] sm:$0xff] %v8546_v48  ;;  %v8556_v16 = vld [vmem:[%s11103_s12 + $0x378] sm:$0xff]  ;;  %v8561_v17 = vld [vmem:[%s11103_s12 + $0x380] sm:$0xff] }
  0x38   :  { %11479 = vst [vmem:[#allocation106_spill] sm:$0xff] %v8551_v49  ;;  %11480 = vst [vmem:[#allocation107_spill] sm:$0xff] %v8556_v16  ;;  %v8566_v50 = vld [vmem:[%s11103_s12 + $0x388] sm:$0xff]  ;;  %v8571_v48 = vld [vmem:[%s11103_s12 + $0x390] sm:$0xff] }
  0x39   :  { %11481 = vst [vmem:[#allocation108_spill] sm:$0xff] %v8561_v17  ;;  %11482 = vst [vmem:[#allocation109_spill] sm:$0xff] %v8566_v50  ;;  %v8576_v49 = vld [vmem:[%s11103_s12 + $0x398] sm:$0xff]  ;;  %v8581_v16 = vld [vmem:[%s11103_s12 + $0x3a0] sm:$0xff] }
  0x3a   :  { %11483 = vst [vmem:[#allocation110_spill] sm:$0xff] %v8571_v48  ;;  %11484 = vst [vmem:[#allocation111_spill] sm:$0xff] %v8576_v49  ;;  %v8586_v17 = vld [vmem:[%s11103_s12 + $0x3a8] sm:$0xff]  ;;  %v8591_v50 = vld [vmem:[%s11103_s12 + $0x3b0] sm:$0xff] }
  0x3b   :  { %11485 = vst [vmem:[#allocation112_spill] sm:$0xff] %v8581_v16  ;;  %11486 = vst [vmem:[#allocation113_spill] sm:$0xff] %v8586_v17  ;;  %v8596_v48 = vld [vmem:[%s11103_s12 + $0x3b8] sm:$0xff]  ;;  %v8601_v49 = vld [vmem:[%s11103_s12 + $0x3c0] sm:$0xff] }
  0x3c   :  { %11487 = vst [vmem:[#allocation114_spill] sm:$0xff] %v8591_v50  ;;  %11488 = vst [vmem:[#allocation115_spill] sm:$0xff] %v8596_v48  ;;  %v8606_v16 = vld [vmem:[%s11103_s12 + $0x3c8] sm:$0xff]  ;;  %v8611_v17 = vld [vmem:[%s11103_s12 + $0x3d0] sm:$0xff] }
  0x3d   :  { %11489 = vst [vmem:[#allocation116_spill] sm:$0xff] %v8601_v49  ;;  %11490 = vst [vmem:[#allocation117_spill] sm:$0xff] %v8606_v16  ;;  %v8616_v50 = vld [vmem:[%s11103_s12 + $0x3d8] sm:$0xff]  ;;  %v8621_v48 = vld [vmem:[%s11103_s12 + $0x3e0] sm:$0xff] }
  0x3e   :  { %11491 = vst [vmem:[#allocation118_spill] sm:$0xff] %v8611_v17  ;;  %11492 = vst [vmem:[#allocation119_spill] sm:$0xff] %v8616_v50  ;;  %v8626_v49 = vld [vmem:[%s11103_s12 + $0x3e8] sm:$0xff]  ;;  %v8631_v16 = vld [vmem:[%s11103_s12 + $0x3f0] sm:$0xff] }
  0x3f   :  { %11493 = vst [vmem:[#allocation120_spill] sm:$0xff] %v8621_v48  ;;  %11494 = vst [vmem:[#allocation121_spill] sm:$0xff] %v8626_v49  ;;  %v8636_v17 = vld [vmem:[%s11103_s12 + $0x3f8] sm:$0xff]  ;;  %v8641_v50 = vld [vmem:[%s11103_s12 + $0x400] sm:$0xff] }
  0x40   :  { %11495 = vst [vmem:[#allocation122_spill] sm:$0xff] %v8631_v16  ;;  %11496 = vst [vmem:[#allocation123_spill] sm:$0xff] %v8636_v17  ;;  %v8646_v48 = vld [vmem:[%s11103_s12 + $0x408] sm:$0xff]  ;;  %v8651_v49 = vld [vmem:[%s11103_s12 + $0x410] sm:$0xff] }
  0x41   :  { %11497 = vst [vmem:[#allocation124_spill] sm:$0xff] %v8641_v50  ;;  %11498 = vst [vmem:[#allocation125_spill] sm:$0xff] %v8646_v48  ;;  %v8656_v16 = vld [vmem:[%s11103_s12 + $0x418] sm:$0xff]  ;;  %v8661_v17 = vld [vmem:[%s11103_s12 + $0x420] sm:$0xff] }
  0x42   :  { %11499 = vst [vmem:[#allocation126_spill] sm:$0xff] %v8651_v49  ;;  %11500 = vst [vmem:[#allocation127_spill] sm:$0xff] %v8656_v16  ;;  %v8666_v50 = vld [vmem:[%s11103_s12 + $0x428] sm:$0xff]  ;;  %v8671_v48 = vld [vmem:[%s11103_s12 + $0x430] sm:$0xff] }
  0x43   :  { %11501 = vst [vmem:[#allocation128_spill] sm:$0xff] %v8661_v17  ;;  %11502 = vst [vmem:[#allocation129_spill] sm:$0xff] %v8666_v50  ;;  %v8676_v49 = vld [vmem:[%s11103_s12 + $0x438] sm:$0xff]  ;;  %v8681_v16 = vld [vmem:[%s11103_s12 + $0x440] sm:$0xff] }
  0x44   :  { %11503 = vst [vmem:[#allocation130_spill] sm:$0xff] %v8671_v48  ;;  %11504 = vst [vmem:[#allocation131_spill] sm:$0xff] %v8676_v49  ;;  %v8686_v17 = vld [vmem:[%s11103_s12 + $0x448] sm:$0xff]  ;;  %v8691_v50 = vld [vmem:[%s11103_s12 + $0x450] sm:$0xff] }
  0x45   :  { %11505 = vst [vmem:[#allocation132_spill] sm:$0xff] %v8681_v16  ;;  %11506 = vst [vmem:[#allocation133_spill] sm:$0xff] %v8686_v17  ;;  %v8696_v48 = vld [vmem:[%s11103_s12 + $0x458] sm:$0xff]  ;;  %v8701_v49 = vld [vmem:[%s11103_s12 + $0x460] sm:$0xff] }
  0x46   :  { %11507 = vst [vmem:[#allocation134_spill] sm:$0xff] %v8691_v50  ;;  %11508 = vst [vmem:[#allocation135_spill] sm:$0xff] %v8696_v48  ;;  %v8706_v16 = vld [vmem:[%s11103_s12 + $0x468] sm:$0xff]  ;;  %v8711_v17 = vld [vmem:[%s11103_s12 + $0x470] sm:$0xff] }
  0x47   :  { %11509 = vst [vmem:[#allocation136_spill] sm:$0xff] %v8701_v49  ;;  %11510 = vst [vmem:[#allocation137_spill] sm:$0xff] %v8706_v16  ;;  %v8716_v50 = vld [vmem:[%s11103_s12 + $0x478] sm:$0xff] }
  0x48   :  { %11511 = vst [vmem:[#allocation138_spill] sm:$0xff] %v8711_v17  ;;  %11512 = vst [vmem:[#allocation139_spill] sm:$0xff] %v8716_v50 }
  0x49   :  { %378 = vsyncadd [#allocation8], 18432  ;;  %v8721_v48 = vld [vmem:[%s11104_s13] sm:$0xff]  ;;  %v8726_v49 = vld [vmem:[%s11104_s13 + $0x8] sm:$0xff] }
  0x4a   :  { %11513 = vst [vmem:[#allocation140_spill] sm:$0xff] %v8721_v48  ;;  %11514 = vst [vmem:[#allocation141_spill] sm:$0xff] %v8726_v49  ;;  %v8731_v16 = vld [vmem:[%s11104_s13 + $0x10] sm:$0xff]  ;;  %v8736_v17 = vld [vmem:[%s11104_s13 + $0x18] sm:$0xff] }
  0x4b   :  { %11515 = vst [vmem:[#allocation142_spill] sm:$0xff] %v8731_v16  ;;  %11516 = vst [vmem:[#allocation143_spill] sm:$0xff] %v8736_v17  ;;  %v8741_v50 = vld [vmem:[%s11104_s13 + $0x20] sm:$0xff]  ;;  %v8746_v48 = vld [vmem:[%s11104_s13 + $0x28] sm:$0xff] }
  0x4c   :  { %11517 = vst [vmem:[#allocation144_spill] sm:$0xff] %v8741_v50  ;;  %11518 = vst [vmem:[#allocation145_spill] sm:$0xff] %v8746_v48  ;;  %v8751_v49 = vld [vmem:[%s11104_s13 + $0x30] sm:$0xff]  ;;  %v8756_v16 = vld [vmem:[%s11104_s13 + $0x38] sm:$0xff] }
  0x4d   :  { %11519 = vst [vmem:[#allocation146_spill] sm:$0xff] %v8751_v49  ;;  %11520 = vst [vmem:[#allocation147_spill] sm:$0xff] %v8756_v16  ;;  %v8761_v17 = vld [vmem:[%s11104_s13 + $0x40] sm:$0xff]  ;;  %v8766_v50 = vld [vmem:[%s11104_s13 + $0x48] sm:$0xff] }
  0x4e   :  { %11521 = vst [vmem:[#allocation148_spill] sm:$0xff] %v8761_v17  ;;  %11522 = vst [vmem:[#allocation149_spill] sm:$0xff] %v8766_v50  ;;  %v8771_v48 = vld [vmem:[%s11104_s13 + $0x50] sm:$0xff]  ;;  %v8776_v49 = vld [vmem:[%s11104_s13 + $0x58] sm:$0xff] }
  0x4f   :  { %11523 = vst [vmem:[#allocation150_spill] sm:$0xff] %v8771_v48  ;;  %11524 = vst [vmem:[#allocation151_spill] sm:$0xff] %v8776_v49  ;;  %v8781_v16 = vld [vmem:[%s11104_s13 + $0x60] sm:$0xff]  ;;  %v8786_v17 = vld [vmem:[%s11104_s13 + $0x68] sm:$0xff] }
  0x50   :  { %11525 = vst [vmem:[#allocation152_spill] sm:$0xff] %v8781_v16  ;;  %11526 = vst [vmem:[#allocation153_spill] sm:$0xff] %v8786_v17  ;;  %v8791_v50 = vld [vmem:[%s11104_s13 + $0x70] sm:$0xff]  ;;  %v8796_v48 = vld [vmem:[%s11104_s13 + $0x78] sm:$0xff] }
  0x51   :  { %11527 = vst [vmem:[#allocation154_spill] sm:$0xff] %v8791_v50  ;;  %11528 = vst [vmem:[#allocation155_spill] sm:$0xff] %v8796_v48  ;;  %v8801_v49 = vld [vmem:[%s11104_s13 + $0x80] sm:$0xff]  ;;  %v8806_v16 = vld [vmem:[%s11104_s13 + $0x88] sm:$0xff] }
  0x52   :  { %11529 = vst [vmem:[#allocation156_spill] sm:$0xff] %v8801_v49  ;;  %11530 = vst [vmem:[#allocation157_spill] sm:$0xff] %v8806_v16  ;;  %v8811_v17 = vld [vmem:[%s11104_s13 + $0x90] sm:$0xff]  ;;  %v8816_v50 = vld [vmem:[%s11104_s13 + $0x98] sm:$0xff] }
  0x53   :  { %11531 = vst [vmem:[#allocation158_spill] sm:$0xff] %v8811_v17  ;;  %11532 = vst [vmem:[#allocation159_spill] sm:$0xff] %v8816_v50  ;;  %v8821_v48 = vld [vmem:[%s11104_s13 + $0xa0] sm:$0xff]  ;;  %v8826_v49 = vld [vmem:[%s11104_s13 + $0xa8] sm:$0xff] }
  0x54   :  { %11533 = vst [vmem:[#allocation160_spill] sm:$0xff] %v8821_v48  ;;  %11534 = vst [vmem:[#allocation161_spill] sm:$0xff] %v8826_v49  ;;  %v8831_v16 = vld [vmem:[%s11104_s13 + $0xb0] sm:$0xff]  ;;  %v8836_v17 = vld [vmem:[%s11104_s13 + $0xb8] sm:$0xff] }
  0x55   :  { %11535 = vst [vmem:[#allocation162_spill] sm:$0xff] %v8831_v16  ;;  %11536 = vst [vmem:[#allocation163_spill] sm:$0xff] %v8836_v17  ;;  %v8841_v50 = vld [vmem:[%s11104_s13 + $0xc0] sm:$0xff]  ;;  %v8846_v48 = vld [vmem:[%s11104_s13 + $0xc8] sm:$0xff] }
  0x56   :  { %11537 = vst [vmem:[#allocation164_spill] sm:$0xff] %v8841_v50  ;;  %11538 = vst [vmem:[#allocation165_spill] sm:$0xff] %v8846_v48  ;;  %v8851_v49 = vld [vmem:[%s11104_s13 + $0xd0] sm:$0xff]  ;;  %v8856_v16 = vld [vmem:[%s11104_s13 + $0xd8] sm:$0xff] }
  0x57   :  { %11539 = vst [vmem:[#allocation166_spill] sm:$0xff] %v8851_v49  ;;  %11540 = vst [vmem:[#allocation167_spill] sm:$0xff] %v8856_v16  ;;  %v8861_v17 = vld [vmem:[%s11104_s13 + $0xe0] sm:$0xff]  ;;  %v8866_v50 = vld [vmem:[%s11104_s13 + $0xe8] sm:$0xff] }
  0x58   :  { %11541 = vst [vmem:[#allocation168_spill] sm:$0xff] %v8861_v17  ;;  %11542 = vst [vmem:[#allocation169_spill] sm:$0xff] %v8866_v50  ;;  %v8871_v48 = vld [vmem:[%s11104_s13 + $0xf0] sm:$0xff]  ;;  %v8876_v49 = vld [vmem:[%s11104_s13 + $0xf8] sm:$0xff] }
  0x59   :  { %11543 = vst [vmem:[#allocation170_spill] sm:$0xff] %v8871_v48  ;;  %11544 = vst [vmem:[#allocation171_spill] sm:$0xff] %v8876_v49  ;;  %v8881_v16 = vld [vmem:[%s11104_s13 + $0x100] sm:$0xff]  ;;  %v8886_v17 = vld [vmem:[%s11104_s13 + $0x108] sm:$0xff] }
  0x5a   :  { %11545 = vst [vmem:[#allocation172_spill] sm:$0xff] %v8881_v16  ;;  %11546 = vst [vmem:[#allocation173_spill] sm:$0xff] %v8886_v17  ;;  %v8891_v50 = vld [vmem:[%s11104_s13 + $0x110] sm:$0xff]  ;;  %v8896_v48 = vld [vmem:[%s11104_s13 + $0x118] sm:$0xff] }
  0x5b   :  { %11547 = vst [vmem:[#allocation174_spill] sm:$0xff] %v8891_v50  ;;  %11548 = vst [vmem:[#allocation175_spill] sm:$0xff] %v8896_v48  ;;  %v8901_v49 = vld [vmem:[%s11104_s13 + $0x120] sm:$0xff]  ;;  %v8906_v16 = vld [vmem:[%s11104_s13 + $0x128] sm:$0xff] }
  0x5c   :  { %11549 = vst [vmem:[#allocation176_spill] sm:$0xff] %v8901_v49  ;;  %11550 = vst [vmem:[#allocation177_spill] sm:$0xff] %v8906_v16  ;;  %v8911_v17 = vld [vmem:[%s11104_s13 + $0x130] sm:$0xff]  ;;  %v8916_v50 = vld [vmem:[%s11104_s13 + $0x138] sm:$0xff] }
  0x5d   :  { %11551 = vst [vmem:[#allocation178_spill] sm:$0xff] %v8911_v17  ;;  %11552 = vst [vmem:[#allocation179_spill] sm:$0xff] %v8916_v50  ;;  %v8921_v48 = vld [vmem:[%s11104_s13 + $0x140] sm:$0xff]  ;;  %v8926_v49 = vld [vmem:[%s11104_s13 + $0x148] sm:$0xff] }
  0x5e   :  { %11553 = vst [vmem:[#allocation180_spill] sm:$0xff] %v8921_v48  ;;  %11554 = vst [vmem:[#allocation181_spill] sm:$0xff] %v8926_v49  ;;  %v8931_v16 = vld [vmem:[%s11104_s13 + $0x150] sm:$0xff]  ;;  %v8936_v17 = vld [vmem:[%s11104_s13 + $0x158] sm:$0xff] }
  0x5f   :  { %11555 = vst [vmem:[#allocation182_spill] sm:$0xff] %v8931_v16  ;;  %11556 = vst [vmem:[#allocation183_spill] sm:$0xff] %v8936_v17  ;;  %v8941_v50 = vld [vmem:[%s11104_s13 + $0x160] sm:$0xff]  ;;  %v8946_v48 = vld [vmem:[%s11104_s13 + $0x168] sm:$0xff] }
  0x60   :  { %11557 = vst [vmem:[#allocation184_spill] sm:$0xff] %v8941_v50  ;;  %11558 = vst [vmem:[#allocation185_spill] sm:$0xff] %v8946_v48  ;;  %v8951_v49 = vld [vmem:[%s11104_s13 + $0x170] sm:$0xff]  ;;  %v8956_v16 = vld [vmem:[%s11104_s13 + $0x178] sm:$0xff] }
  0x61   :  { %11559 = vst [vmem:[#allocation186_spill] sm:$0xff] %v8951_v49  ;;  %11560 = vst [vmem:[#allocation187_spill] sm:$0xff] %v8956_v16  ;;  %v8961_v17 = vld [vmem:[%s11104_s13 + $0x180] sm:$0xff]  ;;  %v8966_v50 = vld [vmem:[%s11104_s13 + $0x188] sm:$0xff] }
  0x62   :  { %11561 = vst [vmem:[#allocation188_spill] sm:$0xff] %v8961_v17  ;;  %11562 = vst [vmem:[#allocation189_spill] sm:$0xff] %v8966_v50  ;;  %v8971_v48 = vld [vmem:[%s11104_s13 + $0x190] sm:$0xff]  ;;  %v8976_v49 = vld [vmem:[%s11104_s13 + $0x198] sm:$0xff] }
  0x63   :  { %11563 = vst [vmem:[#allocation190_spill] sm:$0xff] %v8971_v48  ;;  %11564 = vst [vmem:[#allocation191_spill] sm:$0xff] %v8976_v49  ;;  %v8981_v16 = vld [vmem:[%s11104_s13 + $0x1a0] sm:$0xff]  ;;  %v8986_v17 = vld [vmem:[%s11104_s13 + $0x1a8] sm:$0xff] }
  0x64   :  { %11565 = vst [vmem:[#allocation192_spill] sm:$0xff] %v8981_v16  ;;  %11566 = vst [vmem:[#allocation193_spill] sm:$0xff] %v8986_v17  ;;  %v8991_v50 = vld [vmem:[%s11104_s13 + $0x1b0] sm:$0xff]  ;;  %v8996_v48 = vld [vmem:[%s11104_s13 + $0x1b8] sm:$0xff] }
  0x65   :  { %11567 = vst [vmem:[#allocation194_spill] sm:$0xff] %v8991_v50  ;;  %11568 = vst [vmem:[#allocation195_spill] sm:$0xff] %v8996_v48  ;;  %v9001_v49 = vld [vmem:[%s11104_s13 + $0x1c0] sm:$0xff]  ;;  %v9006_v16 = vld [vmem:[%s11104_s13 + $0x1c8] sm:$0xff] }
  0x66   :  { %11569 = vst [vmem:[#allocation196_spill] sm:$0xff] %v9001_v49  ;;  %11570 = vst [vmem:[#allocation197_spill] sm:$0xff] %v9006_v16  ;;  %v9011_v17 = vld [vmem:[%s11104_s13 + $0x1d0] sm:$0xff]  ;;  %v9016_v50 = vld [vmem:[%s11104_s13 + $0x1d8] sm:$0xff] }
  0x67   :  { %11571 = vst [vmem:[#allocation198_spill] sm:$0xff] %v9011_v17  ;;  %11572 = vst [vmem:[#allocation199_spill] sm:$0xff] %v9016_v50  ;;  %v9021_v48 = vld [vmem:[%s11104_s13 + $0x1e0] sm:$0xff]  ;;  %v9026_v49 = vld [vmem:[%s11104_s13 + $0x1e8] sm:$0xff] }
  0x68   :  { %11573 = vst [vmem:[#allocation200_spill] sm:$0xff] %v9021_v48  ;;  %11574 = vst [vmem:[#allocation201_spill] sm:$0xff] %v9026_v49  ;;  %v9031_v16 = vld [vmem:[%s11104_s13 + $0x1f0] sm:$0xff]  ;;  %v9036_v17 = vld [vmem:[%s11104_s13 + $0x1f8] sm:$0xff] }
  0x69   :  { %11575 = vst [vmem:[#allocation202_spill] sm:$0xff] %v9031_v16  ;;  %11576 = vst [vmem:[#allocation203_spill] sm:$0xff] %v9036_v17  ;;  %v9041_v50 = vld [vmem:[%s11104_s13 + $0x200] sm:$0xff]  ;;  %v9046_v48 = vld [vmem:[%s11104_s13 + $0x208] sm:$0xff] }
  0x6a   :  { %11577 = vst [vmem:[#allocation204_spill] sm:$0xff] %v9041_v50  ;;  %11578 = vst [vmem:[#allocation205_spill] sm:$0xff] %v9046_v48  ;;  %v9051_v49 = vld [vmem:[%s11104_s13 + $0x210] sm:$0xff]  ;;  %v9056_v16 = vld [vmem:[%s11104_s13 + $0x218] sm:$0xff] }
  0x6b   :  { %11579 = vst [vmem:[#allocation206_spill] sm:$0xff] %v9051_v49  ;;  %11580 = vst [vmem:[#allocation207_spill] sm:$0xff] %v9056_v16  ;;  %v9061_v17 = vld [vmem:[%s11104_s13 + $0x220] sm:$0xff]  ;;  %v9066_v50 = vld [vmem:[%s11104_s13 + $0x228] sm:$0xff] }
  0x6c   :  { %11581 = vst [vmem:[#allocation208_spill] sm:$0xff] %v9061_v17  ;;  %11582 = vst [vmem:[#allocation209_spill] sm:$0xff] %v9066_v50  ;;  %v9071_v48 = vld [vmem:[%s11104_s13 + $0x230] sm:$0xff]  ;;  %v9076_v49 = vld [vmem:[%s11104_s13 + $0x238] sm:$0xff] }
  0x6d   :  { %11583 = vst [vmem:[#allocation210_spill] sm:$0xff] %v9071_v48  ;;  %11584 = vst [vmem:[#allocation211_spill] sm:$0xff] %v9076_v49  ;;  %v9081_v16 = vld [vmem:[%s11104_s13 + $0x240] sm:$0xff]  ;;  %v9086_v17 = vld [vmem:[%s11104_s13 + $0x248] sm:$0xff] }
  0x6e   :  { %11585 = vst [vmem:[#allocation212_spill] sm:$0xff] %v9081_v16  ;;  %11586 = vst [vmem:[#allocation213_spill] sm:$0xff] %v9086_v17  ;;  %v9091_v50 = vld [vmem:[%s11104_s13 + $0x250] sm:$0xff]  ;;  %v9096_v48 = vld [vmem:[%s11104_s13 + $0x258] sm:$0xff] }
  0x6f   :  { %11587 = vst [vmem:[#allocation214_spill] sm:$0xff] %v9091_v50  ;;  %11588 = vst [vmem:[#allocation215_spill] sm:$0xff] %v9096_v48  ;;  %v9101_v49 = vld [vmem:[%s11104_s13 + $0x260] sm:$0xff]  ;;  %v9106_v16 = vld [vmem:[%s11104_s13 + $0x268] sm:$0xff] }
  0x70   :  { %11589 = vst [vmem:[#allocation216_spill] sm:$0xff] %v9101_v49  ;;  %11590 = vst [vmem:[#allocation217_spill] sm:$0xff] %v9106_v16  ;;  %v9111_v17 = vld [vmem:[%s11104_s13 + $0x270] sm:$0xff]  ;;  %v9116_v50 = vld [vmem:[%s11104_s13 + $0x278] sm:$0xff] }
  0x71   :  { %11591 = vst [vmem:[#allocation218_spill] sm:$0xff] %v9111_v17  ;;  %11592 = vst [vmem:[#allocation219_spill] sm:$0xff] %v9116_v50  ;;  %v9121_v48 = vld [vmem:[%s11104_s13 + $0x280] sm:$0xff]  ;;  %v9126_v49 = vld [vmem:[%s11104_s13 + $0x288] sm:$0xff] }
  0x72   :  { %11593 = vst [vmem:[#allocation220_spill] sm:$0xff] %v9121_v48  ;;  %11594 = vst [vmem:[#allocation221_spill] sm:$0xff] %v9126_v49  ;;  %v9131_v16 = vld [vmem:[%s11104_s13 + $0x290] sm:$0xff]  ;;  %v9136_v17 = vld [vmem:[%s11104_s13 + $0x298] sm:$0xff] }
  0x73   :  { %11595 = vst [vmem:[#allocation222_spill] sm:$0xff] %v9131_v16  ;;  %11596 = vst [vmem:[#allocation223_spill] sm:$0xff] %v9136_v17  ;;  %v9141_v50 = vld [vmem:[%s11104_s13 + $0x2a0] sm:$0xff]  ;;  %v9146_v48 = vld [vmem:[%s11104_s13 + $0x2a8] sm:$0xff] }
  0x74   :  { %11597 = vst [vmem:[#allocation224_spill] sm:$0xff] %v9141_v50  ;;  %11598 = vst [vmem:[#allocation225_spill] sm:$0xff] %v9146_v48  ;;  %v9151_v49 = vld [vmem:[%s11104_s13 + $0x2b0] sm:$0xff]  ;;  %v9156_v16 = vld [vmem:[%s11104_s13 + $0x2b8] sm:$0xff] }
  0x75   :  { %11599 = vst [vmem:[#allocation226_spill] sm:$0xff] %v9151_v49  ;;  %11600 = vst [vmem:[#allocation227_spill] sm:$0xff] %v9156_v16  ;;  %v9161_v17 = vld [vmem:[%s11104_s13 + $0x2c0] sm:$0xff]  ;;  %v9166_v50 = vld [vmem:[%s11104_s13 + $0x2c8] sm:$0xff] }
  0x76   :  { %11601 = vst [vmem:[#allocation228_spill] sm:$0xff] %v9161_v17  ;;  %11602 = vst [vmem:[#allocation229_spill] sm:$0xff] %v9166_v50  ;;  %v9171_v48 = vld [vmem:[%s11104_s13 + $0x2d0] sm:$0xff]  ;;  %v9176_v49 = vld [vmem:[%s11104_s13 + $0x2d8] sm:$0xff] }
  0x77   :  { %11603 = vst [vmem:[#allocation230_spill] sm:$0xff] %v9171_v48  ;;  %11604 = vst [vmem:[#allocation231_spill] sm:$0xff] %v9176_v49  ;;  %v9181_v16 = vld [vmem:[%s11104_s13 + $0x2e0] sm:$0xff]  ;;  %v9186_v17 = vld [vmem:[%s11104_s13 + $0x2e8] sm:$0xff] }
  0x78   :  { %11605 = vst [vmem:[#allocation232_spill] sm:$0xff] %v9181_v16  ;;  %11606 = vst [vmem:[#allocation233_spill] sm:$0xff] %v9186_v17  ;;  %v9191_v50 = vld [vmem:[%s11104_s13 + $0x2f0] sm:$0xff]  ;;  %v9196_v48 = vld [vmem:[%s11104_s13 + $0x2f8] sm:$0xff] }
  0x79   :  { %11607 = vst [vmem:[#allocation234_spill] sm:$0xff] %v9191_v50  ;;  %11608 = vst [vmem:[#allocation235_spill] sm:$0xff] %v9196_v48  ;;  %v9201_v49 = vld [vmem:[%s11104_s13 + $0x300] sm:$0xff]  ;;  %v9206_v16 = vld [vmem:[%s11104_s13 + $0x308] sm:$0xff] }
  0x7a   :  { %11609 = vst [vmem:[#allocation236_spill] sm:$0xff] %v9201_v49  ;;  %11610 = vst [vmem:[#allocation237_spill] sm:$0xff] %v9206_v16  ;;  %v9211_v17 = vld [vmem:[%s11104_s13 + $0x310] sm:$0xff]  ;;  %v9216_v50 = vld [vmem:[%s11104_s13 + $0x318] sm:$0xff] }
  0x7b   :  { %11611 = vst [vmem:[#allocation238_spill] sm:$0xff] %v9211_v17  ;;  %11612 = vst [vmem:[#allocation239_spill] sm:$0xff] %v9216_v50  ;;  %v9221_v48 = vld [vmem:[%s11104_s13 + $0x320] sm:$0xff]  ;;  %v9226_v49 = vld [vmem:[%s11104_s13 + $0x328] sm:$0xff] }
  0x7c   :  { %11613 = vst [vmem:[#allocation240_spill] sm:$0xff] %v9221_v48  ;;  %11614 = vst [vmem:[#allocation241_spill] sm:$0xff] %v9226_v49  ;;  %v9231_v16 = vld [vmem:[%s11104_s13 + $0x330] sm:$0xff]  ;;  %v9236_v17 = vld [vmem:[%s11104_s13 + $0x338] sm:$0xff] }
  0x7d   :  { %11615 = vst [vmem:[#allocation242_spill] sm:$0xff] %v9231_v16  ;;  %11616 = vst [vmem:[#allocation243_spill] sm:$0xff] %v9236_v17  ;;  %v9241_v50 = vld [vmem:[%s11104_s13 + $0x340] sm:$0xff]  ;;  %v9246_v48 = vld [vmem:[%s11104_s13 + $0x348] sm:$0xff] }
  0x7e   :  { %11617 = vst [vmem:[#allocation244_spill] sm:$0xff] %v9241_v50  ;;  %11618 = vst [vmem:[#allocation245_spill] sm:$0xff] %v9246_v48  ;;  %v9251_v49 = vld [vmem:[%s11104_s13 + $0x350] sm:$0xff]  ;;  %v9256_v16 = vld [vmem:[%s11104_s13 + $0x358] sm:$0xff] }
  0x7f   :  { %11619 = vst [vmem:[#allocation246_spill] sm:$0xff] %v9251_v49  ;;  %11620 = vst [vmem:[#allocation247_spill] sm:$0xff] %v9256_v16  ;;  %v9261_v17 = vld [vmem:[%s11104_s13 + $0x360] sm:$0xff]  ;;  %v9266_v50 = vld [vmem:[%s11104_s13 + $0x368] sm:$0xff] }
  0x80   :  { %11621 = vst [vmem:[#allocation248_spill] sm:$0xff] %v9261_v17  ;;  %11622 = vst [vmem:[#allocation249_spill] sm:$0xff] %v9266_v50  ;;  %v9271_v48 = vld [vmem:[%s11104_s13 + $0x370] sm:$0xff]  ;;  %v9276_v49 = vld [vmem:[%s11104_s13 + $0x378] sm:$0xff] }
  0x81   :  { %11623 = vst [vmem:[#allocation250_spill] sm:$0xff] %v9271_v48  ;;  %11624 = vst [vmem:[#allocation251_spill] sm:$0xff] %v9276_v49  ;;  %v9281_v16 = vld [vmem:[%s11104_s13 + $0x380] sm:$0xff]  ;;  %v9286_v17 = vld [vmem:[%s11104_s13 + $0x388] sm:$0xff] }
  0x82   :  { %11625 = vst [vmem:[#allocation252_spill] sm:$0xff] %v9281_v16  ;;  %11626 = vst [vmem:[#allocation253_spill] sm:$0xff] %v9286_v17  ;;  %v9291_v50 = vld [vmem:[%s11104_s13 + $0x390] sm:$0xff]  ;;  %v9296_v48 = vld [vmem:[%s11104_s13 + $0x398] sm:$0xff] }
  0x83   :  { %11627 = vst [vmem:[#allocation254_spill] sm:$0xff] %v9291_v50  ;;  %11628 = vst [vmem:[#allocation255_spill] sm:$0xff] %v9296_v48  ;;  %v9301_v49 = vld [vmem:[%s11104_s13 + $0x3a0] sm:$0xff]  ;;  %v9306_v16 = vld [vmem:[%s11104_s13 + $0x3a8] sm:$0xff] }
  0x84   :  { %11629 = vst [vmem:[#allocation256_spill] sm:$0xff] %v9301_v49  ;;  %11630 = vst [vmem:[#allocation257_spill] sm:$0xff] %v9306_v16  ;;  %v9311_v17 = vld [vmem:[%s11104_s13 + $0x3b0] sm:$0xff]  ;;  %v9316_v50 = vld [vmem:[%s11104_s13 + $0x3b8] sm:$0xff] }
  0x85   :  { %11631 = vst [vmem:[#allocation258_spill] sm:$0xff] %v9311_v17  ;;  %11632 = vst [vmem:[#allocation259_spill] sm:$0xff] %v9316_v50  ;;  %v9321_v48 = vld [vmem:[%s11104_s13 + $0x3c0] sm:$0xff]  ;;  %v9326_v49 = vld [vmem:[%s11104_s13 + $0x3c8] sm:$0xff] }
  0x86   :  { %11633 = vst [vmem:[#allocation260_spill] sm:$0xff] %v9321_v48  ;;  %11634 = vst [vmem:[#allocation261_spill] sm:$0xff] %v9326_v49  ;;  %v9331_v16 = vld [vmem:[%s11104_s13 + $0x3d0] sm:$0xff]  ;;  %v9336_v17 = vld [vmem:[%s11104_s13 + $0x3d8] sm:$0xff] }
  0x87   :  { %11635 = vst [vmem:[#allocation262_spill] sm:$0xff] %v9331_v16  ;;  %11636 = vst [vmem:[#allocation263_spill] sm:$0xff] %v9336_v17  ;;  %v9341_v50 = vld [vmem:[%s11104_s13 + $0x3e0] sm:$0xff]  ;;  %v9346_v48 = vld [vmem:[%s11104_s13 + $0x3e8] sm:$0xff] }
  0x88   :  { %11637 = vst [vmem:[#allocation264_spill] sm:$0xff] %v9341_v50  ;;  %11638 = vst [vmem:[#allocation265_spill] sm:$0xff] %v9346_v48  ;;  %v9351_v49 = vld [vmem:[%s11104_s13 + $0x3f0] sm:$0xff]  ;;  %v9356_v16 = vld [vmem:[%s11104_s13 + $0x3f8] sm:$0xff] }
  0x89   :  { %11639 = vst [vmem:[#allocation266_spill] sm:$0xff] %v9351_v49  ;;  %11640 = vst [vmem:[#allocation267_spill] sm:$0xff] %v9356_v16 }
  0x8a   :  { %676 = vsyncadd [#allocation8 + $0x1], 16384  ;;  %v9361_v17 = vld [vmem:[%s11105_s14] sm:$0xff]  ;;  %v9366_v50 = vld [vmem:[%s11105_s14 + $0x8] sm:$0xff]  ;;  %vm7901_vm0 = vmmov 0   ;;  %s11673_s18 = sld [smem:[#allocation300_spill]] }
  0x8b   :  { %11641 = vst [vmem:[#allocation268_spill] sm:$0xff] %v9361_v17  ;;  %11642 = vst [vmem:[#allocation269_spill] sm:$0xff] %v9366_v50  ;;  %v9371_v48 = vld [vmem:[%s11105_s14 + $0x10] sm:$0xff]  ;;  %v9376_v49 = vld [vmem:[%s11105_s14 + $0x18] sm:$0xff]  ;;  %vm847_vm1 = vcmask 523264  }
  0x8c   :  { %11643 = vst [vmem:[#allocation270_spill] sm:$0xff] %v9371_v48  ;;  %11644 = vst [vmem:[#allocation271_spill] sm:$0xff] %v9376_v49  ;;  %v9381_v16 = vld [vmem:[%s11105_s14 + $0x20] sm:$0xff]  ;;  %v9386_v17 = vld [vmem:[%s11105_s14 + $0x28] sm:$0xff] }
  0x8d   :  { %11645 = vst [vmem:[#allocation272_spill] sm:$0xff] %v9381_v16  ;;  %11646 = vst [vmem:[#allocation273_spill] sm:$0xff] %v9386_v17  ;;  %v9391_v50 = vld [vmem:[%s11105_s14 + $0x30] sm:$0xff]  ;;  %v9396_v48 = vld [vmem:[%s11105_s14 + $0x38] sm:$0xff] }
  0x8e   :  { %11647 = vst [vmem:[#allocation274_spill] sm:$0xff] %v9391_v50  ;;  %11648 = vst [vmem:[#allocation275_spill] sm:$0xff] %v9396_v48  ;;  %v9401_v49 = vld [vmem:[%s11105_s14 + $0x40] sm:$0xff]  ;;  %v9406_v16 = vld [vmem:[%s11105_s14 + $0x48] sm:$0xff] }
  0x8f   :  { %11649 = vst [vmem:[#allocation276_spill] sm:$0xff] %v9401_v49  ;;  %11650 = vst [vmem:[#allocation277_spill] sm:$0xff] %v9406_v16  ;;  %v9411_v17 = vld [vmem:[%s11105_s14 + $0x50] sm:$0xff]  ;;  %v9416_v50 = vld [vmem:[%s11105_s14 + $0x58] sm:$0xff] }
  0x90   :  { %11651 = vst [vmem:[#allocation278_spill] sm:$0xff] %v9411_v17  ;;  %11652 = vst [vmem:[#allocation279_spill] sm:$0xff] %v9416_v50  ;;  %v9421_v48 = vld [vmem:[%s11105_s14 + $0x60] sm:$0xff]  ;;  %v9426_v49 = vld [vmem:[%s11105_s14 + $0x68] sm:$0xff] }
  0x91   :  { %11653 = vst [vmem:[#allocation280_spill] sm:$0xff] %v9421_v48  ;;  %11654 = vst [vmem:[#allocation281_spill] sm:$0xff] %v9426_v49  ;;  %v9431_v16 = vld [vmem:[%s11105_s14 + $0x70] sm:$0xff]  ;;  %v9436_v17 = vld [vmem:[%s11105_s14 + $0x78] sm:$0xff] }
  0x92   :  { %11655 = vst [vmem:[#allocation282_spill] sm:$0xff] %v9431_v16  ;;  %11656 = vst [vmem:[#allocation283_spill] sm:$0xff] %v9436_v17  ;;  %v9441_v50 = vld [vmem:[%s11105_s14 + $0x80] sm:$0xff]  ;;  %v9446_v48 = vld [vmem:[%s11105_s14 + $0x88] sm:$0xff] }
  0x93   :  { %11657 = vst [vmem:[#allocation284_spill] sm:$0xff] %v9441_v50  ;;  %11658 = vst [vmem:[#allocation285_spill] sm:$0xff] %v9446_v48  ;;  %v9451_v49 = vld [vmem:[%s11105_s14 + $0x90] sm:$0xff]  ;;  %v9456_v16 = vld [vmem:[%s11105_s14 + $0x98] sm:$0xff] }
  0x94   :  { %11659 = vst [vmem:[#allocation286_spill] sm:$0xff] %v9451_v49  ;;  %11660 = vst [vmem:[#allocation287_spill] sm:$0xff] %v9456_v16  ;;  %v9461_v17 = vld [vmem:[%s11105_s14 + $0xa0] sm:$0xff]  ;;  %v9466_v50 = vld [vmem:[%s11105_s14 + $0xa8] sm:$0xff] }
  0x95   :  { %11661 = vst [vmem:[#allocation288_spill] sm:$0xff] %v9461_v17  ;;  %11662 = vst [vmem:[#allocation289_spill] sm:$0xff] %v9466_v50  ;;  %v9471_v48 = vld [vmem:[%s11105_s14 + $0xb0] sm:$0xff]  ;;  %v9476_v49 = vld [vmem:[%s11105_s14 + $0xb8] sm:$0xff] }
  0x96   :  { %11663 = vst [vmem:[#allocation290_spill] sm:$0xff] %v9471_v48  ;;  %11664 = vst [vmem:[#allocation291_spill] sm:$0xff] %v9476_v49  ;;  %v9481_v16 = vld [vmem:[%s11105_s14 + $0xc0] sm:$0xff]  ;;  %v9486_v17 = vld [vmem:[%s11105_s14 + $0xc8] sm:$0xff] }
  0x97   :  { %11665 = vst [vmem:[#allocation292_spill] sm:$0xff] %v9481_v16  ;;  %11666 = vst [vmem:[#allocation293_spill] sm:$0xff] %v9486_v17  ;;  %v9491_v50 = vld [vmem:[%s11105_s14 + $0xd0] sm:$0xff]  ;;  %v9496_v48 = vld [vmem:[%s11105_s14 + $0xd8] sm:$0xff] }
  0x98   :  { %11667 = vst [vmem:[#allocation294_spill] sm:$0xff] %v9491_v50  ;;  %11668 = vst [vmem:[#allocation295_spill] sm:$0xff] %v9496_v48  ;;  %v9501_v49 = vld [vmem:[%s11105_s14 + $0xe0] sm:$0xff]  ;;  %v9506_v16 = vld [vmem:[%s11105_s14 + $0xe8] sm:$0xff] }
  0x99   :  { %11669 = vst [vmem:[#allocation296_spill] sm:$0xff] %v9501_v49  ;;  %11670 = vst [vmem:[#allocation297_spill] sm:$0xff] %v9506_v16  ;;  %v9511_v17 = vld [vmem:[%s11105_s14 + $0xf0] sm:$0xff]  ;;  %v9516_v50 = vld [vmem:[%s11105_s14 + $0xf8] sm:$0xff]  ;;  %v11360_v49 = vmov 0.0  }
  0x9a   :  { %11671 = vst [vmem:[#allocation298_spill] sm:$0xff] %v9511_v17  ;;  %11672 = vst [vmem:[#allocation299_spill] sm:$0xff] %v9516_v50  ;;  %v7636_v48 = vld [vmem:[%s11095_s4 + $0x18] sm:$0xff]   ;;  %7618 = vmatprep.subr.bf16.mxu1 %v11360_v49  ;;  %7326 = vmatprep.subr.bf16.mxu0 %v11360_v49  ;;  %v7637_v16 = vld [vmem:[%s11095_s4 + $0x10] sm:$0xff]  }
  0x9b   :  { %7622 = vmatpush3.bf16.msra.mxu1 %v7636_v48  ;;  %7342 = vmatprep.mubr.msk.bf16.mxu1 %vm7901_vm0, %v11360_v49  ;;  %v7638_v17 = vld [vmem:[%s11095_s4 + $0x8] sm:$0xff]   ;;  %v7640_v50 = vld [vmem:[%s11673_s18 + $0x10] sm:$0xff]   ;;  %v7643_v51 = vld [vmem:[%s11673_s18 + $0x18] sm:$0xff]  }
  0x9c   :  { %7619 = vmatprep.subr.bf16.mxu1 %v11360_v49  ;;  %7327 = vmatpush3.bf16.msra.mxu0 %v7636_v48  ;;  %v7639_v48 = vld [vmem:[%s11095_s4] sm:$0xff]  }
  0x9d   :  { %7328 = vmatprep.subr.bf16.mxu0 %v11360_v49  ;;  %7334 = vmatprep.mubr.msk.bf16.mxu0 %vm7901_vm0, %v11360_v49 }
  0x9f   :  { %7623 = vmatpush3.bf16.msra.mxu1 %v7637_v16 }
  0xa0   :  { %7620 = vmatprep.subr.bf16.mxu1 %v11360_v49  ;;  %7329 = vmatpush3.bf16.msra.mxu0 %v7637_v16  ;;  %v7641_v16 = vld [vmem:[%s11095_s4 + $0x18] sm:$0xff]  }
  0xa1   :  { %7330 = vmatprep.subr.bf16.mxu0 %v11360_v49 }
  0xa3   :  { %7624 = vmatpush3.bf16.msra.mxu1 %v7638_v17 }
  0xa4   :  { %7621 = vmatprep.subr.bf16.mxu1 %v11360_v49  ;;  %7331 = vmatpush3.bf16.msra.mxu0 %v7638_v17  ;;  %v7642_v17 = vld [vmem:[%s11095_s4 + $0x10] sm:$0xff]  }
  0xa5   :  { %7332 = vmatprep.subr.bf16.mxu0 %v11360_v49 }
  0xa7   :  { %7625 = vmatpush3.bf16.msra.mxu1 %v7639_v48 }
  0xa8   :  { %7354 = vmatprep.subr.bf16.mxu1 %v11360_v49  ;;  %7333 = vmatpush3.bf16.msra.mxu0 %v7639_v48  ;;  %v7644_v48 = vld [vmem:[%s11095_s4 + $0x8] sm:$0xff]  }
  0xa9   :  { %7382 = vmatprep.subr.bf16.mxu0 %v11360_v49 }
  0xaa   :  { %7343 = vmatmul.mubr.msk.bf16.vlgmr.msra.gmra.mxu1 %vm847_vm1, %v7640_v50  ;;  %v7646_v50 = vld [vmem:[%s11095_s4] sm:$0xff]  }
  0xab   :  { %7355 = vmatpush3.bf16.msra.mxu1 %v7641_v16  ;;  %7346 = vmatprep.mubr.msk.bf16.mxu1 %vm7901_vm0, %v11360_v49 }
  0xac   :  { %7356 = vmatprep.subr.bf16.mxu1 %v11360_v49 }
  0xaf   :  { %7357 = vmatpush3.bf16.msra.mxu1 %v7642_v17 }
  0xb0   :  { %7358 = vmatprep.subr.bf16.mxu1 %v11360_v49 }
  0xb2   :  { %7347 = vmatmul.mubr.msk.bf16.gmra.mxu1 %vm847_vm1, %v7643_v51 }
  0xb3   :  { %7359 = vmatpush3.bf16.msra.mxu1 %v7644_v48  ;;  %7350 = vmatprep.mubr.msk.bf16.mxu1 %vm7901_vm0, %v11360_v49 }
  0xb4   :  { %7360 = vmatprep.subr.bf16.mxu1 %v11360_v49 }
  0xb5   :  { %782 = vsyncadd [#allocation8 + $0x2], 4096  ;;  %v7645_v16 = vld [vmem:[%s11673_s18 + $0x20] ss:$0 sps:$4 sm:$0xff]   ;;  %v7670_v17 = vld [vmem:[%s11095_s4 + $0x18] sm:$0xff]   ;;  %vm999_vm3 = vcmask 519168  }
  0xb6   :  { %v7669_v51 = vld [vmem:[%s11673_s18] sm:$0xff]   ;;  %v7672_v48 = vld [vmem:[%s11095_s4 + $0x10] sm:$0xff]   ;;  %v7690_v19 = vld [vmem:[%s11095_s4 + $0x8] sm:$0xff]  }
  0xb7   :  { %7361 = vmatpush3.bf16.msra.mxu1 %v7646_v50  ;;  %7335 = vmatmul.mubr.msk.bf16.vlgmr.msra.gmra.mxu0 %vm847_vm1, %v7669_v51  ;;  %v7647_v50 = vld [vmem:[%s11673_s18 + $0x28] sm:$0xff]   ;;  %v7650_v18 = vld [vmem:[%s11095_s4 + $0x10] sm:$0xff]  }
  0xb8   :  { %7410 = vmatprep.subr.bf16.mxu1 %v11360_v49  ;;  %7383 = vmatpush3.bf16.msra.mxu0 %v7670_v17  ;;  %v7674_v51 = vld [vmem:[%s11673_s18 + $0x8] sm:$0xff]  }
  0xb9   :  { %7338 = vmatprep.mubr.msk.bf16.mxu0 %vm7901_vm0, %v11360_v49  ;;  %7384 = vmatprep.subr.bf16.mxu0 %v11360_v49  ;;  %v7675_v17 = vld [vmem:[%s11095_s4 + $0x8] sm:$0xff]  }
  0xba   :  { %7351 = vmatmul.mubr.msk.bf16.gmra.mxu1 %vm847_vm1, %v7645_v16  ;;  %v7648_v16 = vld [vmem:[%s11095_s4 + $0x18] sm:$0xff]  }
  0xbb   :  { %7362 = vmatprep.mubr.msk.bf16.mxu1 %vm7901_vm0, %v11360_v49 }
  0xbc   :  { %7385 = vmatpush3.bf16.msra.mxu0 %v7672_v48  ;;  %v7677_v48 = vld [vmem:[%s11095_s4] sm:$0xff]  }
  0xbd   :  { %7386 = vmatprep.subr.bf16.mxu0 %v11360_v49 }
  0xbf   :  { %7339 = vmatmul.mubr.msk.bf16.gmra.mxu0 %vm847_vm1, %v7674_v51  ;;  %v7678_v51 = vld [vmem:[%s11673_s18 + $0x50] sm:$0xff]  }
  0xc0   :  { %7387 = vmatpush3.bf16.msra.mxu0 %v7675_v17  ;;  %7390 = vmatprep.mubr.msk.bf16.mxu0 %vm7901_vm0, %v11360_v49  ;;  %v7683_v17 = vld [vmem:[%s11095_s4 + $0x18] sm:$0xff]  }
  0xc1   :  { %7388 = vmatprep.subr.bf16.mxu0 %v11360_v49 }
  0xc2   :  { %7363 = vmatmul.mubr.msk.bf16.vlgmr.msra.gmra.mxu1 %vm847_vm1, %v7647_v50  ;;  %v7649_v50 = vld [vmem:[%s11673_s18 + $0x30] sm:$0xff]  }
  0xc3   :  { %7411 = vmatpush3.bf16.msra.mxu1 %v7648_v16  ;;  %7366 = vmatprep.mubr.msk.bf16.mxu1 %vm7901_vm0, %v11360_v49  ;;  %v7652_v16 = vld [vmem:[%s11095_s4 + $0x8] sm:$0xff]  }
  0xc4   :  { %7412 = vmatprep.subr.bf16.mxu1 %v11360_v49  ;;  %7389 = vmatpush3.bf16.msra.mxu0 %v7677_v48  ;;  %v7651_v48 = vld [vmem:[%s11673_s18 + $0x38] sm:$0xff]  }
  0xc5   :  { %7438 = vmatprep.subr.bf16.mxu0 %v11360_v49 }
  0xc7   :  { %7413 = vmatpush3.bf16.msra.mxu1 %v7650_v18  ;;  %v7654_v18 = vld [vmem:[%s11095_s4] sm:$0xff]   ;;  %7391 = vmatmul.mubr.msk.bf16.vlgmr.msra.gmra.mxu0 %vm847_vm1, %v7678_v51 }
  0xc8   :  { %7414 = vmatprep.subr.bf16.mxu1 %v11360_v49  ;;  %7394 = vmatprep.mubr.msk.bf16.mxu0 %vm7901_vm0, %v11360_v49  ;;  %v7692_v51 = vld [vmem:[%s11095_s4] sm:$0xff]  }
  0xc9   :  { %7439 = vmatpush3.bf16.msra.mxu0 %v7683_v17  ;;  %v7653_v17 = vld [vmem:[%s11673_s18 + $0x40] sm:$0xff]  }
  0xca   :  { %7367 = vmatmul.mubr.msk.bf16.gmra.mxu1 %vm847_vm1, %v7649_v50  ;;  %v7686_v50 = vld [vmem:[%s11095_s4 + $0x10] sm:$0xff]   ;;  %7440 = vmatprep.subr.bf16.mxu0 %v11360_v49 }
  0xcb   :  { %7370 = vmatprep.mubr.msk.bf16.mxu1 %vm7901_vm0, %v11360_v49  ;;  %7415 = vmatpush3.bf16.msra.mxu1 %v7652_v16  ;;  %v7681_v16 = vld [vmem:[%s11673_s18 + $0x58] sm:$0xff]  }
  0xcc   :  { %7416 = vmatprep.subr.bf16.mxu1 %v11360_v49 }
  0xcd   :  { %7441 = vmatpush3.bf16.msra.mxu0 %v7686_v50  ;;  %v7656_v50 = vld [vmem:[%s11673_s18 + $0x78] sm:$0xff]  }
  0xce   :  { %7442 = vmatprep.subr.bf16.mxu0 %v11360_v49 }
  0xcf   :  { %7417 = vmatpush3.bf16.msra.mxu1 %v7654_v18  ;;  %7395 = vmatmul.mubr.msk.bf16.gmra.mxu0 %vm847_vm1, %v7681_v16  ;;  %v7684_v18 = vld [vmem:[%s11673_s18 + $0x60] sm:$0xff]   ;;  %v7657_v16 = vld [vmem:[%s11095_s4 + $0x18] sm:$0xff]  }
  0xd0   :  { %7466 = vmatprep.subr.bf16.mxu1 %v11360_v49  ;;  %7398 = vmatprep.mubr.msk.bf16.mxu0 %vm7901_vm0, %v11360_v49 }
  0xd1   :  { %7443 = vmatpush3.bf16.msra.mxu0 %v7690_v19  ;;  %v7687_v19 = vld [vmem:[%s11673_s18 + $0x68] sm:$0xff]  }
  0xd2   :  { %7371 = vmatmul.mubr.msk.bf16.gmra.mxu1 %vm847_vm1, %v7651_v48  ;;  %7444 = vmatprep.subr.bf16.mxu0 %v11360_v49  ;;  %v7655_v48 = vld [vmem:[%s11673_s18 + $0x48] ss:$0 sps:$4 sm:$0xff]  }
  0xd3   :  { %7374 = vmatprep.mubr.msk.bf16.mxu1 %vm7901_vm0, %v11360_v49 }
  0xd5   :  { %7445 = vmatpush3.bf16.msra.mxu0 %v7692_v51  ;;  %v7689_v51 = vld [vmem:[%s11673_s18 + $0x70] ss:$0 sps:$4 sm:$0xff]  }
  0xd6   :  { %7494 = vmatprep.subr.bf16.mxu0 %v11360_v49 }
  0xd7   :  { %7399 = vmatmul.mubr.msk.bf16.gmra.mxu0 %vm847_vm1, %v7684_v18  ;;  %v7658_v18 = vld [vmem:[%s11673_s18 + $0x80] sm:$0xff]  }
  0xd8   :  { %7402 = vmatprep.mubr.msk.bf16.mxu0 %vm7901_vm0, %v11360_v49 }
  0xda   :  { %7375 = vmatmul.mubr.msk.bf16.gmra.mxu1 %vm847_vm1, %v7653_v17  ;;  %v7659_v17 = vld [vmem:[%s11095_s4 + $0x10] sm:$0xff]  }
  0xdb   :  { %7378 = vmatprep.mubr.msk.bf16.mxu1 %vm7901_vm0, %v11360_v49 }
  0xdf   :  { %7403 = vmatmul.mubr.msk.bf16.gmra.mxu0 %vm847_vm1, %v7687_v19  ;;  %v7693_v19 = vld [vmem:[%s11673_s18 + $0xa0] sm:$0xff]  }
  0xe0   :  { %7406 = vmatprep.mubr.msk.bf16.mxu0 %vm7901_vm0, %v11360_v49 }
  0xe2   :  { %7379 = vmatmul.mubr.msk.bf16.gmra.mxu1 %vm847_vm1, %v7655_v48  ;;  %v7661_v48 = vld [vmem:[%s11095_s4 + $0x8] sm:$0xff]  }
  0xe3   :  { %7418 = vmatprep.mubr.msk.bf16.mxu1 %vm7901_vm0, %v11360_v49 }
  0xe7   :  { %7407 = vmatmul.mubr.msk.bf16.gmra.mxu0 %vm847_vm1, %v7689_v51  ;;  %v7698_v51 = vld [vmem:[%s11095_s4 + $0x10] sm:$0xff]  }
  0xe8   :  { %7446 = vmatprep.mubr.msk.bf16.mxu0 %vm7901_vm0, %v11360_v49 }
  0xea   :  { %7419 = vmatmul.mubr.msk.bf16.vlgmr.msra.gmra.mxu1 %vm847_vm1, %v7656_v50  ;;  %v7696_v50 = vld [vmem:[%s11095_s4 + $0x18] sm:$0xff]  }
  0xeb   :  { %7467 = vmatpush3.bf16.msra.mxu1 %v7657_v16  ;;  %7422 = vmatprep.mubr.msk.bf16.mxu1 %vm7901_vm0, %v11360_v49  ;;  %v7663_v16 = vld [vmem:[%s11095_s4] sm:$0xff]  }
  0xec   :  { %7468 = vmatprep.subr.bf16.mxu1 %v11360_v49 }
  0xef   :  { %7469 = vmatpush3.bf16.msra.mxu1 %v7659_v17  ;;  %v7660_v17 = vld [vmem:[%s11673_s18 + $0x88] sm:$0xff]   ;;  %7447 = vmatmul.mubr.msk.bf16.vlgmr.msra.gmra.mxu0 %vm847_vm1, %v7693_v19  ;;  %v7702_v19 = vld [vmem:[%s11095_s4] sm:$0xff]  }
  0xf0   :  { %7470 = vmatprep.subr.bf16.mxu1 %v11360_v49  ;;  %7450 = vmatprep.mubr.msk.bf16.mxu0 %vm7901_vm0, %v11360_v49 }
  0xf1   :  { %7495 = vmatpush3.bf16.msra.mxu0 %v7696_v50  ;;  %v7662_v50 = vld [vmem:[%s11673_s18 + $0x90] sm:$0xff]  }
  0xf2   :  { %7423 = vmatmul.mubr.msk.bf16.gmra.mxu1 %vm847_vm1, %v7658_v18  ;;  %v7695_v18 = vld [vmem:[%s11673_s18 + $0xa8] sm:$0xff]   ;;  %7496 = vmatprep.subr.bf16.mxu0 %v11360_v49 }
  0xf3   :  { %7426 = vmatprep.mubr.msk.bf16.mxu1 %vm7901_vm0, %v11360_v49  ;;  %7471 = vmatpush3.bf16.msra.mxu1 %v7661_v48  ;;  %v7701_v48 = vld [vmem:[%s11095_s4 + $0x8] sm:$0xff]  }
  0xf4   :  { %7472 = vmatprep.subr.bf16.mxu1 %v11360_v49 }
  0xf5   :  { %7497 = vmatpush3.bf16.msra.mxu0 %v7698_v51  ;;  %v7664_v51 = vld [vmem:[%s11673_s18 + $0x98] ss:$0 sps:$4 sm:$0xff]  }
  0xf6   :  { %7498 = vmatprep.subr.bf16.mxu0 %v11360_v49 }
  0xf7   :  { %7473 = vmatpush3.bf16.msra.mxu1 %v7663_v16  ;;  %7451 = vmatmul.mubr.msk.bf16.gmra.mxu0 %vm847_vm1, %v7695_v18  ;;  %v7697_v16 = vld [vmem:[%s11673_s18 + $0xb0] sm:$0xff]   ;;  %v7665_v18 = vld [vmem:[%s11673_s18 + $0xc8] sm:$0xff]  }
  0xf8   :  { %7522 = vmatprep.subr.bf16.mxu1 %v11360_v49  ;;  %7454 = vmatprep.mubr.msk.bf16.mxu0 %vm7901_vm0, %v11360_v49 }
  0xf9   :  { %7499 = vmatpush3.bf16.msra.mxu0 %v7701_v48  ;;  %v7666_v48 = vld [vmem:[%s11095_s4 + $0x18] sm:$0xff]  }
  0xfa   :  { %7427 = vmatmul.mubr.msk.bf16.gmra.mxu1 %vm847_vm1, %v7660_v17  ;;  %7500 = vmatprep.subr.bf16.mxu0 %v11360_v49  ;;  %v7699_v17 = vld [vmem:[%s11673_s18 + $0xb8] sm:$0xff]  }
  0xfb   :  { %7430 = vmatprep.mubr.msk.bf16.mxu1 %vm7901_vm0, %v11360_v49 }
  0xfd   :  { %7501 = vmatpush3.bf16.msra.mxu0 %v7702_v19  ;;  %v7700_v19 = vld [vmem:[%s11673_s18 + $0xc0] ss:$0 sps:$4 sm:$0xff]  }
  0xfe   :  { %7550 = vmatprep.subr.bf16.mxu0 %v11360_v49 }
  0xff   :  { %7455 = vmatmul.mubr.msk.bf16.gmra.mxu0 %vm847_vm1, %v7697_v16  ;;  %v7667_v16 = vld [vmem:[%s11673_s18 + $0xd0] sm:$0xff]  }
 0x100   :  { %7458 = vmatprep.mubr.msk.bf16.mxu0 %vm7901_vm0, %v11360_v49 }
 0x102   :  { %7431 = vmatmul.mubr.msk.bf16.gmra.mxu1 %vm847_vm1, %v7662_v50  ;;  %v7668_v50 = vld [vmem:[%s11095_s4 + $0x10] sm:$0xff]  }
 0x103   :  { %7434 = vmatprep.mubr.msk.bf16.mxu1 %vm7901_vm0, %v11360_v49 }
 0x107   :  { %7459 = vmatmul.mubr.msk.bf16.gmra.mxu0 %vm847_vm1, %v7699_v17  ;;  %v7703_v17 = vld [vmem:[%s11673_s18 + $0xf0] sm:$0xff]  }
 0x108   :  { %7462 = vmatprep.mubr.msk.bf16.mxu0 %vm7901_vm0, %v11360_v49 }
 0x10a   :  { %7435 = vmatmul.mubr.msk.bf16.gmra.mxu1 %vm847_vm1, %v7664_v51  ;;  %v7673_v51 = vld [vmem:[%s11095_s4 + $0x8] sm:$0xff]  }
 0x10b   :  { %7474 = vmatprep.mubr.msk.bf16.mxu1 %vm7901_vm0, %v11360_v49 }
 0x10f   :  { %7463 = vmatmul.mubr.msk.bf16.gmra.mxu0 %vm847_vm1, %v7700_v19  ;;  %v7707_v19 = vld [vmem:[%s11095_s4 + $0x10] sm:$0xff]  }
 0x110   :  { %7502 = vmatprep.mubr.msk.bf16.mxu0 %vm7901_vm0, %v11360_v49 }
 0x112   :  { %7475 = vmatmul.mubr.msk.bf16.vlgmr.msra.gmra.mxu1 %vm847_vm1, %v7665_v18  ;;  %v7705_v18 = vld [vmem:[%s11095_s4 + $0x18] sm:$0xff]  }
 0x113   :  { %7523 = vmatpush3.bf16.msra.mxu1 %v7666_v48  ;;  %7478 = vmatprep.mubr.msk.bf16.mxu1 %vm7901_vm0, %v11360_v49  ;;  %v7679_v48 = vld [vmem:[%s11095_s4] sm:$0xff]  }
 0x114   :  { %7524 = vmatprep.subr.bf16.mxu1 %v11360_v49 }
 0x117   :  { %7525 = vmatpush3.bf16.msra.mxu1 %v7668_v50  ;;  %7503 = vmatmul.mubr.msk.bf16.vlgmr.msra.gmra.mxu0 %vm847_vm1, %v7703_v17  ;;  %v7671_v50 = vld [vmem:[%s11673_s18 + $0xd8] sm:$0xff]   ;;  %v7711_v17 = vld [vmem:[%s11095_s4] sm:$0xff]  }
 0x118   :  { %7526 = vmatprep.subr.bf16.mxu1 %v11360_v49  ;;  %7506 = vmatprep.mubr.msk.bf16.mxu0 %vm7901_vm0, %v11360_v49 }
 0x119   :  { %7551 = vmatpush3.bf16.msra.mxu0 %v7705_v18  ;;  %v7676_v18 = vld [vmem:[%s11673_s18 + $0xe0] sm:$0xff]  }
 0x11a   :  { %7479 = vmatmul.mubr.msk.bf16.gmra.mxu1 %vm847_vm1, %v7667_v16  ;;  %7552 = vmatprep.subr.bf16.mxu0 %v11360_v49  ;;  %v7704_v16 = vld [vmem:[%s11673_s18 + $0xf8] sm:$0xff]  }
 0x11b   :  { %7482 = vmatprep.mubr.msk.bf16.mxu1 %vm7901_vm0, %v11360_v49  ;;  %7527 = vmatpush3.bf16.msra.mxu1 %v7673_v51  ;;  %v7710_v51 = vld [vmem:[%s11095_s4 + $0x8] sm:$0xff]  }
 0x11c   :  { %7528 = vmatprep.subr.bf16.mxu1 %v11360_v49 }
 0x11d   :  { %7553 = vmatpush3.bf16.msra.mxu0 %v7707_v19  ;;  %v7680_v19 = vld [vmem:[%s11673_s18 + $0xe8] ss:$0 sps:$4 sm:$0xff]  }
 0x11e   :  { %7554 = vmatprep.subr.bf16.mxu0 %v11360_v49 }
 0x11f   :  { %7529 = vmatpush3.bf16.msra.mxu1 %v7679_v48  ;;  %7507 = vmatmul.mubr.msk.bf16.gmra.mxu0 %vm847_vm1, %v7704_v16  ;;  %v7706_v48 = vld [vmem:[%s11673_s18 + $0x100] sm:$0xff]   ;;  %v7682_v16 = vld [vmem:[%s11673_s18 + $0x118] sm:$0xff]  }
 0x120   :  { %7510 = vmatprep.mubr.msk.bf16.mxu0 %vm7901_vm0, %v11360_v49 }
 0x121   :  { %7555 = vmatpush3.bf16.msra.mxu0 %v7710_v51  ;;  %v7709_v51 = vld [vmem:[%s11673_s18 + $0x110] ss:$0 sps:$4 sm:$0xff]  }
 0x122   :  { %7483 = vmatmul.mubr.msk.bf16.gmra.mxu1 %vm847_vm1, %v7671_v50  ;;  %7556 = vmatprep.subr.bf16.mxu0 %v11360_v49  ;;  %v7708_v50 = vld [vmem:[%s11673_s18 + $0x108] sm:$0xff]  }
 0x123   :  { %7486 = vmatprep.mubr.msk.bf16.mxu1 %vm7901_vm0, %v11360_v49 }
 0x125   :  { %7557 = vmatpush3.bf16.msra.mxu0 %v7711_v17  ;;  %v7685_v17 = vld [vmem:[%s11673_s18 + $0x120] sm:$0xff]  }
 0x127   :  { %7511 = vmatmul.mubr.msk.bf16.gmra.mxu0 %vm847_vm1, %v7706_v48  ;;  %v7688_v48 = vld [vmem:[%s11673_s18 + $0x128] sm:$0xff]  }
 0x128   :  { %7514 = vmatprep.mubr.msk.bf16.mxu0 %vm7901_vm0, %v11360_v49 }
 0x12a   :  { %7487 = vmatmul.mubr.msk.bf16.gmra.mxu1 %vm847_vm1, %v7676_v18  ;;  %v7712_v18 = vld [vmem:[%s11673_s18 + $0x140] sm:$0xff]  }
 0x12b   :  { %7490 = vmatprep.mubr.msk.bf16.mxu1 %vm7901_vm0, %v11360_v49 }
 0x12f   :  { %7515 = vmatmul.mubr.msk.bf16.gmra.mxu0 %vm847_vm1, %v7708_v50  ;;  %v7691_v50 = vld [vmem:[%s11673_s18 + $0x130] sm:$0xff]  }
 0x130   :  { %7518 = vmatprep.mubr.msk.bf16.mxu0 %vm7901_vm0, %v11360_v49 }
 0x132   :  { %7491 = vmatmul.mubr.msk.bf16.gmra.mxu1 %vm847_vm1, %v7680_v19  ;;  %v7713_v19 = vld [vmem:[%s11673_s18 + $0x148] sm:$0xff]  }
 0x133   :  { %7530 = vmatprep.mubr.msk.bf16.mxu1 %vm7901_vm0, %v11360_v49 }
 0x137   :  { %7519 = vmatmul.mubr.msk.bf16.gmra.mxu0 %vm847_vm1, %v7709_v51  ;;  %v7694_v51 = vld [vmem:[%s11673_s18 + $0x138] ss:$0 sps:$4 sm:$0xff]  }
 0x138   :  { %7558 = vmatprep.mubr.msk.bf16.mxu0 %vm7901_vm0, %v11360_v49 }
 0x13a   :  { %7531 = vmatmul.mubr.msk.bf16.vlgmr.msra.gmra.mxu1 %vm847_vm1, %v7682_v16  ;;  %v7714_v16 = vld [vmem:[%s11673_s18 + $0x150] sm:$0xff]  }
 0x13b   :  { %7534 = vmatprep.mubr.msk.bf16.mxu1 %vm7901_vm0, %v11360_v49 }
 0x13f   :  { %7559 = vmatmul.mubr.msk.bf16.vlgmr.msra.gmra.mxu0 %vm847_vm1, %v7712_v18  ;;  %v7716_v18 = vld [vmem:[%s11673_s18 + $0x160] ss:$0 sps:$4 sm:$0xff]  }
 0x140   :  { %7562 = vmatprep.mubr.msk.bf16.mxu0 %vm7901_vm0, %v11360_v49 }
 0x142   :  { %7535 = vmatmul.mubr.msk.bf16.gmra.mxu1 %vm847_vm1, %v7685_v17  ;;  %v7715_v17 = vld [vmem:[%s11673_s18 + $0x158] sm:$0xff]   ;;  %s7902_s18 = smov 64  }
 0x143   :  { %7538 = vmatprep.mubr.msk.bf16.mxu1 %vm7901_vm0, %v11360_v49 }
 0x147   :  { %7563 = vmatmul.mubr.msk.bf16.gmra.mxu0 %vm847_vm1, %v7713_v19 }
 0x148   :  { %7566 = vmatprep.mubr.msk.bf16.mxu0 %vm7901_vm0, %v11360_v49 }
 0x14a   :  { %7539 = vmatmul.mubr.msk.bf16.gmra.mxu1 %vm847_vm1, %v7688_v48 }
 0x14b   :  { %7542 = vmatprep.mubr.msk.bf16.mxu1 %vm7901_vm0, %v11360_v49 }
 0x14f   :  { %7567 = vmatmul.mubr.msk.bf16.gmra.mxu0 %vm847_vm1, %v7714_v16 }
 0x150   :  { %7570 = vmatprep.mubr.msk.bf16.mxu0 %vm7901_vm0, %v11360_v49 }
 0x152   :  { %7543 = vmatmul.mubr.msk.bf16.gmra.mxu1 %vm847_vm1, %v7691_v50 }
 0x153   :  { %7546 = vmatprep.mubr.msk.bf16.mxu1 %vm7901_vm0, %v11360_v49 }
 0x157   :  { %7571 = vmatmul.mubr.msk.bf16.gmra.mxu0 %vm847_vm1, %v7715_v17 }
 0x158   :  { %7574 = vmatprep.mubr.msk.bf16.mxu0 %vm7901_vm0, %v11360_v49 }
 0x15a   :  { %7547 = vmatmul.mubr.msk.bf16.gmra.mxu1 %vm847_vm1, %v7694_v51 }
 0x15f   :  { %7575 = vmatmul.mubr.msk.bf16.gmra.mxu0 %vm847_vm1, %v7716_v18 }
 0x16a   :  { %v913_v48 = vpop.f32.mrf.mxu1 }
 0x16b   :  { %vm939_vm2 = vcmp.gt.f32.partialorder %v913_v48, 0.0  ;;  %v948_v19 = vmul.f32 0.01, %v913_v48 }
 0x16c   :  { %v7344_v50 = vpop.f32.mrf.mxu1 }
 0x16d   :  { %v957_v16 = vsel %vm939_vm2, %v913_v48, %v948_v19 }
 0x16e   :  { %v7039_v52 = vpack.c.bf16 %v957_v16, %v957_v16  ;;  %v916_v53 = vpop.f32.mrf.mxu1 }
 0x16f   :  { %vm940_vm4 = vcmp.gt.f32.partialorder %v916_v53, 0.0  ;;  %v949_v51 = vmul.f32 0.01, %v916_v53 }
 0x170   :  { %v7345_v17 = vpop.f32.mrf.mxu1  ;;  %1004 = vst.msk [vmem:[#allocation2 + $0x50] sm:$0xf] %vm999_vm3, %v7039_v52 }
 0x171   :  { %v958_v49 = vsel %vm940_vm4, %v916_v53, %v949_v51 }
 0x172   :  { %v7040_v20 = vpack.c.bf16 %v958_v49, %v958_v49  ;;  %v921_v21 = vpop.f32.mrf.mxu1 }
 0x173   :  { %vm941_vm5 = vcmp.gt.f32.partialorder %v921_v21, 0.0  ;;  %v950_v54 = vmul.f32 0.01, %v921_v21 }
 0x174   :  { %v7348_v55 = vpop.f32.mrf.mxu1  ;;  %1005 = vst.msk [vmem:[#allocation2 + $0x64] sm:$0xf] %vm999_vm3, %v7040_v20 }
 0x175   :  { %v959_v18 = vsel %vm941_vm5, %v921_v21, %v950_v54 }
 0x176   :  { %v7041_v22 = vpack.c.bf16 %v959_v18, %v959_v18  ;;  %v924_v50 = vpop.f32.mrf.mxu1 }
 0x177   :  { %vm942_vm6 = vcmp.gt.f32.partialorder %v924_v50, 0.0  ;;  %v951_v48 = vmul.f32 0.01, %v924_v50  ;;  %v897_v53 = vpop.f32.mrf.mxu0 }
 0x178   :  { %v7349_v19 = vpop.f32.mrf.mxu1  ;;  %1006 = vst.msk [vmem:[#allocation2 + $0x78] sm:$0xf] %vm999_vm3, %v7041_v22  ;;  %vm935_vm8 = vcmp.gt.f32.partialorder %v897_v53, 0.0  ;;  %v944_v20 = vmul.f32 0.01, %v897_v53 }
 0x179   :  { %v960_v16 = vsel %vm942_vm6, %v924_v50, %v951_v48  ;;  %v7336_v51 = vpop.f32.mrf.mxu0 }
 0x17a   :  { %v7042_v17 = vpack.c.bf16 %v960_v16, %v960_v16  ;;  %v929_v23 = vpop.f32.mrf.mxu1  ;;  %v953_v18 = vsel %vm935_vm8, %v897_v53, %v944_v20 }
 0x17b   :  { %vm943_vm7 = vcmp.gt.f32.partialorder %v929_v23, 0.0  ;;  %v952_v52 = vmul.f32 0.01, %v929_v23  ;;  %v7035_v19 = vpack.c.bf16 %v953_v18, %v953_v18  ;;  %v900_v57 = vpop.f32.mrf.mxu0 }
 0x17c   :  { %v7352_v49 = vpop.f32.mrf.mxu1  ;;  %1007 = vst.msk [vmem:[#allocation2 + $0x8c] sm:$0xf] %vm999_vm3, %v7042_v17  ;;  %vm936_vm9 = vcmp.gt.f32.partialorder %v900_v57, 0.0  ;;  %v945_v22 = vmul.f32 0.01, %v900_v57 }
 0x17d   :  { %v961_v55 = vsel %vm943_vm7, %v929_v23, %v952_v52  ;;  %v7337_v48 = vpop.f32.mrf.mxu0  ;;  %1000 = vst.msk [vmem:[#allocation2] sm:$0xf] %vm999_vm3, %v7035_v19 }
 0x17e   :  { %v7043_v21 = vpack.c.bf16 %v961_v55, %v961_v55  ;;  %v932_v54 = vpop.f32.mrf.mxu1  ;;  %v954_v23 = vsel %vm936_vm9, %v900_v57, %v945_v22 }
 0x17f   :  { %v7036_v52 = vpack.c.bf16 %v954_v23, %v954_v23  ;;  %v905_v49 = vpop.f32.mrf.mxu0 }
 0x180   :  { %v7353_v56 = vpop.f32.mrf.mxu1  ;;  %1008 = vst.msk [vmem:[#allocation2 + $0xa0] sm:$0xf] %vm999_vm3, %v7043_v21  ;;  %vm937_vm11 = vcmp.gt.f32.partialorder %v905_v49, 0.0  ;;  %v946_v53 = vmul.f32 0.01, %v905_v49 }
 0x181   :  { %v7340_v54 = vpop.f32.mrf.mxu0  ;;  %1001 = vst.msk [vmem:[#allocation2 + $0x14] sm:$0xf] %vm999_vm3, %v7036_v52 }
 0x182   :  { %v1122_v50 = vpop.f32.mrf.mxu1  ;;  %v955_v51 = vsel %vm937_vm11, %v905_v49, %v946_v53 }
 0x183   :  { %vm1160_vm10 = vcmp.gt.f32.partialorder %v1122_v50, 0.0  ;;  %v1169_v16 = vmul.f32 0.01, %v1122_v50  ;;  %v7037_v19 = vpack.c.bf16 %v955_v51, %v955_v51  ;;  %v908_v57 = vpop.f32.mrf.mxu0 }
 0x184   :  { %v7364_v17 = vpop.f32.mrf.mxu1  ;;  %vm938_vm13 = vcmp.gt.f32.partialorder %v908_v57, 0.0  ;;  %v947_v48 = vmul.f32 0.01, %v908_v57 }
 0x185   :  { %v1178_v55 = vsel %vm1160_vm10, %v1122_v50, %v1169_v16  ;;  %v7341_v23 = vpop.f32.mrf.mxu0  ;;  %1002 = vst.msk [vmem:[#allocation2 + $0x28] sm:$0xf] %vm999_vm3, %v7037_v19  ;;  %v7717_v19 = vld [vmem:[%s11096_s5 + $0x78] sm:$0xff]  }
 0x186   :  { %v1125_v56 = vpop.f32.mrf.mxu1  ;;  %v7044_v20 = vpack.c.bf16 %v1178_v55, %v1178_v55  ;;  %v956_v52 = vsel %vm938_vm13, %v908_v57, %v947_v48  ;;  %7220 = vmatprep.subr.bf16.mxu1 %v7717_v19 }
 0x187   :  { %vm1161_vm12 = vcmp.gt.f32.partialorder %v1125_v56, 0.0  ;;  %v1170_v21 = vmul.f32 0.01, %v1125_v56  ;;  %v7038_v55 = vpack.c.bf16 %v956_v52, %v956_v52  ;;  %v1365_v53 = vpop.f32.mrf.mxu0 }
 0x188   :  { %1215 = vrot.lane.b32.xlu0 %v7044_v20, %s7902_s18  ;;  %v7365_v18 = vpop.f32.mrf.mxu1  ;;  %vm1403_vm15 = vcmp.gt.f32.partialorder %v1365_v53, 0.0  ;;  %v1412_v54 = vmul.f32 0.01, %v1365_v53 }
 0x189   :  { %v1179_v22 = vsel %vm1161_vm12, %v1125_v56, %v1170_v21  ;;  %v7392_v21 = vpop.f32.mrf.mxu0  ;;  %1003 = vst.msk [vmem:[#allocation2 + $0x3c] sm:$0xf] %vm999_vm3, %v7038_v55 }
 0x18a   :  { %v7045_v50 = vpack.c.bf16 %v1179_v22, %v1179_v22  ;;  %v1130_v16 = vpop.f32.mrf.mxu1  ;;  %v1421_v18 = vsel %vm1403_vm15, %v1365_v53, %v1412_v54  ;;  %v7720_v54 = vld [vmem:[%s11096_s5 + $0x30] sm:$0xff]  }
 0x18b   :  { %vm1162_vm14 = vcmp.gt.f32.partialorder %v1130_v16, 0.0  ;;  %v1171_v17 = vmul.f32 0.01, %v1130_v16  ;;  %v7053_v22 = vpack.c.bf16 %v1421_v18, %v1421_v18  ;;  %v1368_v48 = vpop.f32.mrf.mxu0 }
 0x18c   :  { %1217 = vrot.lane.b32.xlu0 %v7045_v50, %s7902_s18  ;;  %v7368_v49 = vpop.f32.mrf.mxu1  ;;  %v7718_v50 = vld [vmem:[%s11096_s5 + $0x38] sm:$0xff]   ;;  %vm1404_vm2 = vcmp.gt.f32.partialorder %v1368_v48, 0.0 }
 0x18d   :  { %v1180_v20 = vsel %vm1162_vm14, %v1130_v16, %v1171_v17  ;;  %v1413_v16 = vmul.f32 0.01, %v1368_v48  ;;  %v7393_v17 = vpop.f32.mrf.mxu0  ;;  %1467 = vst.msk [vmem:[#allocation2 + $0x4] sm:$0xf] %vm999_vm3, %v7053_v22  ;;  %7221 = vmatpush3.bf16.msra.mxu1 %v7718_v50  ;;  %v7719_v49 = vld [vmem:[%s11096_s5 + $0x70] sm:$0xff]  }
 0x18e   :  { %v7046_v51 = vpack.c.bf16 %v1180_v20, %v1180_v20  ;;  %v9946_v56 = vpop.f32.mrf.mxu1  ;;  %7222 = vmatprep.subr.bf16.mxu1 %v7719_v49 }
 0x18f   :  { %v1422_v52 = vsel %vm1404_vm2, %v1368_v48, %v1413_v16  ;;  %v1373_v20 = vpop.f32.mrf.mxu0  ;;  %v7722_v16 = vld [vmem:[%s11096_s5 + $0x28] sm:$0xff]   ;;  %vm1163_vm13 = vcmp.gt.f32.partialorder %v9946_v56, 0.0 }
 0x190   :  { %1219 = vrot.lane.b32.xlu0 %v7046_v51, %s7902_s18  ;;  %v7369_v57 = vpop.f32.mrf.mxu1  ;;  %v7054_v53 = vpack.c.bf16 %v1422_v52, %v1422_v52  ;;  %vm1405_vm4 = vcmp.gt.f32.partialorder %v1373_v20, 0.0  ;;  %v1414_v51 = vmul.f32 0.01, %v1373_v20 }
 0x191   :  { %v7396_v18 = vpop.f32.mrf.mxu0  ;;  %7223 = vmatpush3.bf16.msra.mxu1 %v7720_v54  ;;  %v7721_v57 = vld [vmem:[%s11096_s5 + $0x68] sm:$0xff]  }
 0x192   :  { %v9956_v23 = vpop.f32.mrf.mxu1  ;;  %1468 = vst.msk [vmem:[#allocation2 + $0x18] sm:$0xf] %vm999_vm3, %v7054_v53  ;;  %v1423_v19 = vsel %vm1405_vm4, %v1373_v20, %v1414_v51  ;;  %7224 = vmatprep.subr.bf16.mxu1 %v7721_v57  ;;  %v7723_v53 = vld [vmem:[%s11096_s5 + $0x60] sm:$0xff]  }
 0x193   :  { %v7055_v48 = vpack.c.bf16 %v1423_v19, %v1423_v19  ;;  %v1376_v50 = vpop.f32.mrf.mxu0  ;;  %v7724_v18 = vld [vmem:[%s11096_s5 + $0x20] sm:$0xff]   ;;  %vm1164_vm14 = vcmp.gt.f32.partialorder %v9956_v23, 0.0 }
 0x194   :  { %v7372_v55 = vpop.f32.mrf.mxu1  ;;  %vm1406_vm5 = vcmp.gt.f32.partialorder %v1376_v50, 0.0  ;;  %v1415_v17 = vmul.f32 0.01, %v1376_v50 }
 0x195   :  { %1469 = vst.msk [vmem:[#allocation2 + $0x2c] sm:$0xf] %vm999_vm3, %v7055_v48  ;;  %v7397_v49 = vpop.f32.mrf.mxu0  ;;  %7225 = vmatpush3.bf16.msra.mxu1 %v7722_v16 }
 0x196   :  { %v9965_v21 = vpop.f32.mrf.mxu1  ;;  %v1424_v55 = vsel %vm1406_vm5, %v1376_v50, %v1415_v17  ;;  %7226 = vmatprep.subr.bf16.mxu1 %v7723_v53  ;;  %v7725_v50 = vld [vmem:[%s11096_s5 + $0x58] sm:$0xff]  }
 0x197   :  { %v7056_v54 = vpack.c.bf16 %v1424_v55, %v1424_v55  ;;  %v1381_v51 = vpop.f32.mrf.mxu0  ;;  %v7726_v55 = vld [vmem:[%s11096_s5 + $0x18] sm:$0xff]   ;;  %vm1165_vm4 = vcmp.gt.f32.partialorder %v9965_v21, 0.0 }
 0x198   :  { %v7373_v22 = vpop.f32.mrf.mxu1  ;;  %vm1407_vm6 = vcmp.gt.f32.partialorder %v1381_v51, 0.0  ;;  %v1416_v19 = vmul.f32 0.01, %v1381_v51 }
 0x199   :  { %1470 = vst.msk [vmem:[#allocation2 + $0x40] sm:$0xf] %vm999_vm3, %v7056_v54  ;;  %v7400_v22 = vpop.f32.mrf.mxu0  ;;  %7227 = vmatpush3.bf16.msra.mxu1 %v7724_v18  ;;  %v7727_v18 = vld [vmem:[%s11096_s5 + $0x50] sm:$0xff]  }
 0x19a   :  { %v9974_v52 = vpop.f32.mrf.mxu1  ;;  %v1425_v48 = vsel %vm1407_vm6, %v1381_v51, %v1416_v19  ;;  %7228 = vmatprep.subr.bf16.mxu1 %v7725_v50 }
 0x19b   :  { %v7057_v17 = vpack.c.bf16 %v1425_v48, %v1425_v48  ;;  %v1384_v49 = vpop.f32.mrf.mxu0 }
 0x19c   :  { %v7376_v20 = vpop.f32.mrf.mxu1  ;;  %vm1408_vm7 = vcmp.gt.f32.partialorder %v1384_v49, 0.0  ;;  %v1417_v53 = vmul.f32 0.01, %v1384_v49 }
 0x19d   :  { %1471 = vst.msk [vmem:[#allocation2 + $0x54] sm:$0xf] %vm999_vm3, %v7057_v17  ;;  %v7401_v54 = vpop.f32.mrf.mxu0  ;;  %7229 = vmatpush3.bf16.msra.mxu1 %v7726_v55  ;;  %v7729_v55 = vld [vmem:[%s11096_s5 + $0x48] sm:$0xff]  }
 0x19e   :  { %v9983_v57 = vpop.f32.mrf.mxu1  ;;  %v1426_v51 = vsel %vm1408_vm7, %v1384_v49, %v1417_v53  ;;  %7230 = vmatprep.subr.bf16.mxu1 %v7727_v18  ;;  %vm1166_vm7 = vcmp.gt.f32.partialorder %v9974_v52, 0.0 }
 0x19f   :  { %v7058_v22 = vpack.c.bf16 %v1426_v51, %v1426_v51  ;;  %v1389_v48 = vpop.f32.mrf.mxu0 }
 0x1a0   :  { %v7377_v16 = vpop.f32.mrf.mxu1  ;;  %vm1409_vm8 = vcmp.gt.f32.partialorder %v1389_v48, 0.0  ;;  %v1418_v50 = vmul.f32 0.01, %v1389_v48 }
 0x1a1   :  { %v7728_v16 = vld [vmem:[%s11096_s5 + $0x10] sm:$0xff]   ;;  %1472 = vst.msk [vmem:[#allocation2 + $0x68] sm:$0xf] %vm999_vm3, %v7058_v22  ;;  %v7404_v17 = vpop.f32.mrf.mxu0 }
 0x1a2   :  { %v9992_v20 = vpop.f32.mrf.mxu1  ;;  %7231 = vmatpush3.bf16.msra.mxu1 %v7728_v16  ;;  %v1427_v49 = vsel %vm1409_vm8, %v1389_v48, %v1418_v50  ;;  %v7731_v16 = vld [vmem:[%s11096_s5 + $0x40] sm:$0xff]  }
 0x1a3   :  { %v7059_v54 = vpack.c.bf16 %v1427_v49, %v1427_v49  ;;  %v1392_v51 = vpop.f32.mrf.mxu0  ;;  %7232 = vmatprep.subr.bf16.mxu1 %v7729_v55 }
 0x1a4   :  { %v7380_v19 = vpop.f32.mrf.mxu1  ;;  %vm1410_vm9 = vcmp.gt.f32.partialorder %v1392_v51, 0.0  ;;  %v1419_v25 = vmul.f32 0.01, %v1392_v51 }
 0x1a5   :  { %v7730_v19 = vld [vmem:[%s11096_s5 + $0x8] sm:$0xff]   ;;  %1473 = vst.msk [vmem:[#allocation2 + $0x7c] sm:$0xf] %vm999_vm3, %v7059_v54  ;;  %v7405_v18 = vpop.f32.mrf.mxu0 }
 0x1a6   :  { %v1157_v24 = vpop.f32.mrf.mxu1  ;;  %7233 = vmatpush3.bf16.msra.mxu1 %v7730_v19  ;;  %v1428_v48 = vsel %vm1410_vm9, %v1392_v51, %v1419_v25  ;;  %v1172_v51 = vmul.f32 0.01, %v9946_v56 }
 0x1a7   :  { %v7060_v17 = vpack.c.bf16 %v1428_v48, %v1428_v48  ;;  %v1397_v49 = vpop.f32.mrf.mxu0  ;;  %7234 = vmatprep.subr.bf16.mxu1 %v7731_v16 }
 0x1a8   :  { %v7381_v53 = vpop.f32.mrf.mxu1  ;;  %vm1411_vm11 = vcmp.gt.f32.partialorder %v1397_v49, 0.0  ;;  %v1420_v58 = vmul.f32 0.01, %v1397_v49  ;;  %v1181_v26 = vsel %vm1163_vm13, %v9946_v56, %v1172_v51 }
 0x1a9   :  { %v7732_v53 = vld [vmem:[%s11096_s5] sm:$0xff]   ;;  %1474 = vst.msk [vmem:[#allocation2 + $0x90] sm:$0xf] %vm999_vm3, %v7060_v17  ;;  %v7408_v25 = vpop.f32.mrf.mxu0 }
 0x1aa   :  { %v1589_v24 = vpop.f32.mrf.mxu1  ;;  %7235 = vmatpush3.bf16.msra.mxu1 %v7732_v53  ;;  %v1429_v48 = vsel %vm1411_vm11, %v1397_v49, %v1420_v58 }
 0x1ab   :  { %vm1627_vm10 = vcmp.gt.f32.partialorder %v1589_v24, 0.0  ;;  %v1636_v22 = vmul.f32 0.01, %v1589_v24  ;;  %v1400_v16 = vpop.f32.mrf.mxu0 }
 0x1ac   :  { %v7420_v50 = vpop.f32.mrf.mxu1 }
 0x1ad   :  { %v1645_v55 = vsel %vm1627_vm10, %v1589_v24, %v1636_v22  ;;  %v11674_v50 = vmov 0.0   ;;  %v7061_v22 = vpack.c.bf16 %v1429_v48, %v1429_v48  ;;  %v7409_v53 = vpop.f32.mrf.mxu0  ;;  %vm1167_vm10 = vcmp.gt.f32.partialorder %v9983_v57, 0.0 }
 0x1ae   :  { %v1592_v54 = vpop.f32.mrf.mxu1  ;;  %v7062_v19 = vpack.c.bf16 %v1645_v55, %v1645_v55  ;;  %7578 = vmatprep.subr.bf16.mxu1 %v11674_v50  ;;  %v1173_v55 = vmul.f32 0.01, %v9956_v23 }
 0x1af   :  { %vm1628_vm12 = vcmp.gt.f32.partialorder %v1592_v54, 0.0  ;;  %v1637_v18 = vmul.f32 0.01, %v1592_v54  ;;  %1475 = vst.msk [vmem:[#allocation2 + $0xa4] sm:$0xf] %vm999_vm3, %v7061_v22 }
 0x1b0   :  { %1682 = vrot.lane.b32.xlu1 %v7062_v19, %s7902_s18  ;;  %v7421_v24 = vpop.f32.mrf.mxu1  ;;  %v1831_v19 = vpop.f32.mrf.mxu0 }
 0x1b1   :  { %v1646_v59 = vsel %vm1628_vm12, %v1592_v54, %v1637_v18  ;;  %vm1869_vm2 = vcmp.gt.f32.partialorder %v1831_v19, 0.0  ;;  %v1878_v54 = vmul.f32 0.01, %v1831_v19  ;;  %v7047_v18 = vpack.c.bf16 %v1181_v26, %v1181_v26 }
 0x1b2   :  { %v7063_v17 = vpack.c.bf16 %v1646_v59, %v1646_v59  ;;  %v1597_v25 = vpop.f32.mrf.mxu1  ;;  %v1182_v59 = vsel %vm1164_vm14, %v9956_v23, %v1173_v55  ;;  %v1174_v24 = vmul.f32 0.01, %v9965_v21  ;;  %v7448_v53 = vpop.f32.mrf.mxu0  ;;  %vm1168_vm14 = vcmp.gt.f32.partialorder %v9992_v20, 0.0 }
 0x1b3   :  { %vm1629_vm15 = vcmp.gt.f32.partialorder %v1597_v25, 0.0  ;;  %v1638_v58 = vmul.f32 0.01, %v1597_v25  ;;  %v1887_v51 = vsel %vm1869_vm2, %v1831_v19, %v1878_v54  ;;  %v7048_v55 = vpack.c.bf16 %v1182_v59, %v1182_v59 }
 0x1b4   :  { %1684 = vrot.lane.b32.xlu1 %v7063_v17, %s7902_s18  ;;  %v7424_v49 = vpop.f32.mrf.mxu1 }
 0x1b5   :  { %v1647_v48 = vsel %vm1629_vm15, %v1597_v25, %v1638_v58  ;;  %v7071_v25 = vpack.c.bf16 %v1887_v51, %v1887_v51  ;;  %v1834_v58 = vpop.f32.mrf.mxu0  ;;  %v1183_v49 = vsel %vm1165_vm4, %v9965_v21, %v1174_v24 }
 0x1b6   :  { %v7064_v22 = vpack.c.bf16 %v1647_v48, %v1647_v48  ;;  %v1600_v16 = vpop.f32.mrf.mxu1  ;;  %vm1870_vm6 = vcmp.gt.f32.partialorder %v1834_v58, 0.0  ;;  %v1879_v23 = vmul.f32 0.01, %v1834_v58  ;;  %v1175_v48 = vmul.f32 0.01, %v9974_v52 }
 0x1b7   :  { %vm1630_vm5 = vcmp.gt.f32.partialorder %v1600_v16, 0.0  ;;  %v1639_v56 = vmul.f32 0.01, %v1600_v16  ;;  %1933 = vst.msk [vmem:[#allocation2 + $0x8] sm:$0xf] %vm999_vm3, %v7071_v25  ;;  %v7449_v19 = vpop.f32.mrf.mxu0 }
 0x1b8   :  { %1221 = vrot.lane.b32.xlu1 %v7047_v18, %s7902_s18  ;;  %1686 = vrot.lane.b32.xlu0 %v7064_v22, %s7902_s18  ;;  %v7425_v17 = vpop.f32.mrf.mxu1  ;;  %v1888_v18 = vsel %vm1870_vm6, %v1834_v58, %v1879_v23  ;;  %v1184_v51 = vsel %vm1166_vm7, %v9974_v52, %v1175_v48 }
 0x1b9   :  { %v1648_v26 = vsel %vm1630_vm5, %v1600_v16, %v1639_v56  ;;  %v7072_v59 = vpack.c.bf16 %v1888_v18, %v1888_v18  ;;  %v1839_v16 = vpop.f32.mrf.mxu0  ;;  %v7049_v56 = vpack.c.bf16 %v1183_v49, %v1183_v49  ;;  %v1176_v17 = vmul.f32 0.01, %v9983_v57 }
 0x1ba   :  { %v7065_v53 = vpack.c.bf16 %v1648_v26, %v1648_v26  ;;  %v1605_v27 = vpop.f32.mrf.mxu1  ;;  %vm1871_vm9 = vcmp.gt.f32.partialorder %v1839_v16, 0.0  ;;  %v1880_v24 = vmul.f32 0.01, %v1839_v16  ;;  %v7050_v19 = vpack.c.bf16 %v1184_v51, %v1184_v51 }
 0x1bb   :  { %vm1631_vm8 = vcmp.gt.f32.partialorder %v1605_v27, 0.0  ;;  %v1640_v54 = vmul.f32 0.01, %v1605_v27  ;;  %1934 = vst.msk [vmem:[#allocation2 + $0x1c] sm:$0xf] %vm999_vm3, %v7072_v59  ;;  %v7452_v58 = vpop.f32.mrf.mxu0 }
 0x1bc   :  { %1223 = vrot.lane.b32.xlu0 %v7048_v55, %s7902_s18  ;;  %1688 = vrot.lane.b32.xlu1 %v7065_v53, %s7902_s18  ;;  %v7428_v22 = vpop.f32.mrf.mxu1  ;;  %v1889_v55 = vsel %vm1871_vm9, %v1839_v16, %v1880_v24  ;;  %v1177_v16 = vmul.f32 0.01, %v9992_v20 }
 0x1bd   :  { %v1649_v21 = vsel %vm1631_vm8, %v1605_v27, %v1640_v54  ;;  %v7073_v49 = vpack.c.bf16 %v1889_v55, %v1889_v55  ;;  %v1842_v53 = vpop.f32.mrf.mxu0  ;;  %v1185_v54 = vsel %vm1167_vm10, %v9983_v57, %v1176_v17 }
 0x1be   :  { %v7066_v25 = vpack.c.bf16 %v1649_v21, %v1649_v21  ;;  %v1608_v26 = vpop.f32.mrf.mxu1  ;;  %vm1872_vm12 = vcmp.gt.f32.partialorder %v1842_v53, 0.0  ;;  %v1881_v48 = vmul.f32 0.01, %v1842_v53 }
 0x1bf   :  { %vm1632_vm11 = vcmp.gt.f32.partialorder %v1608_v26, 0.0  ;;  %v1641_v23 = vmul.f32 0.01, %v1608_v26  ;;  %1935 = vst.msk [vmem:[#allocation2 + $0x30] sm:$0xf] %vm999_vm3, %v7073_v49  ;;  %v7453_v59 = vpop.f32.mrf.mxu0 }
 0x1c0   :  { %1225 = vrot.lane.b32.xlu1 %v7049_v56, %s7902_s18  ;;  %1690 = vrot.lane.b32.xlu0 %v7066_v25, %s7902_s18  ;;  %v7429_v27 = vpop.f32.mrf.mxu1  ;;  %v1890_v24 = vsel %vm1872_vm12, %v1842_v53, %v1881_v48 }
 0x1c1   :  { %v1650_v52 = vsel %vm1632_vm11, %v1608_v26, %v1641_v23  ;;  %v7074_v51 = vpack.c.bf16 %v1890_v24, %v1890_v24  ;;  %v1847_v25 = vpop.f32.mrf.mxu0  ;;  %v7051_v26 = vpack.c.bf16 %v1185_v54, %v1185_v54  ;;  %v1186_v27 = vsel %vm1168_vm14, %v9992_v20, %v1177_v16 }
 0x1c2   :  { %v7067_v18 = vpack.c.bf16 %v1650_v52, %v1650_v52  ;;  %v1613_v22 = vpop.f32.mrf.mxu1  ;;  %vm1873_vm15 = vcmp.gt.f32.partialorder %v1847_v25, 0.0  ;;  %v1882_v17 = vmul.f32 0.01, %v1847_v25 }
 0x1c3   :  { %vm1633_vm13 = vcmp.gt.f32.partialorder %v1613_v22, 0.0  ;;  %v1642_v21 = vmul.f32 0.01, %v1613_v22  ;;  %1936 = vst.msk [vmem:[#allocation2 + $0x44] sm:$0xf] %vm999_vm3, %v7074_v51  ;;  %v7456_v55 = vpop.f32.mrf.mxu0 }
 0x1c4   :  { %1227 = vrot.lane.b32.xlu0 %v7050_v19, %s7902_s18  ;;  %1692 = vrot.lane.b32.xlu1 %v7067_v18, %s7902_s18  ;;  %v7432_v56 = vpop.f32.mrf.mxu1  ;;  %v1891_v53 = vsel %vm1873_vm15, %v1847_v25, %v1882_v17 }
 0x1c5   :  { %v1651_v57 = vsel %vm1633_vm13, %v1613_v22, %v1642_v21  ;;  %v7075_v48 = vpack.c.bf16 %v1891_v53, %v1891_v53  ;;  %v1850_v19 = vpop.f32.mrf.mxu0  ;;  %v7052_v22 = vpack.c.bf16 %v1186_v27, %v1186_v27 }
 0x1c6   :  { %v7068_v58 = vpack.c.bf16 %v1651_v57, %v1651_v57  ;;  %v1616_v23 = vpop.f32.mrf.mxu1  ;;  %vm1874_vm4 = vcmp.gt.f32.partialorder %v1850_v19, 0.0  ;;  %v1883_v54 = vmul.f32 0.01, %v1850_v19 }
 0x1c7   :  { %vm1634_vm2 = vcmp.gt.f32.partialorder %v1616_v23, 0.0  ;;  %v1643_v49 = vmul.f32 0.01, %v1616_v23  ;;  %1937 = vst.msk [vmem:[#allocation2 + $0x58] sm:$0xf] %vm999_vm3, %v7075_v48  ;;  %v7457_v24 = vpop.f32.mrf.mxu0  ;;  %v7743_v48 = vld [vmem:[%s11096_s5 + $0xf8] sm:$0xff]  }
 0x1c8   :  { %1229 = vrot.lane.b32.xlu1 %v7051_v26, %s7902_s18  ;;  %1694 = vrot.lane.b32.xlu0 %v7068_v58, %s7902_s18  ;;  %v7433_v52 = vpop.f32.mrf.mxu1  ;;  %v1892_v16 = vsel %vm1874_vm4, %v1850_v19, %v1883_v54  ;;  %v7744_v19 = vld [vmem:[%s11096_s5 + $0xb8] sm:$0xff]  }
 0x1c9   :  { %v1652_v18 = vsel %vm1634_vm2, %v1616_v23, %v1643_v49  ;;  %v7076_v51 = vpack.c.bf16 %v1892_v16, %v1892_v16  ;;  %v1855_v25 = vpop.f32.mrf.mxu0  ;;  %7266 = vmatprep.subr.bf16.mxu0 %v7743_v48 }
 0x1ca   :  { %v7069_v59 = vpack.c.bf16 %v1652_v18, %v1652_v18  ;;  %v1621_v21 = vpop.f32.mrf.mxu1  ;;  %vm1875_vm6 = vcmp.gt.f32.partialorder %v1855_v25, 0.0  ;;  %v1884_v17 = vmul.f32 0.01, %v1855_v25  ;;  %v7745_v18 = vld [vmem:[%s11096_s5 + $0xf0] sm:$0xff]   ;;  %7267 = vmatpush3.bf16.msra.mxu0 %v7744_v19  ;;  %v7750_v19 = vld [vmem:[%s11096_s5 + $0xe0] sm:$0xff]  }
 0x1cb   :  { %vm1635_vm5 = vcmp.gt.f32.partialorder %v1621_v21, 0.0  ;;  %v1644_v20 = vmul.f32 0.01, %v1621_v21  ;;  %1938 = vst.msk [vmem:[#allocation2 + $0x6c] sm:$0xf] %vm999_vm3, %v7076_v51  ;;  %v7460_v23 = vpop.f32.mrf.mxu0  ;;  %7268 = vmatprep.subr.bf16.mxu0 %v7745_v18 }
 0x1cc   :  { %1231 = vrot.lane.b32.xlu0 %v7052_v22, %s7902_s18  ;;  %1696 = vrot.lane.b32.xlu1 %v7069_v59, %s7902_s18  ;;  %v7436_v56 = vpop.f32.mrf.mxu1  ;;  %v1893_v55 = vsel %vm1875_vm6, %v1855_v25, %v1884_v17 }
 0x1cd   :  { %v1653_v57 = vsel %vm1635_vm5, %v1621_v21, %v1644_v20  ;;  %v7077_v49 = vpack.c.bf16 %v1893_v55, %v1893_v55  ;;  %v1858_v53 = vpop.f32.mrf.mxu0  ;;  %v7746_v56 = vld [vmem:[%s11096_s5 + $0xb0] sm:$0xff]   ;;  %vm1242_vm5 = vcmask 1043968  }
 0x1ce   :  { %v7070_v26 = vpack.c.bf16 %v1653_v57, %v1653_v57  ;;  %v1624_v58 = vpop.f32.mrf.mxu1  ;;  %vm1876_vm7 = vcmp.gt.f32.partialorder %v1858_v53, 0.0  ;;  %v1885_v52 = vmul.f32 0.01, %v1858_v53  ;;  %v7748_v57 = vld [vmem:[%s11096_s5 + $0xe8] sm:$0xff]   ;;  %7269 = vmatpush3.bf16.msra.mxu0 %v7746_v56 }
 0x1cf   :  { %1939 = vst.msk [vmem:[#allocation2 + $0x80] sm:$0xf] %vm999_vm3, %v7077_v49  ;;  %v7461_v22 = vpop.f32.mrf.mxu0  ;;  %7270 = vmatprep.subr.bf16.mxu0 %v7748_v57 }
 0x1d0   :  { %1698 = vrot.lane.b32.xlu1 %v7070_v26, %s7902_s18  ;;  %v7437_v27 = vpop.f32.mrf.mxu1  ;;  %v1894_v21 = vsel %vm1876_vm7, %v1858_v53, %v1885_v52  ;;  %v7749_v52 = vld [vmem:[%s11096_s5 + $0xa8] sm:$0xff]  }
 0x1d1   :  { %v7078_v20 = vpack.c.bf16 %v1894_v21, %v1894_v21  ;;  %v1863_v16 = vpop.f32.mrf.mxu0 }
 0x1d2   :  { %v2055_v54 = vpop.f32.mrf.mxu1  ;;  %vm1877_vm9 = vcmp.gt.f32.partialorder %v1863_v16, 0.0  ;;  %v1886_v25 = vmul.f32 0.01, %v1863_v16  ;;  %7271 = vmatpush3.bf16.msra.mxu0 %v7749_v52 }
 0x1d3   :  { %vm2093_vm8 = vcmp.gt.f32.partialorder %v2055_v54, 0.0  ;;  %v2102_v59 = vmul.f32 0.01, %v2055_v54  ;;  %1940 = vst.msk [vmem:[#allocation2 + $0x94] sm:$0xf] %vm999_vm3, %v7078_v20  ;;  %v7464_v58 = vpop.f32.mrf.mxu0  ;;  %7272 = vmatprep.subr.bf16.mxu0 %v7750_v19 }
 0x1d4   :  { %v7476_v24 = vpop.f32.mrf.mxu1  ;;  %v1895_v55 = vsel %vm1877_vm9, %v1863_v16, %v1886_v25  ;;  %v7753_v16 = vld [vmem:[%s11096_s5 + $0xd8] sm:$0xff]  }
 0x1d5   :  { %v2111_v51 = vsel %vm2093_vm8, %v2055_v54, %v2102_v59  ;;  %v7079_v49 = vpack.c.bf16 %v1895_v55, %v1895_v55  ;;  %v1866_v53 = vpop.f32.mrf.mxu0  ;;  %v7751_v24 = vld [vmem:[%s11096_s5 + $0xa0] sm:$0xff]   ;;  %v7754_v58 = vld [vmem:[%s11096_s5 + $0x98] sm:$0xff]  }
 0x1d6   :  { %v7080_v17 = vpack.c.bf16 %v2111_v51, %v2111_v51  ;;  %v2058_v26 = vpop.f32.mrf.mxu1  ;;  %7273 = vmatpush3.bf16.msra.mxu0 %v7751_v24 }
 0x1d7   :  { %vm2094_vm10 = vcmp.gt.f32.partialorder %v2058_v26, 0.0  ;;  %v2103_v23 = vmul.f32 0.01, %v2058_v26  ;;  %1941 = vst.msk [vmem:[#allocation2 + $0xa8] sm:$0xf] %vm999_vm3, %v7079_v49  ;;  %v7465_v22 = vpop.f32.mrf.mxu0  ;;  %7274 = vmatprep.subr.bf16.mxu0 %v7753_v16 }
 0x1d8   :  { %2148 = vrot.lane.b32.xlu0 %v7080_v17, %s7902_s18  ;;  %v7477_v27 = vpop.f32.mrf.mxu1 }
 0x1d9   :  { %v2112_v48 = vsel %vm2094_vm10, %v2058_v26, %v2103_v23  ;;  %v2297_v21 = vpop.f32.mrf.mxu0 }
 0x1da   :  { %v7081_v18 = vpack.c.bf16 %v2112_v48, %v2112_v48  ;;  %v10081_v54 = vpop.f32.mrf.mxu1  ;;  %vm2335_vm11 = vcmp.gt.f32.partialorder %v2297_v21, 0.0  ;;  %v2344_v20 = vmul.f32 0.01, %v2297_v21  ;;  %7275 = vmatpush3.bf16.msra.mxu0 %v7754_v58 }
 0x1db   :  { %v7504_v51 = vpop.f32.mrf.mxu0  ;;  %vm2095_vm8 = vcmp.gt.f32.partialorder %v10081_v54, 0.0 }
 0x1dc   :  { %2150 = vrot.lane.b32.xlu1 %v7081_v18, %s7902_s18  ;;  %v7480_v59 = vpop.f32.mrf.mxu1  ;;  %v2353_v25 = vsel %vm2335_vm11, %v2297_v21, %v2344_v20 }
 0x1dd   :  { %v7089_v17 = vpack.c.bf16 %v2353_v25, %v2353_v25  ;;  %v2300_v26 = vpop.f32.mrf.mxu0 }
 0x1de   :  { %v10091_v56 = vpop.f32.mrf.mxu1  ;;  %vm2336_vm12 = vcmp.gt.f32.partialorder %v2300_v26, 0.0  ;;  %v2345_v23 = vmul.f32 0.01, %v2300_v26 }
 0x1df   :  { %2399 = vst.msk [vmem:[#allocation2 + $0xc] sm:$0xf] %vm999_vm3, %v7089_v17  ;;  %v7505_v27 = vpop.f32.mrf.mxu0  ;;  %vm2096_vm11 = vcmp.gt.f32.partialorder %v10091_v56, 0.0 }
 0x1e0   :  { %v7481_v57 = vpop.f32.mrf.mxu1  ;;  %v2354_v49 = vsel %vm2336_vm12, %v2300_v26, %v2345_v23 }
 0x1e1   :  { %v7090_v52 = vpack.c.bf16 %v2354_v49, %v2354_v49  ;;  %v2305_v48 = vpop.f32.mrf.mxu0 }
 0x1e2   :  { %v10096_v55 = vpop.f32.mrf.mxu1  ;;  %vm2337_vm13 = vcmp.gt.f32.partialorder %v2305_v48, 0.0  ;;  %v2346_v19 = vmul.f32 0.01, %v2305_v48 }
 0x1e3   :  { %2400 = vst.msk [vmem:[#allocation2 + $0x20] sm:$0xf] %vm999_vm3, %v7090_v52  ;;  %v7508_v22 = vpop.f32.mrf.mxu0 }
 0x1e4   :  { %v7484_v53 = vpop.f32.mrf.mxu1  ;;  %v2355_v59 = vsel %vm2337_vm13, %v2305_v48, %v2346_v19  ;;  %vm2097_vm13 = vcmp.gt.f32.partialorder %v10096_v55, 0.0 }
 0x1e5   :  { %v7091_v24 = vpack.c.bf16 %v2355_v59, %v2355_v59  ;;  %v2308_v20 = vpop.f32.mrf.mxu0 }
 0x1e6   :  { %v10099_v18 = vpop.f32.mrf.mxu1  ;;  %vm2338_vm14 = vcmp.gt.f32.partialorder %v2308_v20, 0.0  ;;  %v2347_v16 = vmul.f32 0.01, %v2308_v20 }
 0x1e7   :  { %2401 = vst.msk [vmem:[#allocation2 + $0x34] sm:$0xf] %vm999_vm3, %v7091_v24  ;;  %v7509_v25 = vpop.f32.mrf.mxu0 }
 0x1e8   :  { %v7485_v21 = vpop.f32.mrf.mxu1  ;;  %v2356_v57 = vsel %vm2338_vm14, %v2308_v20, %v2347_v16  ;;  %v7755_v20 = vld [vmem:[%s11096_s5 + $0xd0] sm:$0xff]  }
 0x1e9   :  { %v7092_v26 = vpack.c.bf16 %v2356_v57, %v2356_v57  ;;  %v2313_v58 = vpop.f32.mrf.mxu0  ;;  %v7756_v16 = vld [vmem:[%s11096_s5 + $0x90] sm:$0xff]   ;;  %7276 = vmatprep.subr.bf16.mxu0 %v7755_v20 }
 0x1ea   :  { %v10102_v51 = vpop.f32.mrf.mxu1  ;;  %vm2339_vm15 = vcmp.gt.f32.partialorder %v2313_v58, 0.0  ;;  %v2348_v23 = vmul.f32 0.01, %v2313_v58  ;;  %7277 = vmatpush3.bf16.msra.mxu0 %v7756_v16  ;;  %v2104_v16 = vmul.f32 0.01, %v10081_v54 }
 0x1eb   :  { %2402 = vst.msk [vmem:[#allocation2 + $0x48] sm:$0xf] %vm999_vm3, %v7092_v26  ;;  %v7512_v49 = vpop.f32.mrf.mxu0 }
 0x1ec   :  { %v7488_v17 = vpop.f32.mrf.mxu1  ;;  %v2357_v53 = vsel %vm2339_vm15, %v2313_v58, %v2348_v23 }
 0x1ed   :  { %v7093_v48 = vpack.c.bf16 %v2357_v53, %v2357_v53  ;;  %v2316_v19 = vpop.f32.mrf.mxu0  ;;  %v7758_v53 = vld [vmem:[%s11096_s5 + $0xc8] sm:$0xff]  }
 0x1ee   :  { %v10105_v27 = vpop.f32.mrf.mxu1  ;;  %vm2340_vm2 = vcmp.gt.f32.partialorder %v2316_v19, 0.0  ;;  %v2349_v22 = vmul.f32 0.01, %v2316_v19  ;;  %7278 = vmatprep.subr.bf16.mxu0 %v7758_v53 }
 0x1ef   :  { %2403 = vst.msk [vmem:[#allocation2 + $0x5c] sm:$0xf] %vm999_vm3, %v7093_v48  ;;  %v7513_v21 = vpop.f32.mrf.mxu0 }
 0x1f0   :  { %v7489_v52 = vpop.f32.mrf.mxu1  ;;  %v2358_v24 = vsel %vm2340_vm2, %v2316_v19, %v2349_v22  ;;  %vm2098_vm2 = vcmp.gt.f32.partialorder %v10099_v18, 0.0 }
 0x1f1   :  { %v7094_v57 = vpack.c.bf16 %v2358_v24, %v2358_v24  ;;  %v2321_v17 = vpop.f32.mrf.mxu0  ;;  %v7759_v52 = vld [vmem:[%s11096_s5 + $0x88] sm:$0xff]  }
 0x1f2   :  { %v10108_v59 = vpop.f32.mrf.mxu1  ;;  %vm2341_vm4 = vcmp.gt.f32.partialorder %v2321_v17, 0.0  ;;  %v2350_v26 = vmul.f32 0.01, %v2321_v17  ;;  %7279 = vmatpush3.bf16.msra.mxu0 %v7759_v52 }
 0x1f3   :  { %2404 = vst.msk [vmem:[#allocation2 + $0x70] sm:$0xf] %vm999_vm3, %v7094_v57  ;;  %v7516_v23 = vpop.f32.mrf.mxu0 }
 0x1f4   :  { %v7492_v25 = vpop.f32.mrf.mxu1  ;;  %v2359_v49 = vsel %vm2341_vm4, %v2321_v17, %v2350_v26  ;;  %v7761_v26 = vld [vmem:[%s11096_s5 + $0xc0] sm:$0xff]  }
 0x1f5   :  { %v7095_v19 = vpack.c.bf16 %v2359_v49, %v2359_v49  ;;  %v2324_v22 = vpop.f32.mrf.mxu0  ;;  %v7763_v49 = vld [vmem:[%s11096_s5 + $0x80] sm:$0xff]   ;;  %7280 = vmatprep.subr.bf16.mxu0 %v7761_v26 }
 0x1f6   :  { %v2090_v58 = vpop.f32.mrf.mxu1  ;;  %vm2342_vm6 = vcmp.gt.f32.partialorder %v2324_v22, 0.0  ;;  %v2351_v21 = vmul.f32 0.01, %v2324_v22  ;;  %7281 = vmatpush3.bf16.msra.mxu0 %v7763_v49 }
 0x1f7   :  { %2405 = vst.msk [vmem:[#allocation2 + $0x84] sm:$0xf] %vm999_vm3, %v7095_v19  ;;  %v7517_v17 = vpop.f32.mrf.mxu0 }
 0x1f8   :  { %v7493_v48 = vpop.f32.mrf.mxu1  ;;  %v2360_v57 = vsel %vm2342_vm6, %v2324_v22, %v2351_v21  ;;  %v2113_v21 = vsel %vm2095_vm8, %v10081_v54, %v2104_v16  ;;  %v2105_v17 = vmul.f32 0.01, %v10091_v56 }
 0x1f9   :  { %v7096_v23 = vpack.c.bf16 %v2360_v57, %v2360_v57  ;;  %v2329_v52 = vpop.f32.mrf.mxu0  ;;  %v7082_v60 = vpack.c.bf16 %v2113_v21, %v2113_v21 }
 0x1fa   :  { %v1216_v24 = vpop.permute.xlu0 %1215  ;;  %v2521_v20 = vpop.f32.mrf.mxu1  ;;  %vm2343_vm9 = vcmp.gt.f32.partialorder %v2329_v52, 0.0  ;;  %v2352_v22 = vmul.f32 0.01, %v2329_v52  ;;  %v2114_v16 = vsel %vm2096_vm11, %v10091_v56, %v2105_v17 }
 0x1fb   :  { %1243 = vst.msk [vmem:[#allocation2] sm:$0xf] %vm1242_vm5, %v1216_v24  ;;  %vm2559_vm7 = vcmp.gt.f32.partialorder %v2521_v20, 0.0  ;;  %v2568_v25 = vmul.f32 0.01, %v2521_v20  ;;  %v7083_v21 = vpack.c.bf16 %v2114_v16, %v2114_v16 }
 0x1fc   :  { %v7532_v58 = vpop.f32.mrf.mxu1  ;;  %2406 = vst.msk [vmem:[#allocation2 + $0x98] sm:$0xf] %vm999_vm3, %v7096_v23 }
 0x1fd   :  { %v2577_v53 = vsel %vm2559_vm7, %v2521_v20, %v2568_v25  ;;  %v7520_v58 = vpop.f32.mrf.mxu0  ;;  %v2361_v25 = vsel %vm2343_vm9, %v2329_v52, %v2352_v22  ;;  %vm2099_vm7 = vcmp.gt.f32.partialorder %v10102_v51, 0.0 }
 0x1fe   :  { %v7098_v48 = vpack.c.bf16 %v2577_v53, %v2577_v53  ;;  %v1218_v19 = vpop.permute.xlu0 %1217  ;;  %v2524_v24 = vpop.f32.mrf.mxu1  ;;  %v7097_v23 = vpack.c.bf16 %v2361_v25, %v2361_v25 }
 0x1ff   :  { %1244 = vst.msk [vmem:[#allocation2 + $0x14] sm:$0xf] %vm1242_vm5, %v1218_v19  ;;  %vm2560_vm10 = vcmp.gt.f32.partialorder %v2524_v24, 0.0  ;;  %v2569_v57 = vmul.f32 0.01, %v2524_v24  ;;  %v2332_v53 = vpop.f32.mrf.mxu0 }
 0x200   :  { %2614 = vrot.lane.b32.xlu0 %v7098_v48, %s7902_s18  ;;  %v7533_v20 = vpop.f32.mrf.mxu1  ;;  %v2106_v19 = vmul.f32 0.01, %v10096_v55  ;;  %2407 = vst.msk [vmem:[#allocation2 + $0xac] sm:$0xf] %vm999_vm3, %v7097_v23 }
 0x201   :  { %v2578_v26 = vsel %vm2560_vm10, %v2524_v24, %v2569_v57  ;;  %v7521_v48 = vpop.f32.mrf.mxu0  ;;  %v2107_v20 = vmul.f32 0.01, %v10099_v18  ;;  %vm2100_vm10 = vcmp.gt.f32.partialorder %v10105_v27, 0.0 }
 0x202   :  { %v7099_v49 = vpack.c.bf16 %v2578_v26, %v2578_v26  ;;  %v1220_v61 = vpop.permute.xlu0 %1219  ;;  %v2529_v54 = vpop.f32.mrf.mxu1 }
 0x203   :  { %1245 = vst.msk [vmem:[#allocation2 + $0x28] sm:$0xf] %vm1242_vm5, %v1220_v61  ;;  %vm2561_vm12 = vcmp.gt.f32.partialorder %v2529_v54, 0.0  ;;  %v2570_v58 = vmul.f32 0.01, %v2529_v54  ;;  %v2763_v22 = vpop.f32.mrf.mxu0  ;;  %v2115_v61 = vsel %vm2097_vm13, %v10096_v55, %v2106_v19  ;;  %v2116_v19 = vsel %vm2098_vm2, %v10099_v18, %v2107_v20 }
 0x204   :  { %2152 = vrot.lane.b32.xlu0 %v7082_v60, %s7902_s18  ;;  %2616 = vrot.lane.b32.xlu1 %v7099_v49, %s7902_s18  ;;  %v7536_v52 = vpop.f32.mrf.mxu1  ;;  %vm2801_vm14 = vcmp.gt.f32.partialorder %v2763_v22, 0.0  ;;  %v2810_v57 = vmul.f32 0.01, %v2763_v22  ;;  %v7084_v16 = vpack.c.bf16 %v2115_v61, %v2115_v61  ;;  %vm2101_vm13 = vcmp.gt.f32.partialorder %v10108_v59, 0.0 }
 0x205   :  { %v2579_v24 = vsel %vm2561_vm12, %v2529_v54, %v2570_v58  ;;  %v7560_v26 = vpop.f32.mrf.mxu0  ;;  %v2108_v52 = vmul.f32 0.01, %v10102_v51 }
 0x206   :  { %v7100_v56 = vpack.c.bf16 %v2579_v24, %v2579_v24  ;;  %v2532_v17 = vpop.f32.mrf.mxu1  ;;  %v2819_v23 = vsel %vm2801_vm14, %v2763_v22, %v2810_v57 }
 0x207   :  { %vm2562_vm15 = vcmp.gt.f32.partialorder %v2532_v17, 0.0  ;;  %v2571_v25 = vmul.f32 0.01, %v2532_v17  ;;  %v7107_v49 = vpack.c.bf16 %v2819_v23, %v2819_v23  ;;  %v2766_v54 = vpop.f32.mrf.mxu0  ;;  %v2109_v23 = vmul.f32 0.01, %v10105_v27 }
 0x208   :  { %2154 = vrot.lane.b32.xlu1 %v7083_v21, %s7902_s18  ;;  %2618 = vrot.lane.b32.xlu0 %v7100_v56, %s7902_s18  ;;  %v7537_v60 = vpop.f32.mrf.mxu1  ;;  %vm2802_vm4 = vcmp.gt.f32.partialorder %v2766_v54, 0.0  ;;  %v2811_v55 = vmul.f32 0.01, %v2766_v54 }
 0x209   :  { %v2580_v53 = vsel %vm2562_vm15, %v2532_v17, %v2571_v25  ;;  %2865 = vst.msk [vmem:[#allocation2 + $0x10] sm:$0xf] %vm999_vm3, %v7107_v49  ;;  %v7561_v21 = vpop.f32.mrf.mxu0  ;;  %v7085_v25 = vpack.c.bf16 %v2116_v19, %v2116_v19  ;;  %v2117_v60 = vsel %vm2099_vm7, %v10102_v51, %v2108_v52 }
 0x20a   :  { %v7101_v58 = vpack.c.bf16 %v2580_v53, %v2580_v53  ;;  %v2537_v48 = vpop.f32.mrf.mxu1  ;;  %v2820_v56 = vsel %vm2802_vm4, %v2766_v54, %v2811_v55  ;;  %v7086_v19 = vpack.c.bf16 %v2117_v60, %v2117_v60  ;;  %v2118_v21 = vsel %vm2100_vm10, %v10105_v27, %v2109_v23 }
 0x20b   :  { %vm2563_vm6 = vcmp.gt.f32.partialorder %v2537_v48, 0.0  ;;  %v2572_v24 = vmul.f32 0.01, %v2537_v48  ;;  %v7108_v57 = vpack.c.bf16 %v2820_v56, %v2820_v56  ;;  %v2771_v61 = vpop.f32.mrf.mxu0 }
 0x20c   :  { %2156 = vrot.lane.b32.xlu0 %v7084_v16, %s7902_s18  ;;  %2620 = vrot.lane.b32.xlu1 %v7101_v58, %s7902_s18  ;;  %v7540_v22 = vpop.f32.mrf.mxu1  ;;  %vm2803_vm8 = vcmp.gt.f32.partialorder %v2771_v61, 0.0  ;;  %v2812_v26 = vmul.f32 0.01, %v2771_v61 }
 0x20d   :  { %v2581_v17 = vsel %vm2563_vm6, %v2537_v48, %v2572_v24  ;;  %2866 = vst.msk [vmem:[#allocation2 + $0x24] sm:$0xf] %vm999_vm3, %v7108_v57  ;;  %v7564_v49 = vpop.f32.mrf.mxu0  ;;  %v2110_v22 = vmul.f32 0.01, %v10108_v59 }
 0x20e   :  { %v7102_v18 = vpack.c.bf16 %v2581_v17, %v2581_v17  ;;  %v2540_v20 = vpop.f32.mrf.mxu1  ;;  %v2821_v16 = vsel %vm2803_vm8, %v2771_v61, %v2812_v26  ;;  %v7087_v26 = vpack.c.bf16 %v2118_v21, %v2118_v21 }
 0x20f   :  { %vm2564_vm9 = vcmp.gt.f32.partialorder %v2540_v20, 0.0  ;;  %v2573_v53 = vmul.f32 0.01, %v2540_v20  ;;  %v7109_v48 = vpack.c.bf16 %v2821_v16, %v2821_v16  ;;  %v2774_v55 = vpop.f32.mrf.mxu0 }
 0x210   :  { %2158 = vrot.lane.b32.xlu1 %v7085_v25, %s7902_s18  ;;  %2622 = vrot.lane.b32.xlu0 %v7102_v18, %s7902_s18  ;;  %v7541_v54 = vpop.f32.mrf.mxu1  ;;  %vm2804_vm11 = vcmp.gt.f32.partialorder %v2774_v55, 0.0  ;;  %v2813_v24 = vmul.f32 0.01, %v2774_v55 }
 0x211   :  { %v2582_v58 = vsel %vm2564_vm9, %v2540_v20, %v2573_v53  ;;  %2867 = vst.msk [vmem:[#allocation2 + $0x38] sm:$0xf] %vm999_vm3, %v7109_v48  ;;  %v7565_v17 = vpop.f32.mrf.mxu0  ;;  %v2119_v53 = vsel %vm2101_vm13, %v10108_v59, %v2110_v22 }
 0x212   :  { %v7103_v51 = vpack.c.bf16 %v2582_v58, %v2582_v58  ;;  %v2545_v52 = vpop.f32.mrf.mxu1  ;;  %v2822_v61 = vsel %vm2804_vm11, %v2774_v55, %v2813_v24 }
 0x213   :  { %vm2565_vm12 = vcmp.gt.f32.partialorder %v2545_v52, 0.0  ;;  %v2574_v56 = vmul.f32 0.01, %v2545_v52  ;;  %v7110_v18 = vpack.c.bf16 %v2822_v61, %v2822_v61  ;;  %v2779_v20 = vpop.f32.mrf.mxu0 }
 0x214   :  { %2160 = vrot.lane.b32.xlu0 %v7086_v19, %s7902_s18  ;;  %2624 = vrot.lane.b32.xlu1 %v7103_v51, %s7902_s18  ;;  %v7544_v57 = vpop.f32.mrf.mxu1  ;;  %vm2805_vm14 = vcmp.gt.f32.partialorder %v2779_v20, 0.0  ;;  %v2814_v23 = vmul.f32 0.01, %v2779_v20  ;;  %v7088_v51 = vpack.c.bf16 %v2119_v53, %v2119_v53 }
 0x215   :  { %v2583_v25 = vsel %vm2565_vm12, %v2545_v52, %v2574_v56  ;;  %2868 = vst.msk [vmem:[#allocation2 + $0x4c] sm:$0xf] %vm999_vm3, %v7110_v18  ;;  %v7568_v54 = vpop.f32.mrf.mxu0 }
 0x216   :  { %v7104_v27 = vpack.c.bf16 %v2583_v25, %v2583_v25  ;;  %v2548_v60 = vpop.f32.mrf.mxu1  ;;  %v2823_v58 = vsel %vm2805_vm14, %v2779_v20, %v2814_v23  ;;  %v3571_v54 = vld [vmem:[%s11094_s3] sm:$0xff] }
 0x217   :  { %vm2566_vm15 = vcmp.gt.f32.partialorder %v2548_v60, 0.0  ;;  %v2575_v49 = vmul.f32 0.01, %v2548_v60  ;;  %v7111_v55 = vpack.c.bf16 %v2823_v58, %v2823_v58  ;;  %v2782_v19 = vpop.f32.mrf.mxu0 }
 0x218   :  { %2162 = vrot.lane.b32.xlu1 %v7087_v26, %s7902_s18  ;;  %2626 = vrot.lane.b32.xlu0 %v7104_v27, %s7902_s18  ;;  %v7545_v16 = vpop.f32.mrf.mxu1  ;;  %vm2806_vm2 = vcmp.gt.f32.partialorder %v2782_v19, 0.0  ;;  %v2815_v21 = vmul.f32 0.01, %v2782_v19 }
 0x219   :  { %v2584_v48 = vsel %vm2566_vm15, %v2548_v60, %v2575_v49  ;;  %2869 = vst.msk [vmem:[#allocation2 + $0x60] sm:$0xf] %vm999_vm3, %v7111_v55  ;;  %v7569_v22 = vpop.f32.mrf.mxu0  ;;  %v3572_v16 = vld [vmem:[%s11094_s3 + $0x8] sm:$0xff]  ;;  %v11378_v55 = vmov 0  }
 0x21a   :  { %v7105_v52 = vpack.c.bf16 %v2584_v48, %v2584_v48  ;;  %v2553_v24 = vpop.f32.mrf.mxu1  ;;  %v2824_v17 = vsel %vm2806_vm2, %v2782_v19, %v2815_v21  ;;  %7634 = vset.pattern.permute.xlu0 %v11378_v55  ;;  %7635 = vset.pattern.permute.xlu1 %v11378_v55 }
 0x21b   :  { %vm2567_vm4 = vcmp.gt.f32.partialorder %v2553_v24, 0.0  ;;  %v2576_v59 = vmul.f32 0.01, %v2553_v24  ;;  %v7112_v61 = vpack.c.bf16 %v2824_v17, %v2824_v17  ;;  %v2787_v25 = vpop.f32.mrf.mxu0 }
 0x21c   :  { %2164 = vrot.lane.b32.xlu0 %v7088_v51, %s7902_s18  ;;  %2628 = vrot.lane.b32.xlu1 %v7105_v52, %s7902_s18  ;;  %v7548_v56 = vpop.f32.mrf.mxu1  ;;  %vm2807_vm6 = vcmp.gt.f32.partialorder %v2787_v25, 0.0  ;;  %v2816_v26 = vmul.f32 0.01, %v2787_v25  ;;  %v3574_v52 = vld [vmem:[%s11094_s3 + $0x18] sm:$0xff] }
 0x21d   :  { %v2585_v57 = vsel %vm2567_vm4, %v2553_v24, %v2576_v59  ;;  %2870 = vst.msk [vmem:[#allocation2 + $0x74] sm:$0xf] %vm999_vm3, %v7112_v61  ;;  %v7572_v27 = vpop.f32.mrf.mxu0  ;;  %v3573_v59 = vld [vmem:[%s11094_s3 + $0x10] sm:$0xff] }
 0x21e   :  { %v7106_v18 = vpack.c.bf16 %v2585_v57, %v2585_v57  ;;  %v2556_v20 = vpop.f32.mrf.mxu1  ;;  %v2825_v23 = vsel %vm2807_vm6, %v2787_v25, %v2816_v26  ;;  %v3576_v57 = vld [vmem:[%s11094_s3 + $0x28] sm:$0xff] }
 0x21f   :  { %v7113_v53 = vpack.c.bf16 %v2825_v23, %v2825_v23  ;;  %v2790_v49 = vpop.f32.mrf.mxu0  ;;  %v3578_v23 = vld [vmem:[%s11094_s3 + $0x38] sm:$0xff] }
 0x220   :  { %2630 = vrot.lane.b32.xlu1 %v7106_v18, %s7902_s18  ;;  %v7549_v60 = vpop.f32.mrf.mxu1  ;;  %vm2808_vm7 = vcmp.gt.f32.partialorder %v2790_v49, 0.0  ;;  %v2817_v48 = vmul.f32 0.01, %v2790_v49  ;;  %3582 = vperm.xlu0 %7634, %v3571_v54   ;;  %v3575_v18 = vld [vmem:[%s11094_s3 + $0x20] sm:$0xff] }
 0x221   :  { %2871 = vst.msk [vmem:[#allocation2 + $0x88] sm:$0xf] %vm999_vm3, %v7113_v53  ;;  %v7573_v19 = vpop.f32.mrf.mxu0  ;;  %v7747_v53 = vld [vmem:[%s11096_s5 + $0x118] sm:$0xff]  }
 0x222   :  { %v1683_v58 = vpop.permute.xlu1 %1682  ;;  %v2826_v51 = vsel %vm2808_vm7, %v2790_v49, %v2817_v48  ;;  %v3577_v49 = vld [vmem:[%s11094_s3 + $0x30] sm:$0xff]  ;;  %v3579_v19 = vld [vmem:[%s11094_s3 + $0x40] sm:$0xff] }
 0x223   :  { %1709 = vst.msk [vmem:[#allocation2 + $0x4] sm:$0xf] %vm1242_vm5, %v1683_v58  ;;  %v7114_v24 = vpack.c.bf16 %v2826_v51, %v2826_v51  ;;  %v2795_v21 = vpop.f32.mrf.mxu0  ;;  %v7733_v58 = vld [vmem:[#allocation2] ss:$20 sps:$4 sm:$0xff]  }
 0x224   :  { %3587 = vperm.xlu1 %7635, %v3572_v16   ;;  %vm2809_vm8 = vcmp.gt.f32.partialorder %v2795_v21, 0.0  ;;  %v2818_v56 = vmul.f32 0.01, %v2795_v21  ;;  %3597 = vperm.xlu0 %7634, %v3574_v52  }
 0x225   :  { %2872 = vst.msk [vmem:[#allocation2 + $0x9c] sm:$0xf] %vm999_vm3, %v7114_v24  ;;  %v7576_v17 = vpop.f32.mrf.mxu0  ;;  %v7752_v24 = vld [vmem:[%s11096_s5 + $0x110] sm:$0xff]  }
 0x226   :  { %v1685_v22 = vpop.permute.xlu1 %1684  ;;  %v2827_v61 = vsel %vm2809_vm8, %v2795_v21, %v2818_v56  ;;  %v7757_v21 = vld [vmem:[%s11096_s5 + $0x108] sm:$0xff]  }
 0x227   :  { %1710 = vst.msk [vmem:[#allocation2 + $0x18] sm:$0xf] %vm1242_vm5, %v1685_v22  ;;  %v2798_v25 = vpop.f32.mrf.mxu0  ;;  %v7115_v27 = vpack.c.bf16 %v2827_v61, %v2827_v61 }
 0x228   :  { %3592 = vperm.xlu1 %7635, %v3573_v59   ;;  %3607 = vperm.xlu0 %7634, %v3576_v57  }
 0x229   :  { %v7577_v60 = vpop.f32.mrf.mxu0  ;;  %2873 = vst.msk [vmem:[#allocation2 + $0xb0] sm:$0xf] %vm999_vm3, %v7115_v27 }
 0x22a   :  { %v1222_v20 = vpop.permute.xlu1 %1221  ;;  %v1687_v26 = vpop.permute.xlu0 %1686 }
 0x22b   :  { %1246 = vst.msk [vmem:[#allocation2 + $0x3c] sm:$0xf] %vm1242_vm5, %v1222_v20  ;;  %1711 = vst.msk [vmem:[#allocation2 + $0x2c] sm:$0xf] %vm1242_vm5, %v1687_v26  ;;  %v7760_v20 = vld [vmem:[%s11096_s5 + $0x100] sm:$0xff]  }
 0x22c   :  { %3602 = vperm.xlu1 %7635, %v3575_v18   ;;  %3617 = vperm.xlu0 %7634, %v3578_v23  }
 0x22e   :  { %v1224_v54 = vpop.permute.xlu0 %1223  ;;  %v1689_v16 = vpop.permute.xlu1 %1688  ;;  %v7735_v48 = vld [vmem:[#allocation2 + $0x4] ss:$20 sps:$4 sm:$0xff]  }
 0x22f   :  { %1247 = vst.msk [vmem:[#allocation2 + $0x50] sm:$0xf] %vm1242_vm5, %v1224_v54  ;;  %1712 = vst.msk [vmem:[#allocation2 + $0x40] sm:$0xf] %vm1242_vm5, %v1689_v16  ;;  %3360 = vmatprep.mubr.bf16.mxu1 %v7735_v48 }
 0x230   :  { %3612 = vperm.xlu1 %7635, %v3577_v49   ;;  %3361 = vmatmul.mubr.bf16.vlgmr.msra.gmra.mxu1 %v7733_v58 }
 0x231   :  { %7579 = vmatpush3.bf16.msra.mxu1 %v7747_v53 }
 0x232   :  { %v1226_v51 = vpop.permute.xlu1 %1225  ;;  %v1691_v52 = vpop.permute.xlu0 %1690  ;;  %7580 = vmatprep.subr.bf16.mxu1 %v11674_v50  ;;  %v2880_v56 = vld [vmem:[#allocation2 + $0x28] sm:$0xff] }
 0x233   :  { %1248 = vst.msk [vmem:[#allocation2 + $0x64] sm:$0xf] %vm1242_vm5, %v1226_v51  ;;  %1713 = vst.msk [vmem:[#allocation2 + $0x54] sm:$0xf] %vm1242_vm5, %v1691_v52 }
 0x234   :  { %3622 = vperm.xlu1 %7635, %v3579_v19  }
 0x235   :  { %7581 = vmatpush3.bf16.msra.mxu1 %v7752_v24 }
 0x236   :  { %v1228_v59 = vpop.permute.xlu0 %1227  ;;  %v1693_v22 = vpop.permute.xlu1 %1692  ;;  %v2883_v17 = vld [vmem:[#allocation2 + $0x3c] sm:$0xff]  ;;  %7582 = vmatprep.subr.bf16.mxu1 %v11674_v50 }
 0x237   :  { %v7736_v57 = vld [vmem:[#allocation2 + $0x2c] ss:$20 sps:$4 sm:$0xff]   ;;  %1249 = vst.msk [vmem:[#allocation2 + $0x78] sm:$0xf] %vm1242_vm5, %v1228_v59  ;;  %1714 = vst.msk [vmem:[#allocation2 + $0x68] sm:$0xf] %vm1242_vm5, %v1693_v22  ;;  %v6632_v61 = vcombine.low %v2880_v56, %v2883_v17 }
 0x238   :  { %3368 = vmatprep.mubr.bf16.mxu1 %v7736_v57  ;;  %v7762_v22 = vld [vmem:[#allocation2 + $0x10] ss:$20 sps:$4 sm:$0xff]   ;;  %v7767_v56 = vld [vmem:[#allocation2 + $0x38] ss:$20 sps:$4 sm:$0xff]   ;;  %v7770_v17 = vld [vmem:[#allocation2 + $0x60] ss:$20 sps:$4 sm:$0xff]  }
 0x239   :  { %3369 = vmatmul.mubr.bf16.gmra.mxu1 %v6632_v61  ;;  %v7773_v57 = vld [vmem:[#allocation2 + $0x88] ss:$20 sps:$4 sm:$0xff]  }
 0x23a   :  { %v1230_v25 = vpop.permute.xlu1 %1229  ;;  %v1695_v18 = vpop.permute.xlu0 %1694  ;;  %7583 = vmatpush3.bf16.msra.mxu1 %v7757_v21  ;;  %v2886_v60 = vld [vmem:[#allocation2 + $0x50] sm:$0xff] }
 0x23b   :  { %1250 = vst.msk [vmem:[#allocation2 + $0x8c] sm:$0xf] %vm1242_vm5, %v1230_v25  ;;  %1715 = vst.msk [vmem:[#allocation2 + $0x7c] sm:$0xf] %vm1242_vm5, %v1695_v18  ;;  %7584 = vmatprep.subr.bf16.mxu1 %v11674_v50  ;;  %v7778_v25 = vld [vmem:[#allocation2 + $0xb0] ss:$0 sps:$4 sm:$0xff]  }
 0x23e   :  { %v1232_v26 = vpop.permute.xlu0 %1231  ;;  %v1697_v27 = vpop.permute.xlu1 %1696  ;;  %v2889_v23 = vld [vmem:[#allocation2 + $0x64] sm:$0xff]  ;;  %7585 = vmatpush3.bf16.msra.mxu1 %v7760_v20 }
 0x23f   :  { %v7738_v53 = vld [vmem:[#allocation2 + $0x54] ss:$20 sps:$4 sm:$0xff]   ;;  %1251 = vst.msk [vmem:[#allocation2 + $0xa0] sm:$0xf] %vm1242_vm5, %v1232_v26  ;;  %1716 = vst.msk [vmem:[#allocation2 + $0x90] sm:$0xf] %vm1242_vm5, %v1697_v27  ;;  %v6637_v49 = vcombine.low %v2886_v60, %v2889_v23 }
 0x240   :  { %3376 = vmatprep.mubr.bf16.mxu1 %v7738_v53 }
 0x241   :  { %3377 = vmatmul.mubr.bf16.gmra.mxu1 %v6637_v49 }
 0x242   :  { %v1699_v54 = vpop.permute.xlu1 %1698  ;;  %v2892_v16 = vld [vmem:[#allocation2 + $0x78] sm:$0xff] }
 0x243   :  { %1717 = vst.msk [vmem:[#allocation2 + $0xa4] sm:$0xf] %vm1242_vm5, %v1699_v54 }
 0x246   :  { %v2895_v58 = vld [vmem:[#allocation2 + $0x8c] sm:$0xff] }
 0x247   :  { %v7740_v48 = vld [vmem:[#allocation2 + $0x7c] ss:$20 sps:$4 sm:$0xff]   ;;  %v6642_v19 = vcombine.low %v2892_v16, %v2895_v58 }
 0x248   :  { %3384 = vmatprep.mubr.bf16.mxu1 %v7740_v48 }
 0x249   :  { %3385 = vmatmul.mubr.bf16.gmra.mxu1 %v6642_v19 }
 0x24a   :  { %v2149_v51 = vpop.permute.xlu0 %2148  ;;  %v2898_v52 = vld [vmem:[#allocation2 + $0xa0] sm:$0xff] }
 0x24b   :  { %2175 = vst.msk [vmem:[#allocation2 + $0x8] sm:$0xf] %vm1242_vm5, %v2149_v51  ;;  %v6648_v24 = vcombine.high %v2898_v52, %v2898_v52  ;;  %v6647_v59 = vcombine.low %v2898_v52, %v2898_v52 }
 0x24d   :  { %3392 = vmatprep.mubr.bf16.mxu1 %v6648_v24 }
 0x24e   :  { %v2151_v21 = vpop.permute.xlu1 %2150 }
 0x24f   :  { %2176 = vst.msk [vmem:[#allocation2 + $0x1c] sm:$0xf] %vm1242_vm5, %v2151_v21 }
 0x251   :  { %3393 = vmatmul.mubr.bf16.gmra.mxu1 %v6647_v59 }
 0x252   :  { %7586 = vmatprep.mubr.msk.bf16.mxu1 %vm7901_vm0, %v11674_v50 }
 0x256   :  { %v7764_v53 = vld [vmem:[#allocation2 + $0x8] ss:$20 sps:$4 sm:$0xff]  }
 0x259   :  { %7587 = vmatmul.mubr.msk.bf16.vlgmr.msra.gmra.mxu1 %vm847_vm1, %v7762_v22 }
 0x25a   :  { %7590 = vmatprep.mubr.msk.bf16.mxu1 %vm7901_vm0, %v11674_v50 }
 0x261   :  { %7591 = vmatmul.mubr.msk.bf16.gmra.mxu1 %vm847_vm1, %v7767_v56 }
 0x262   :  { %7594 = vmatprep.mubr.msk.bf16.mxu1 %vm7901_vm0, %v11674_v50 }
 0x269   :  { %7595 = vmatmul.mubr.msk.bf16.gmra.mxu1 %vm847_vm1, %v7770_v17 }
 0x26a   :  { %7598 = vmatprep.mubr.msk.bf16.mxu1 %vm7901_vm0, %v11674_v50 }
 0x271   :  { %7599 = vmatmul.mubr.msk.bf16.gmra.mxu1 %vm847_vm1, %v7773_v57 }
 0x272   :  { %v2615_v61 = vpop.permute.xlu0 %2614  ;;  %7602 = vmatprep.mubr.msk.bf16.mxu1 %vm7901_vm0, %v11674_v50 }
 0x273   :  { %2641 = vst.msk [vmem:[#allocation2 + $0xc] sm:$0xf] %vm1242_vm5, %v2615_v61 }
 0x276   :  { %v2153_v18 = vpop.permute.xlu0 %2152  ;;  %v2617_v20 = vpop.permute.xlu1 %2616 }
 0x277   :  { %2177 = vst.msk [vmem:[#allocation2 + $0x30] sm:$0xf] %vm1242_vm5, %v2153_v18  ;;  %2642 = vst.msk [vmem:[#allocation2 + $0x20] sm:$0xf] %vm1242_vm5, %v2617_v20 }
 0x279   :  { %7603 = vmatmul.mubr.msk.bf16.gmra.mxu1 %vm847_vm1, %v7778_v25 }
 0x27a   :  { %v2155_v26 = vpop.permute.xlu1 %2154  ;;  %v2619_v27 = vpop.permute.xlu0 %2618 }
 0x27b   :  { %2178 = vst.msk [vmem:[#allocation2 + $0x44] sm:$0xf] %vm1242_vm5, %v2155_v26  ;;  %2643 = vst.msk [vmem:[#allocation2 + $0x34] sm:$0xf] %vm1242_vm5, %v2619_v27 }
 0x27e   :  { %v2157_v60 = vpop.permute.xlu0 %2156  ;;  %v2621_v23 = vpop.permute.xlu1 %2620  ;;  %v7766_v49 = vld [vmem:[#allocation2 + $0xc] ss:$20 sps:$4 sm:$0xff]  }
 0x27f   :  { %2179 = vst.msk [vmem:[#allocation2 + $0x58] sm:$0xf] %vm1242_vm5, %v2157_v60  ;;  %2644 = vst.msk [vmem:[#allocation2 + $0x48] sm:$0xf] %vm1242_vm5, %v2621_v23  ;;  %3432 = vmatprep.mubr.bf16.mxu0 %v7766_v49 }
 0x280   :  { %3433 = vmatmul.mubr.bf16.vlgmr.msra.gmra.mxu0 %v7764_v53 }
 0x282   :  { %v2159_v54 = vpop.permute.xlu1 %2158  ;;  %v2623_v16 = vpop.permute.xlu0 %2622  ;;  %v2881_v19 = vld [vmem:[#allocation2 + $0x30] sm:$0xff] }
 0x283   :  { %2180 = vst.msk [vmem:[#allocation2 + $0x6c] sm:$0xf] %vm1242_vm5, %v2159_v54  ;;  %2645 = vst.msk [vmem:[#allocation2 + $0x5c] sm:$0xf] %vm1242_vm5, %v2623_v16 }
 0x286   :  { %v2161_v58 = vpop.permute.xlu0 %2160  ;;  %v2625_v48 = vpop.permute.xlu1 %2624  ;;  %v2884_v51 = vld [vmem:[#allocation2 + $0x44] sm:$0xff] }
 0x287   :  { %v7768_v52 = vld [vmem:[#allocation2 + $0x34] ss:$20 sps:$4 sm:$0xff]   ;;  %2181 = vst.msk [vmem:[#allocation2 + $0x80] sm:$0xf] %vm1242_vm5, %v2161_v58  ;;  %2646 = vst.msk [vmem:[#allocation2 + $0x70] sm:$0xf] %vm1242_vm5, %v2625_v48  ;;  %v6634_v24 = vcombine.low %v2881_v19, %v2884_v51 }
 0x288   :  { %3440 = vmatprep.mubr.bf16.mxu0 %v7768_v52 }
 0x289   :  { %3441 = vmatmul.mubr.bf16.gmra.mxu0 %v6634_v24 }
 0x28a   :  { %v2163_v21 = vpop.permute.xlu1 %2162  ;;  %v2627_v59 = vpop.permute.xlu0 %2626  ;;  %v2887_v17 = vld [vmem:[#allocation2 + $0x58] sm:$0xff] }
 0x28b   :  { %2182 = vst.msk [vmem:[#allocation2 + $0x94] sm:$0xf] %vm1242_vm5, %v2163_v21  ;;  %2647 = vst.msk [vmem:[#allocation2 + $0x84] sm:$0xf] %vm1242_vm5, %v2627_v59 }
 0x28e   :  { %v2165_v22 = vpop.permute.xlu0 %2164  ;;  %v2629_v56 = vpop.permute.xlu1 %2628  ;;  %v2890_v57 = vld [vmem:[#allocation2 + $0x6c] sm:$0xff] }
 0x28f   :  { %v7771_v61 = vld [vmem:[#allocation2 + $0x5c] ss:$20 sps:$4 sm:$0xff]   ;;  %2183 = vst.msk [vmem:[#allocation2 + $0xa8] sm:$0xf] %vm1242_vm5, %v2165_v22  ;;  %2648 = vst.msk [vmem:[#allocation2 + $0x98] sm:$0xf] %vm1242_vm5, %v2629_v56  ;;  %v6639_v25 = vcombine.low %v2887_v17, %v2890_v57 }
 0x290   :  { %3448 = vmatprep.mubr.bf16.mxu0 %v7771_v61 }
 0x291   :  { %3449 = vmatmul.mubr.bf16.gmra.mxu0 %v6639_v25 }
 0x292   :  { %v2631_v18 = vpop.permute.xlu1 %2630  ;;  %v7776_v26 = vld [vmem:[#allocation2 + $0x80] ss:$20 sps:$4 sm:$0xff]  }
 0x293   :  { %2649 = vst.msk [vmem:[#allocation2 + $0xac] sm:$0xf] %vm1242_vm5, %v2631_v18 }
 0x296   :  { %v7774_v20 = vld [vmem:[#allocation2 + $0x84] ss:$20 sps:$4 sm:$0xff]  }
 0x297   :  { %3456 = vmatprep.mubr.bf16.mxu0 %v7774_v20 }
 0x299   :  { %3457 = vmatmul.mubr.bf16.gmra.mxu0 %v7776_v26 }
 0x29a   :  { %v2899_v27 = vld [vmem:[#allocation2 + $0xa8] sm:$0xff] }
 0x29b   :  { %v6650_v60 = vcombine.high %v2899_v27, %v2899_v27  ;;  %v6649_v23 = vcombine.low %v2899_v27, %v2899_v27 }
 0x29d   :  { %3464 = vmatprep.mubr.bf16.mxu0 %v6650_v60 }
 0x2a1   :  { %3465 = vmatmul.mubr.bf16.gmra.mxu0 %v6649_v23 }
 0x2f0   :  { %v7236_v53 = vpop.f32.mrf.mxu1 }
 0x2f2   :  { %v7237_v49 = vpop.f32.mrf.mxu1 }
 0x2f3   :  { %v7238_v54 = vadd.f32 %v7237_v49, %v7236_v53 }
 0x2f4   :  { %v7239_v16 = vpop.f32.mrf.mxu1 }
 0x2f6   :  { %v7240_v58 = vpop.f32.mrf.mxu1 }
 0x2f7   :  { %v7241_v48 = vadd.f32 %v7240_v58, %v7239_v16 }
 0x2f9   :  { %v7242_v19 = vpop.f32.mrf.mxu1 }
 0x2fb   :  { %v7243_v51 = vpop.f32.mrf.mxu1 }
 0x2fc   :  { %v7244_v52 = vadd.f32 %v7243_v51, %v7242_v19 }
 0x2fd   :  { %v7245_v24 = vpop.f32.mrf.mxu1 }
 0x2ff   :  { %v7246_v21 = vpop.f32.mrf.mxu1 }
 0x300   :  { %v10274_v59 = vadd.f32 %v7246_v21, %v7245_v24 }
 0x301   :  { %v7248_v22 = vpop.f32.mrf.mxu1 }
 0x303   :  { %v7249_v56 = vpop.f32.mrf.mxu1 }
 0x304   :  { %v10276_v17 = vadd.f32 %v7249_v56, %v7248_v22 }
 0x305   :  { %v7251_v57 = vpop.f32.mrf.mxu1 }
 0x307   :  { %v7252_v61 = vpop.f32.mrf.mxu1 }
 0x308   :  { %v10278_v25 = vadd.f32 %v7252_v61, %v7251_v57 }
 0x309   :  { %v7254_v18 = vpop.f32.mrf.mxu1 }
 0x30b   :  { %v7255_v20 = vpop.f32.mrf.mxu1 }
 0x30c   :  { %v10280_v26 = vadd.f32 %v7255_v20, %v7254_v18 }
 0x30d   :  { %v7257_v27 = vpop.f32.mrf.mxu1 }
 0x30f   :  { %v7258_v60 = vpop.f32.mrf.mxu1 }
 0x310   :  { %v10282_v23 = vadd.f32 %v7258_v60, %v7257_v27 }
 0x311   :  { %v7260_v53 = vpop.f32.mrf.mxu1 }
 0x313   :  { %v7261_v49 = vpop.f32.mrf.mxu1 }
 0x314   :  { %v10284_v16 = vadd.f32 %v7261_v49, %v7260_v53 }
 0x315   :  { %v7263_v58 = vpop.f32.mrf.mxu1 }
 0x317   :  { %v7264_v19 = vpop.f32.mrf.mxu1 }
 0x319   :  { %v3506_v51 = vpop.f32.mrf.mxu1 }
 0x31b   :  { %v7588_v24 = vpop.f32.mrf.mxu1 }
 0x31d   :  { %v3509_v21 = vpop.f32.mrf.mxu1 }
 0x31f   :  { %v7589_v22 = vpop.f32.mrf.mxu1 }
 0x321   :  { %v3514_v56 = vpop.f32.mrf.mxu1 }
 0x323   :  { %v7592_v57 = vpop.f32.mrf.mxu1 }
 0x325   :  { %v3517_v61 = vpop.f32.mrf.mxu1 }
 0x327   :  { %v7593_v55 = vpop.f32.mrf.mxu1 }
 0x328   :  { %v10299_v55 = vld [vmem:[%s11097_s6] ss:$0 sm:$0xff] }
 0x329   :  { %v10286_v18 = vpop.f32.mrf.mxu1  ;;  %v3371_v33 = vadd.f32 %v7244_v52, %v10299_v55 }
 0x32b   :  { %v7596_v20 = vpop.f32.mrf.mxu1 }
 0x32d   :  { %v10288_v50 = vpop.f32.mrf.mxu1 }
 0x32f   :  { %v7597_v27 = vpop.f32.mrf.mxu1 }
 0x330   :  { %v3363_v27 = vadd.f32 %v7238_v54, %v10299_v55  ;;  %v3583_v54 = vpop.permute.xlu0 %3582 }
 0x331   :  { %v10290_v60 = vpop.f32.mrf.mxu1 }
 0x333   :  { %v7600_v53 = vpop.f32.mrf.mxu1 }
 0x335   :  { %v10292_v49 = vpop.f32.mrf.mxu1 }
 0x337   :  { %v7601_v58 = vpop.f32.mrf.mxu1 }
 0x338   :  { %v3366_v58 = vadd.f32 %v7241_v48, %v10299_v55  ;;  %v3374_v48 = vadd.f32 %v10274_v59, %v10299_v55 }
 0x339   :  { %v10294_v19 = vpop.f32.mrf.mxu1 }
 0x33b   :  { %v7604_v24 = vpop.f32.mrf.mxu1 }
 0x33d   :  { %v3541_v22 = vpop.f32.mrf.mxu1 }
 0x33f   :  { %v7605_v28 = vpop.f32.mrf.mxu1 }
 0x340   :  { %v7282_v57 = vpop.f32.mrf.mxu0 }
 0x342   :  { %v7283_v20 = vpop.f32.mrf.mxu0 }
 0x343   :  { %v7284_v29 = vadd.f32 %v7283_v20, %v7282_v57 }
 0x344   :  { %v7285_v62 = vpop.f32.mrf.mxu0 }
 0x345   :  { %v3435_v53 = vadd.f32 %v7284_v29, %v3363_v27 }
 0x346   :  { %v7286_v63 = vpop.f32.mrf.mxu0 }
 0x347   :  { %v3507_v30 = vadd.f32 %v3506_v51, %v3435_v53  ;;  %v7287_v31 = vadd.f32 %v7286_v63, %v7285_v62  ;;  %v3588_v63 = vpop.permute.xlu1 %3587 }
 0x349   :  { %v7288_v24 = vpop.f32.mrf.mxu0  ;;  %v3438_v22 = vadd.f32 %v7287_v31, %v3366_v58  ;;  %v3553_v28 = vmul.f32 0.01, %v3507_v30  ;;  %vm3544_vm3 = vcmp.gt.f32.partialorder %v3507_v30, 0.0 }
 0x34b   :  { %v7289_v32 = vpop.f32.mrf.mxu0  ;;  %v3510_v0 = vadd.f32 %v3509_v21, %v3438_v22  ;;  %v3562_v57 = vsel %vm3544_vm3, %v3507_v30, %v3553_v28  ;;  %v3379_v30 = vadd.f32 %v10276_v17, %v10299_v55  ;;  %v3382_v28 = vadd.f32 %v10278_v25, %v10299_v55 }
 0x34c   :  { %v7290_v1 = vadd.f32 %v7289_v32, %v7288_v24  ;;  %v3625_v27 = vmul.f32 %v3583_v54, %v3562_v57  ;;  %v3593_v54 = vpop.permute.xlu1 %3592 }
 0x34d   :  { %v7291_v34 = vpop.f32.mrf.mxu0  ;;  %vm3545_vm5 = vcmp.gt.f32.partialorder %v3510_v0, 0.0  ;;  %v3554_v29 = vmul.f32 0.01, %v3510_v0 }
 0x34e   :  { %v3443_v35 = vadd.f32 %v7290_v1, %v3371_v33 }
 0x34f   :  { %v7292_v20 = vpop.f32.mrf.mxu0  ;;  %v3563_v31 = vsel %vm3545_vm5, %v3510_v0, %v3554_v29 }
 0x350   :  { %v3515_v62 = vadd.f32 %v3514_v56, %v3443_v35  ;;  %v7293_v51 = vadd.f32 %v7292_v20, %v7291_v34  ;;  %v3626_v53 = vmul.f32 %v3588_v63, %v3563_v31  ;;  %v3598_v56 = vpop.permute.xlu0 %3597 }
 0x351   :  { %v7294_v58 = vpop.f32.mrf.mxu0 }
 0x352   :  { %v3446_v52 = vadd.f32 %v7293_v51, %v3374_v48  ;;  %v3555_v21 = vmul.f32 0.01, %v3515_v62  ;;  %v7119_v32 = vpack.c.bf16 %v3626_v53, %v3625_v27  ;;  %vm3546_vm9 = vcmp.gt.f32.partialorder %v3515_v62, 0.0 }
 0x353   :  { %v7295_v1 = vpop.f32.mrf.mxu0  ;;  %v3387_v27 = vadd.f32 %v10280_v26, %v10299_v55 }
 0x354   :  { %v3518_v33 = vadd.f32 %v3517_v61, %v3446_v52  ;;  %v7296_v24 = vadd.f32 %v7295_v1, %v7294_v58  ;;  %7120 = vst [vmem:[#allocation3] sm:$0xff] %v7119_v32   ;;  %v3564_v59 = vsel %vm3546_vm9, %v3515_v62, %v3555_v21  ;;  %v3390_v1 = vadd.f32 %v10282_v23, %v10299_v55 }
 0x355   :  { %v7297_v22 = vpop.f32.mrf.mxu0  ;;  %v3627_v48 = vmul.f32 %v3593_v54, %v3564_v59  ;;  %v3395_v54 = vadd.f32 %v10284_v16, %v10299_v55 }
 0x356   :  { %v3451_v35 = vadd.f32 %v7296_v24, %v3379_v30  ;;  %vm3547_vm10 = vcmp.gt.f32.partialorder %v3518_v33, 0.0  ;;  %v3556_v0 = vmul.f32 0.01, %v3518_v33  ;;  %v3603_v30 = vpop.permute.xlu1 %3602  ;;  %v3608_v24 = vpop.permute.xlu0 %3607 }
 0x357   :  { %v7298_v34 = vpop.f32.mrf.mxu0 }
 0x358   :  { %v3523_v57 = vadd.f32 %v10286_v18, %v3451_v35  ;;  %v7299_v29 = vadd.f32 %v7298_v34, %v7297_v22  ;;  %v3565_v20 = vsel %vm3547_vm10, %v3518_v33, %v3556_v0 }
 0x359   :  { %v3628_v17 = vmul.f32 %v3598_v56, %v3565_v20  ;;  %v7300_v61 = vpop.f32.mrf.mxu0 }
 0x35a   :  { %v3557_v63 = vmul.f32 0.01, %v3523_v57  ;;  %v3454_v31 = vadd.f32 %v7299_v29, %v3382_v28  ;;  %vm3548_vm11 = vcmp.gt.f32.partialorder %v3523_v57, 0.0 }
 0x35b   :  { %v7124_v62 = vpack.c.bf16 %v3628_v17, %v3627_v48  ;;  %v7301_v51 = vpop.f32.mrf.mxu0 }
 0x35c   :  { %v3526_v53 = vadd.f32 %v10288_v50, %v3454_v31  ;;  %v7302_v58 = vadd.f32 %v7301_v51, %v7300_v61  ;;  %v3566_v52 = vsel %vm3548_vm11, %v3523_v57, %v3557_v63  ;;  %v3618_v63 = vpop.permute.xlu0 %3617 }
 0x35d   :  { %7136 = vst [vmem:[#allocation3 + $0x8] sm:$0xff] %v7124_v62   ;;  %v7303_v25 = vpop.f32.mrf.mxu0  ;;  %v3629_v26 = vmul.f32 %v3603_v30, %v3566_v52  ;;  %v6717_v52 = vcombine.high %v8071_v14, %v8076_v15 }
 0x35e   :  { %v3459_v18 = vadd.f32 %v7302_v58, %v3387_v27  ;;  %vm3549_vm12 = vcmp.gt.f32.partialorder %v3526_v53, 0.0  ;;  %v3558_v21 = vmul.f32 0.01, %v3526_v53 }
 0x35f   :  { %v7304_v32 = vpop.f32.mrf.mxu0 }
 0x360   :  { %v3531_v33 = vadd.f32 %v10290_v60, %v3459_v18  ;;  %v3567_v22 = vsel %vm3549_vm12, %v3526_v53, %v3558_v21  ;;  %v7305_v59 = vadd.f32 %v7304_v32, %v7303_v25  ;;  %v3613_v60 = vpop.permute.xlu1 %3612  ;;  %v6716_v18 = vcombine.low %v8071_v14, %v8076_v15 }
 0x361   :  { %v3630_v35 = vmul.f32 %v3608_v24, %v3567_v22  ;;  %v7306_v50 = vpop.f32.mrf.mxu0  ;;  %v6748_v21 = vcombine.low %v8231_v46, %v8236_v47 }
 0x362   :  { %v3559_v56 = vmul.f32 0.01, %v3531_v33  ;;  %v3462_v0 = vadd.f32 %v7305_v59, %v3390_v1  ;;  %vm3550_vm13 = vcmp.gt.f32.partialorder %v3531_v33, 0.0 }
 0x363   :  { %v7129_v34 = vpack.c.bf16 %v3630_v35, %v3629_v26  ;;  %v7307_v28 = vpop.f32.mrf.mxu0 }
 0x364   :  { %v3534_v57 = vadd.f32 %v10292_v49, %v3462_v0  ;;  %v7308_v23 = vadd.f32 %v7307_v28, %v7306_v50  ;;  %v3568_v48 = vsel %vm3550_vm13, %v3531_v33, %v3559_v56  ;;  %v3623_v55 = vpop.permute.xlu1 %3622 }
 0x365   :  { %7137 = vst [vmem:[#allocation3 + $0x10] sm:$0xff] %v7129_v34   ;;  %v7309_v29 = vpop.f32.mrf.mxu0  ;;  %v3631_v51 = vmul.f32 %v3613_v60, %v3568_v48 }
 0x366   :  { %vm3551_vm14 = vcmp.gt.f32.partialorder %v3534_v57, 0.0  ;;  %v3560_v20 = vmul.f32 0.01, %v3534_v57  ;;  %v3467_v17 = vadd.f32 %v7308_v23, %v3395_v54 }
 0x367   :  { %v7310_v61 = vpop.f32.mrf.mxu0 }
 0x368   :  { %v3569_v31 = vsel %vm3551_vm14, %v3534_v57, %v3560_v20  ;;  %v3539_v62 = vadd.f32 %v10294_v19, %v3467_v17  ;;  %v6749_v19 = vcombine.high %v8231_v46, %v8236_v47 }
 0x369   :  { %v3632_v27 = vmul.f32 %v3618_v63, %v3569_v31 }
 0x36a   :  { %vm3552_vm15 = vcmp.gt.f32.partialorder %v3539_v62, 0.0  ;;  %v3561_v53 = vmul.f32 0.01, %v3539_v62 }
 0x36b   :  { %v7134_v16 = vpack.c.bf16 %v3632_v27, %v3631_v51 }
 0x36c   :  { %v3570_v49 = vsel %vm3552_vm15, %v3539_v62, %v3561_v53 }
 0x36d   :  { %7138 = vst [vmem:[#allocation3 + $0x18] sm:$0xff] %v7134_v16   ;;  %v3633_v58 = vmul.f32 %v3623_v55, %v3570_v49 }
 0x36f   :  { %v3650_v25 = vpack.c.bf16 %v3633_v58, %v3633_v58 }
 0x371   :  { %3651 = vst [vmem:[#allocation3 + $0x20] sm:$0xf] %v3650_v25 }
 0x372   :  { %7890 = dma.done.wait [#allocation8], 18432 }
 0x373   :  { %7891 = vsyncadd [#allocation8], 4294948864  ;;  %v6715_v32 = vcombine.high %v8061_v12, %v8066_v13  ;;  %v6747_v1 = vcombine.high %v8221_v44, %v8226_v45  ;;  %4569 = vmatprep.subr.bf16.mxu0 %v6717_v52  ;;  %4610 = vmatprep.subr.bf16.mxu1 %v6749_v19  ;;  %v6714_v14 = vcombine.low %v8061_v12, %v8066_v13  ;;  %v11675_v22 = vld [vmem:[#allocation43_spill] sm:$0xff]  ;;  %v11676_v59 = vld [vmem:[#allocation42_spill] sm:$0xff] }
 0x374   :  { %4570 = vmatpush1.bf16.msra.mxu0 %v6716_v18  ;;  %4611 = vmatpush1.bf16.msra.mxu1 %v6748_v21  ;;  %v6746_v15 = vcombine.low %v8221_v44, %v8226_v45  ;;  %v6713_v46 = vcombine.high %v8051_v10, %v8056_v11  ;;  %v6745_v47 = vcombine.high %v8211_v42, %v8216_v43  ;;  %v11679_v50 = vld [vmem:[#allocation41_spill] sm:$0xff]  ;;  %v11680_v56 = vld [vmem:[#allocation40_spill] sm:$0xff]  ;;  %v11683_v57 = vld [vmem:[#allocation59_spill] sm:$0xff] }
 0x375   :  { %4571 = vmatprep.subr.bf16.mxu0 %v6715_v32  ;;  %4612 = vmatprep.subr.bf16.mxu1 %v6747_v1  ;;  %v6712_v30 = vcombine.low %v8051_v10, %v8056_v11  ;;  %v6744_v33 = vcombine.low %v8211_v42, %v8216_v43  ;;  %v6711_v12 = vcombine.high %v8041_v8, %v8046_v9  ;;  %v11684_v23 = vld [vmem:[#allocation58_spill] sm:$0xff]  ;;  %v11685_v48 = vld [vmem:[#allocation37_spill] sm:$0xff]  ;;  %v11686_v17 = vld [vmem:[#allocation36_spill] sm:$0xff] }
 0x376   :  { %v6743_v13 = vcombine.high %v8201_v40, %v8206_v41  ;;  %v6710_v44 = vcombine.low %v8041_v8, %v8046_v9  ;;  %v6742_v45 = vcombine.low %v8201_v40, %v8206_v41  ;;  %v6709_v10 = vcombine.high %v8031_v6, %v8036_v7  ;;  %v10361_v8 = vld [vmem:[#allocation3] sm:$0xff]  ;;  %v10367_v41 = vld [vmem:[#allocation3 + $0x8] sm:$0xff]  ;;  %v11690_v16 = vld [vmem:[#allocation34_spill] sm:$0xff] }
 0x377   :  { %v6741_v11 = vcombine.high %v8191_v38, %v8196_v39  ;;  %v6708_v42 = vcombine.low %v8031_v6, %v8036_v7  ;;  %v6740_v43 = vcombine.low %v8191_v38, %v8196_v39  ;;  %v6707_v9 = vcombine.high %v8021_v4, %v8026_v5  ;;  %v11687_v63 = vld [vmem:[#allocation57_spill] sm:$0xff]  ;;  %v11688_v31 = vld [vmem:[#allocation56_spill] sm:$0xff]  ;;  %v11689_v53 = vld [vmem:[#allocation35_spill] sm:$0xff] }
 0x378   :  { %4572 = vmatpush1.bf16.msra.mxu0 %v6714_v14  ;;  %4613 = vmatpush1.bf16.msra.mxu1 %v6746_v15  ;;  %v6739_v40 = vcombine.high %v8181_v36, %v8186_v37  ;;  %v6694_v24 = vcombine.high %v10361_v8, %v10361_v8  ;;  %v6706_v6 = vcombine.low %v8021_v4, %v8026_v5  ;;  %v11691_v49 = vld [vmem:[#allocation55_spill] sm:$0xff]  ;;  %v11692_v58 = vld [vmem:[#allocation54_spill] sm:$0xff]  ;;  %v11693_v19 = vld [vmem:[#allocation33_spill] sm:$0xff] }
 0x379   :  { %4573 = vmatprep.subr.bf16.mxu0 %v6713_v46  ;;  %4614 = vmatprep.subr.bf16.mxu1 %v6745_v47  ;;  %v6738_v7 = vcombine.low %v8181_v36, %v8186_v37  ;;  %v6696_v38 = vcombine.high %v10367_v41, %v10367_v41  ;;  %v6705_v39 = vcombine.high %v8011_v2, %v8016_v3  ;;  %v11677_v36 = vld [vmem:[#allocation23_spill] sm:$0xff]  ;;  %v11678_v37 = vld [vmem:[#allocation22_spill] sm:$0xff]  ;;  %v11694_v21 = vld [vmem:[#allocation32_spill] sm:$0xff] }
 0x37a   :  { %v6737_v26 = vcombine.high %v11676_v59, %v11675_v22  ;;  %4601 = vmatprep.mubr.bf16.mxu0 %v6694_v24  ;;  %v6704_v4 = vcombine.low %v8011_v2, %v8016_v3  ;;  %v6736_v5 = vcombine.low %v11676_v59, %v11675_v22  ;;  %v6703_v35 = vcombine.high %v11678_v37, %v11677_v36  ;;  %v11681_v2 = vld [vmem:[#allocation39_spill] sm:$0xff]  ;;  %v11682_v3 = vld [vmem:[#allocation38_spill] sm:$0xff]  ;;  %v11695_v1 = vld [vmem:[#allocation53_spill] sm:$0xff] }
 0x37b   :  { %4642 = vmatprep.mubr.bf16.mxu1 %v6696_v38  ;;  %v6735_v0 = vcombine.high %v11680_v56, %v11679_v50  ;;  %v6702_v34 = vcombine.low %v11678_v37, %v11677_v36  ;;  %v6734_v28 = vcombine.low %v11680_v56, %v11679_v50  ;;  %v6733_v54 = vcombine.high %v11682_v3, %v11681_v2  ;;  %v11696_v14 = vld [vmem:[#allocation52_spill] sm:$0xff]  ;;  %v11706_v22 = vld [vmem:[#allocation26_spill] sm:$0xff] }
 0x37c   :  { %4574 = vmatpush1.bf16.msra.mxu0 %v6712_v30  ;;  %4615 = vmatpush1.bf16.msra.mxu1 %v6744_v33  ;;  %v6765_v29 = vcombine.high %v11684_v23, %v11683_v57  ;;  %v6732_v60 = vcombine.low %v11682_v3, %v11681_v2  ;;  %v6764_v20 = vcombine.low %v11684_v23, %v11683_v57  ;;  %v11697_v30 = vld [vmem:[#allocation31_spill] sm:$0xff]  ;;  %v11698_v33 = vld [vmem:[#allocation30_spill] sm:$0xff]  ;;  %v11704_v24 = vld [vmem:[#allocation48_spill] sm:$0xff] }
 0x37d   :  { %4575 = vmatprep.subr.bf16.mxu0 %v6711_v12  ;;  %4616 = vmatprep.subr.bf16.mxu1 %v6743_v13  ;;  %v6731_v61 = vcombine.high %v11686_v17, %v11685_v48  ;;  %v6763_v62 = vcombine.high %v11688_v31, %v11687_v63  ;;  %v6730_v51 = vcombine.low %v11686_v17, %v11685_v48  ;;  %v11699_v13 = vld [vmem:[#allocation51_spill] sm:$0xff]  ;;  %v11710_v50 = vld [vmem:[#allocation24_spill] sm:$0xff]  ;;  %v11714_v57 = vld [vmem:[#allocation74_spill] sm:$0xff] }
 0x37e   :  { %v6762_v27 = vcombine.low %v11688_v31, %v11687_v63  ;;  %v6729_v55 = vcombine.high %v11690_v16, %v11689_v53  ;;  %v6761_v25 = vcombine.high %v11692_v58, %v11691_v49  ;;  %v6728_v52 = vcombine.low %v11690_v16, %v11689_v53  ;;  %v10467_v63 = vld [vmem:[#allocation3 + $0x18] sm:$0xff]  ;;  %v11719_v53 = vld [vmem:[#allocation105_spill] sm:$0xff]  ;;  %v11720_v16 = vld [vmem:[#allocation104_spill] sm:$0xff] }
 0x37f   :  { %v6760_v18 = vcombine.low %v11692_v58, %v11691_v49  ;;  %v6727_v32 = vcombine.high %v11694_v21, %v11693_v19  ;;  %v6759_v15 = vcombine.high %v11696_v14, %v11695_v1  ;;  %v6726_v46 = vcombine.low %v11694_v21, %v11693_v19  ;;  %v11723_v21 = vld [vmem:[#allocation103_spill] sm:$0xff] }
 0x380   :  { %4576 = vmatpush1.bf16.msra.mxu0 %v6710_v44  ;;  %4617 = vmatpush1.bf16.msra.mxu1 %v6742_v45  ;;  %v6758_v47 = vcombine.low %v11696_v14, %v11695_v1  ;;  %v6725_v12 = vcombine.high %v11698_v33, %v11697_v30  ;;  %v11700_v44 = vld [vmem:[#allocation50_spill] sm:$0xff]  ;;  %v6693_v48 = vcombine.low %v10361_v8, %v10361_v8 }
 0x381   :  { %4577 = vmatprep.subr.bf16.mxu0 %v6709_v10  ;;  %4618 = vmatprep.subr.bf16.mxu1 %v6741_v11  ;;  %v6757_v45 = vcombine.high %v11700_v44, %v11699_v13  ;;  %v6724_v10 = vcombine.low %v11698_v33, %v11697_v30  ;;  %v6756_v11 = vcombine.low %v11700_v44, %v11699_v13  ;;  %v11727_v33 = vld [vmem:[#allocation101_spill] sm:$0xff] }
 0x382   :  { %v6695_v17 = vcombine.low %v10367_v41, %v10367_v41  ;;  %v6811_v41 = vcombine.high %v11720_v16, %v11719_v53  ;;  %v6700_v49 = vcombine.high %v10467_v63, %v10467_v63 }
 0x384   :  { %4578 = vmatpush1.bf16.msra.mxu0 %v6708_v42  ;;  %4619 = vmatpush1.bf16.msra.mxu1 %v6740_v43  ;;  %v11701_v42 = vld [vmem:[#allocation29_spill] sm:$0xff]  ;;  %v11702_v43 = vld [vmem:[#allocation28_spill] sm:$0xff] }
 0x385   :  { %4579 = vmatprep.subr.bf16.mxu0 %v6707_v9  ;;  %4620 = vmatprep.subr.bf16.mxu1 %v6739_v40  ;;  %v6723_v9 = vcombine.high %v11702_v43, %v11701_v42  ;;  %v11703_v40 = vld [vmem:[#allocation49_spill] sm:$0xff] }
 0x386   :  { %v6754_v38 = vcombine.low %v11704_v24, %v11703_v40 }
 0x388   :  { %4580 = vmatpush1.bf16.msra.mxu0 %v6706_v6  ;;  %4621 = vmatpush1.bf16.msra.mxu1 %v6738_v7  ;;  %v6755_v6 = vcombine.high %v11704_v24, %v11703_v40  ;;  %v6722_v7 = vcombine.low %v11702_v43, %v11701_v42  ;;  %v11731_v43 = vld [vmem:[#allocation99_spill] sm:$0xff] }
 0x389   :  { %4581 = vmatprep.subr.bf16.mxu0 %v6705_v39  ;;  %4622 = vmatprep.subr.bf16.mxu1 %v6737_v26  ;;  %v11705_v39 = vld [vmem:[#allocation27_spill] sm:$0xff] }
 0x38a   :  { %v6721_v59 = vcombine.high %v11706_v22, %v11705_v39  ;;  %v11707_v26 = vld [vmem:[#allocation47_spill] sm:$0xff]  ;;  %v6720_v36 = vcombine.low %v11706_v22, %v11705_v39  ;;  %v11735_v22 = vld [vmem:[#allocation97_spill] sm:$0xff] }
 0x38c   :  { %4582 = vmatpush1.bf16.msra.mxu0 %v6704_v4  ;;  %4623 = vmatpush1.bf16.msra.mxu1 %v6736_v5  ;;  %v11708_v4 = vld [vmem:[#allocation46_spill] sm:$0xff] }
 0x38d   :  { %4583 = vmatprep.subr.bf16.mxu0 %v6703_v35  ;;  %4624 = vmatprep.subr.bf16.mxu1 %v6735_v0  ;;  %v6753_v5 = vcombine.high %v11708_v4, %v11707_v26  ;;  %v6752_v37 = vcombine.low %v11708_v4, %v11707_v26  ;;  %v11709_v35 = vld [vmem:[#allocation25_spill] sm:$0xff] }
 0x38e   :  { %v6719_v56 = vcombine.high %v11710_v50, %v11709_v35  ;;  %v11711_v0 = vld [vmem:[#allocation45_spill] sm:$0xff]  ;;  %v6718_v2 = vcombine.low %v11710_v50, %v11709_v35  ;;  %v11739_v50 = vld [vmem:[#allocation95_spill] sm:$0xff] }
 0x390   :  { %4584 = vmatpush1.bf16.msra.mxu0 %v6702_v34  ;;  %4625 = vmatpush1.bf16.msra.mxu1 %v6734_v28  ;;  %v11712_v34 = vld [vmem:[#allocation44_spill] sm:$0xff] }
 0x391   :  { %4585 = vmatprep.subr.bf16.mxu0 %v6733_v54  ;;  %4626 = vmatprep.subr.bf16.mxu1 %v6765_v29  ;;  %v6751_v28 = vcombine.high %v11712_v34, %v11711_v0  ;;  %v6750_v3 = vcombine.low %v11712_v34, %v11711_v0  ;;  %v11713_v54 = vld [vmem:[#allocation75_spill] sm:$0xff] }
 0x392   :  { %v6781_v23 = vcombine.high %v11714_v57, %v11713_v54  ;;  %v11715_v29 = vld [vmem:[#allocation107_spill] sm:$0xff]  ;;  %v6780_v31 = vcombine.low %v11714_v57, %v11713_v54  ;;  %v11743_v57 = vld [vmem:[#allocation93_spill] sm:$0xff] }
 0x394   :  { %4586 = vmatpush2.bf16.msra.mxu0 %v6732_v60  ;;  %4627 = vmatpush2.bf16.msra.mxu1 %v6764_v20  ;;  %v11716_v60 = vld [vmem:[#allocation106_spill] sm:$0xff] }
 0x395   :  { %4587 = vmatprep.subr.bf16.mxu0 %v6731_v61  ;;  %4628 = vmatprep.subr.bf16.mxu1 %v6763_v62  ;;  %v6813_v20 = vcombine.high %v11716_v60, %v11715_v29  ;;  %v10465_v61 = vld [vmem:[#allocation3 + $0x10] sm:$0xff]  ;;  %v6812_v62 = vcombine.low %v11716_v60, %v11715_v29 }
 0x398   :  { %4588 = vmatpush2.bf16.msra.mxu0 %v6730_v51  ;;  %4629 = vmatpush2.bf16.msra.mxu1 %v6762_v27  ;;  %v11717_v51 = vld [vmem:[#allocation73_spill] sm:$0xff]  ;;  %v11718_v27 = vld [vmem:[#allocation72_spill] sm:$0xff] }
 0x399   :  { %4589 = vmatprep.subr.bf16.mxu0 %v6729_v55  ;;  %4630 = vmatprep.subr.bf16.mxu1 %v6761_v25  ;;  %v6779_v8 = vcombine.high %v11718_v27, %v11717_v51  ;;  %v6698_v55 = vcombine.high %v10465_v61, %v10465_v61  ;;  %v6778_v58 = vcombine.low %v11718_v27, %v11717_v51  ;;  %v11748_v51 = vld [vmem:[#allocation122_spill] sm:$0xff] }
 0x39a   :  { %v6810_v25 = vcombine.low %v11720_v16, %v11719_v53  ;;  %v11749_v16 = vld [vmem:[#allocation89_spill] sm:$0xff] }
 0x39c   :  { %4590 = vmatpush2.bf16.msra.mxu0 %v6728_v52  ;;  %4631 = vmatpush2.bf16.msra.mxu1 %v6760_v18  ;;  %v11721_v52 = vld [vmem:[#allocation71_spill] sm:$0xff]  ;;  %v11722_v18 = vld [vmem:[#allocation70_spill] sm:$0xff] }
 0x39d   :  { %4591 = vmatprep.subr.bf16.mxu0 %v6727_v32  ;;  %4632 = vmatprep.subr.bf16.mxu1 %v6759_v15  ;;  %v6777_v19 = vcombine.high %v11722_v18, %v11721_v52  ;;  %v11724_v32 = vld [vmem:[#allocation102_spill] sm:$0xff]  ;;  %v6776_v14 = vcombine.low %v11722_v18, %v11721_v52 }
 0x39e   :  { %v6809_v1 = vcombine.high %v11724_v32, %v11723_v21  ;;  %v6808_v15 = vcombine.low %v11724_v32, %v11723_v21  ;;  %v11754_v21 = vld [vmem:[#allocation86_spill] sm:$0xff] }
 0x3a0   :  { %4592 = vmatpush2.bf16.msra.mxu0 %v6726_v46  ;;  %4633 = vmatpush2.bf16.msra.mxu1 %v6758_v47  ;;  %v11725_v46 = vld [vmem:[#allocation69_spill] sm:$0xff]  ;;  %v11726_v47 = vld [vmem:[#allocation68_spill] sm:$0xff] }
 0x3a1   :  { %4593 = vmatprep.subr.bf16.mxu0 %v6725_v12  ;;  %4634 = vmatprep.subr.bf16.mxu1 %v6757_v45  ;;  %v6775_v30 = vcombine.high %v11726_v47, %v11725_v46  ;;  %v11728_v12 = vld [vmem:[#allocation100_spill] sm:$0xff]  ;;  %v6774_v44 = vcombine.low %v11726_v47, %v11725_v46 }
 0x3a2   :  { %v6807_v13 = vcombine.high %v11728_v12, %v11727_v33  ;;  %v6806_v45 = vcombine.low %v11728_v12, %v11727_v33  ;;  %v11758_v33 = vld [vmem:[#allocation84_spill] sm:$0xff] }
 0x3a4   :  { %4594 = vmatpush2.bf16.msra.mxu0 %v6724_v10  ;;  %4635 = vmatpush2.bf16.msra.mxu1 %v6756_v11  ;;  %v11729_v10 = vld [vmem:[#allocation67_spill] sm:$0xff]  ;;  %v11730_v11 = vld [vmem:[#allocation66_spill] sm:$0xff] }
 0x3a5   :  { %4595 = vmatprep.subr.bf16.mxu0 %v6723_v9  ;;  %4636 = vmatprep.subr.bf16.mxu1 %v6755_v6  ;;  %v6773_v42 = vcombine.high %v11730_v11, %v11729_v10  ;;  %v11732_v9 = vld [vmem:[#allocation98_spill] sm:$0xff]  ;;  %v6772_v24 = vcombine.low %v11730_v11, %v11729_v10 }
 0x3a6   :  { %v6805_v40 = vcombine.high %v11732_v9, %v11731_v43  ;;  %v6804_v6 = vcombine.low %v11732_v9, %v11731_v43  ;;  %v11762_v43 = vld [vmem:[#allocation82_spill] sm:$0xff] }
 0x3a8   :  { %4596 = vmatpush2.bf16.msra.mxu0 %v6722_v7  ;;  %4637 = vmatpush2.bf16.msra.mxu1 %v6754_v38  ;;  %v11733_v7 = vld [vmem:[#allocation65_spill] sm:$0xff]  ;;  %v11734_v38 = vld [vmem:[#allocation64_spill] sm:$0xff] }
 0x3a9   :  { %4597 = vmatprep.subr.bf16.mxu0 %v6721_v59  ;;  %4638 = vmatprep.subr.bf16.mxu1 %v6753_v5  ;;  %v6771_v39 = vcombine.high %v11734_v38, %v11733_v7  ;;  %v11736_v59 = vld [vmem:[#allocation96_spill] sm:$0xff]  ;;  %v6770_v4 = vcombine.low %v11734_v38, %v11733_v7 }
 0x3aa   :  { %v6803_v26 = vcombine.high %v11736_v59, %v11735_v22  ;;  %v6802_v5 = vcombine.low %v11736_v59, %v11735_v22  ;;  %v11766_v22 = vld [vmem:[#allocation80_spill] sm:$0xff] }
 0x3ac   :  { %4598 = vmatpush2.bf16.msra.mxu0 %v6720_v36  ;;  %4639 = vmatpush2.bf16.msra.mxu1 %v6752_v37  ;;  %v11737_v36 = vld [vmem:[#allocation63_spill] sm:$0xff]  ;;  %v11738_v37 = vld [vmem:[#allocation62_spill] sm:$0xff] }
 0x3ad   :  { %4599 = vmatprep.subr.bf16.mxu0 %v6719_v56  ;;  %4640 = vmatprep.subr.bf16.mxu1 %v6751_v28  ;;  %v6769_v35 = vcombine.high %v11738_v37, %v11737_v36  ;;  %v11740_v56 = vld [vmem:[#allocation94_spill] sm:$0xff]  ;;  %v6768_v34 = vcombine.low %v11738_v37, %v11737_v36 }
 0x3ae   :  { %v6801_v0 = vcombine.high %v11740_v56, %v11739_v50  ;;  %v6800_v28 = vcombine.low %v11740_v56, %v11739_v50  ;;  %v11770_v50 = vld [vmem:[#allocation78_spill] sm:$0xff] }
 0x3b0   :  { %4600 = vmatpush2.bf16.msra.mxu0 %v6718_v2  ;;  %4641 = vmatpush2.bf16.msra.mxu1 %v6750_v3  ;;  %v11741_v2 = vld [vmem:[#allocation61_spill] sm:$0xff]  ;;  %v11742_v3 = vld [vmem:[#allocation60_spill] sm:$0xff] }
 0x3b1   :  { %4651 = vmatprep.subr.bf16.mxu0 %v6781_v23  ;;  %4692 = vmatprep.subr.bf16.mxu1 %v6813_v20  ;;  %v6767_v54 = vcombine.high %v11742_v3, %v11741_v2  ;;  %v11744_v23 = vld [vmem:[#allocation92_spill] sm:$0xff]  ;;  %v6766_v60 = vcombine.low %v11742_v3, %v11741_v2 }
 0x3b2   :  { %v6799_v29 = vcombine.high %v11744_v23, %v11743_v57  ;;  %v6798_v20 = vcombine.low %v11744_v23, %v11743_v57  ;;  %v11774_v57 = vld [vmem:[#allocation76_spill] sm:$0xff] }
 0x3b3   :  { %4602 = vmatmul.mubr.bf16.vlgmr.msra.gmra.mxu0 %v6693_v48  ;;  %4643 = vmatmul.mubr.bf16.vlgmr.msra.gmra.mxu1 %v6695_v17  ;;  %v11745_v48 = vld [vmem:[#allocation91_spill] sm:$0xff]  ;;  %v11746_v17 = vld [vmem:[#allocation90_spill] sm:$0xff] }
 0x3b4   :  { %4652 = vmatpush1.bf16.msra.mxu0 %v6780_v31  ;;  %4693 = vmatpush1.bf16.msra.mxu1 %v6812_v62  ;;  %v6797_v31 = vcombine.high %v11746_v17, %v11745_v48  ;;  %v11747_v62 = vld [vmem:[#allocation123_spill] sm:$0xff] }
 0x3b5   :  { %4653 = vmatprep.subr.bf16.mxu0 %v6779_v8  ;;  %4694 = vmatprep.subr.bf16.mxu1 %v6811_v41  ;;  %v6829_v27 = vcombine.high %v11748_v51, %v11747_v62  ;;  %v6796_v8 = vcombine.low %v11746_v17, %v11745_v48  ;;  %v6828_v53 = vcombine.low %v11748_v51, %v11747_v62  ;;  %v11750_v41 = vld [vmem:[#allocation88_spill] sm:$0xff]  ;;  %v11778_v62 = vld [vmem:[#allocation138_spill] sm:$0xff] }
 0x3b6   :  { %4683 = vmatprep.mubr.bf16.mxu0 %v6698_v55  ;;  %4724 = vmatprep.mubr.bf16.mxu1 %v6700_v49  ;;  %v6795_v55 = vcombine.high %v11750_v41, %v11749_v16  ;;  %v11751_v49 = vld [vmem:[#allocation121_spill] sm:$0xff]  ;;  %v6794_v52 = vcombine.low %v11750_v41, %v11749_v16  ;;  %v11780_v41 = vld [vmem:[#allocation136_spill] sm:$0xff] }
 0x3b7   :  { %v11779_v16 = vld [vmem:[#allocation137_spill] sm:$0xff] }
 0x3b8   :  { %4654 = vmatpush1.bf16.msra.mxu0 %v6778_v58  ;;  %4695 = vmatpush1.bf16.msra.mxu1 %v6810_v25  ;;  %v11752_v58 = vld [vmem:[#allocation120_spill] sm:$0xff] }
 0x3b9   :  { %4655 = vmatprep.subr.bf16.mxu0 %v6777_v19  ;;  %4696 = vmatprep.subr.bf16.mxu1 %v6809_v1  ;;  %v6827_v25 = vcombine.high %v11752_v58, %v11751_v49  ;;  %v6826_v18 = vcombine.low %v11752_v58, %v11751_v49  ;;  %v11753_v19 = vld [vmem:[#allocation87_spill] sm:$0xff]  ;;  %v6842_v49 = vcombine.low %v11780_v41, %v11779_v16  ;;  %v11781_v58 = vmov 0  }
 0x3ba   :  { %v6793_v32 = vcombine.high %v11754_v21, %v11753_v19  ;;  %v11755_v1 = vld [vmem:[#allocation119_spill] sm:$0xff]  ;;  %v6792_v46 = vcombine.low %v11754_v21, %v11753_v19  ;;  %v11785_v19 = vld [vmem:[#allocation132_spill] sm:$0xff] }
 0x3bc   :  { %4656 = vmatpush1.bf16.msra.mxu0 %v6776_v14  ;;  %4697 = vmatpush1.bf16.msra.mxu1 %v6808_v15  ;;  %v11756_v14 = vld [vmem:[#allocation118_spill] sm:$0xff] }
 0x3bd   :  { %4657 = vmatprep.subr.bf16.mxu0 %v6775_v30  ;;  %4698 = vmatprep.subr.bf16.mxu1 %v6807_v13  ;;  %v6825_v15 = vcombine.high %v11756_v14, %v11755_v1  ;;  %v6824_v47 = vcombine.low %v11756_v14, %v11755_v1  ;;  %v11757_v30 = vld [vmem:[#allocation85_spill] sm:$0xff]  ;;  %v11786_v1 = vld [vmem:[#allocation131_spill] sm:$0xff]  ;;  %v11787_v14 = vld [vmem:[#allocation130_spill] sm:$0xff] }
 0x3be   :  { %v6791_v12 = vcombine.high %v11758_v33, %v11757_v30  ;;  %v11759_v13 = vld [vmem:[#allocation117_spill] sm:$0xff]  ;;  %v6790_v10 = vcombine.low %v11758_v33, %v11757_v30  ;;  %v11789_v30 = vld [vmem:[#allocation128_spill] sm:$0xff] }
 0x3c0   :  { %4658 = vmatpush1.bf16.msra.mxu0 %v6774_v44  ;;  %4699 = vmatpush1.bf16.msra.mxu1 %v6806_v45  ;;  %v11760_v44 = vld [vmem:[#allocation116_spill] sm:$0xff] }
 0x3c1   :  { %4659 = vmatprep.subr.bf16.mxu0 %v6773_v42  ;;  %4700 = vmatprep.subr.bf16.mxu1 %v6805_v40  ;;  %v6823_v45 = vcombine.high %v11760_v44, %v11759_v13  ;;  %v6822_v11 = vcombine.low %v11760_v44, %v11759_v13  ;;  %v11761_v42 = vld [vmem:[#allocation83_spill] sm:$0xff]  ;;  %v11791_v44 = vld [vmem:[#allocation126_spill] sm:$0xff] }
 0x3c2   :  { %v6789_v9 = vcombine.high %v11762_v43, %v11761_v42  ;;  %v11763_v40 = vld [vmem:[#allocation115_spill] sm:$0xff]  ;;  %v6788_v7 = vcombine.low %v11762_v43, %v11761_v42  ;;  %v11793_v42 = vld [vmem:[#allocation124_spill] sm:$0xff] }
 0x3c3   :  { %v11790_v13 = vld [vmem:[#allocation127_spill] sm:$0xff] }
 0x3c4   :  { %4660 = vmatpush1.bf16.msra.mxu0 %v6772_v24  ;;  %4701 = vmatpush1.bf16.msra.mxu1 %v6804_v6  ;;  %v11764_v24 = vld [vmem:[#allocation114_spill] sm:$0xff] }
 0x3c5   :  { %4661 = vmatprep.subr.bf16.mxu0 %v6771_v39  ;;  %4702 = vmatprep.subr.bf16.mxu1 %v6803_v26  ;;  %v6821_v6 = vcombine.high %v11764_v24, %v11763_v40  ;;  %v6820_v38 = vcombine.low %v11764_v24, %v11763_v40  ;;  %v11765_v39 = vld [vmem:[#allocation81_spill] sm:$0xff]  ;;  %v7788_v40 = vld [vmem:[#allocation3 + $0x20] ss:$0 sps:$4 sm:$0xff]   ;;  %v3807_v24 = vlaneseq }
 0x3c6   :  { %v6787_v59 = vcombine.high %v11766_v22, %v11765_v39  ;;  %v11767_v26 = vld [vmem:[#allocation113_spill] sm:$0xff]  ;;  %v6786_v36 = vcombine.low %v11766_v22, %v11765_v39 }
 0x3c8   :  { %4662 = vmatpush1.bf16.msra.mxu0 %v6770_v4  ;;  %4703 = vmatpush1.bf16.msra.mxu1 %v6802_v5  ;;  %v11768_v4 = vld [vmem:[#allocation112_spill] sm:$0xff] }
 0x3c9   :  { %4663 = vmatprep.subr.bf16.mxu0 %v6769_v35  ;;  %4704 = vmatprep.subr.bf16.mxu1 %v6801_v0  ;;  %v6819_v5 = vcombine.high %v11768_v4, %v11767_v26  ;;  %v6818_v37 = vcombine.low %v11768_v4, %v11767_v26  ;;  %v11769_v35 = vld [vmem:[#allocation79_spill] sm:$0xff] }
 0x3ca   :  { %v6785_v56 = vcombine.high %v11770_v50, %v11769_v35  ;;  %v11771_v0 = vld [vmem:[#allocation111_spill] sm:$0xff]  ;;  %v6784_v2 = vcombine.low %v11770_v50, %v11769_v35 }
 0x3cc   :  { %4664 = vmatpush1.bf16.msra.mxu0 %v6768_v34  ;;  %4705 = vmatpush1.bf16.msra.mxu1 %v6800_v28  ;;  %v11772_v34 = vld [vmem:[#allocation110_spill] sm:$0xff] }
 0x3cd   :  { %4665 = vmatprep.subr.bf16.mxu0 %v6767_v54  ;;  %4706 = vmatprep.subr.bf16.mxu1 %v6799_v29  ;;  %v6817_v28 = vcombine.high %v11772_v34, %v11771_v0  ;;  %v6816_v3 = vcombine.low %v11772_v34, %v11771_v0  ;;  %v11773_v54 = vld [vmem:[#allocation77_spill] sm:$0xff] }
 0x3ce   :  { %v6783_v23 = vcombine.high %v11774_v57, %v11773_v54  ;;  %v11775_v29 = vld [vmem:[#allocation109_spill] sm:$0xff]  ;;  %v6782_v48 = vcombine.low %v11774_v57, %v11773_v54 }
 0x3d0   :  { %4666 = vmatpush1.bf16.msra.mxu0 %v6766_v60  ;;  %4707 = vmatpush1.bf16.msra.mxu1 %v6798_v20  ;;  %v11776_v60 = vld [vmem:[#allocation108_spill] sm:$0xff] }
 0x3d1   :  { %4667 = vmatprep.subr.bf16.mxu0 %v6797_v31  ;;  %4708 = vmatprep.subr.bf16.mxu1 %v6829_v27  ;;  %v6815_v20 = vcombine.high %v11776_v60, %v11775_v29  ;;  %v6814_v17 = vcombine.low %v11776_v60, %v11775_v29  ;;  %v11777_v31 = vld [vmem:[#allocation139_spill] sm:$0xff]  ;;  %v6697_v27 = vcombine.low %v10465_v61, %v10465_v61 }
 0x3d2   :  { %v6845_v51 = vcombine.high %v11778_v62, %v11777_v31  ;;  %v11782_v61 = vld [vmem:[#allocation135_spill] sm:$0xff] }
 0x3d4   :  { %4668 = vmatpush2.bf16.msra.mxu0 %v6796_v8  ;;  %4709 = vmatpush2.bf16.msra.mxu1 %v6828_v53  ;;  %v6699_v8 = vcombine.low %v10467_v63, %v10467_v63  ;;  %v6844_v53 = vcombine.low %v11778_v62, %v11777_v31  ;;  %v11783_v63 = vld [vmem:[#allocation134_spill] sm:$0xff]  ;;  %v7904_v62 = vmov 1966171168  }
 0x3d5   :  { %4669 = vmatprep.subr.bf16.mxu0 %v6795_v55  ;;  %4710 = vmatprep.subr.bf16.mxu1 %v6827_v25  ;;  %v6843_v55 = vcombine.high %v11780_v41, %v11779_v16  ;;  %v6841_v25 = vcombine.high %v11783_v63, %v11782_v61 }
 0x3d8   :  { %4670 = vmatpush2.bf16.msra.mxu0 %v6794_v52  ;;  %4711 = vmatpush2.bf16.msra.mxu1 %v6826_v18  ;;  %v6840_v52 = vcombine.low %v11783_v63, %v11782_v61  ;;  %v11784_v18 = vld [vmem:[#allocation133_spill] sm:$0xff] }
 0x3d9   :  { %4671 = vmatprep.subr.bf16.mxu0 %v6793_v32  ;;  %4712 = vmatprep.subr.bf16.mxu1 %v6825_v15  ;;  %v6839_v21 = vcombine.high %v11785_v19, %v11784_v18  ;;  %v6838_v32 = vcombine.low %v11785_v19, %v11784_v18  ;;  %v6837_v15 = vcombine.high %v11787_v14, %v11786_v1 }
 0x3dc   :  { %4672 = vmatpush2.bf16.msra.mxu0 %v6792_v46  ;;  %4713 = vmatpush2.bf16.msra.mxu1 %v6824_v47  ;;  %v6836_v46 = vcombine.low %v11787_v14, %v11786_v1  ;;  %v11788_v47 = vld [vmem:[#allocation129_spill] sm:$0xff] }
 0x3dd   :  { %4673 = vmatprep.subr.bf16.mxu0 %v6791_v12  ;;  %4714 = vmatprep.subr.bf16.mxu1 %v6823_v45  ;;  %v6835_v33 = vcombine.high %v11789_v30, %v11788_v47  ;;  %v6834_v12 = vcombine.low %v11789_v30, %v11788_v47  ;;  %v6833_v45 = vcombine.high %v11791_v44, %v11790_v13 }
 0x3e0   :  { %4674 = vmatpush2.bf16.msra.mxu0 %v6790_v10  ;;  %4715 = vmatpush2.bf16.msra.mxu1 %v6822_v11  ;;  %v6832_v10 = vcombine.low %v11791_v44, %v11790_v13  ;;  %v11792_v11 = vld [vmem:[#allocation125_spill] sm:$0xff]  ;;  %v11796_v44 = vld [vmem:[#allocation187_spill] sm:$0xff] }
 0x3e1   :  { %4675 = vmatprep.subr.bf16.mxu0 %v6789_v9  ;;  %4716 = vmatprep.subr.bf16.mxu1 %v6821_v6  ;;  %v6831_v43 = vcombine.high %v11793_v42, %v11792_v11  ;;  %v6830_v9 = vcombine.low %v11793_v42, %v11792_v11  ;;  %v3808_v6 = vshrl.u32 %v3807_v24, 7 }
 0x3e3   :  { %v10639_v39 = vsub.s32 1, %v3808_v6 }
 0x3e4   :  { %4676 = vmatpush2.bf16.msra.mxu0 %v6788_v7  ;;  %4717 = vmatpush2.bf16.msra.mxu1 %v6820_v38  ;;  %v10634_v7 = vsub.s32 0, %v3808_v6  ;;  %v3805_v38 = vld [vmem:[%s11098_s7] sm:$0x3] }
 0x3e5   :  { %4677 = vmatprep.subr.bf16.mxu0 %v6787_v59  ;;  %4718 = vmatprep.subr.bf16.mxu1 %v6819_v5  ;;  %v3814_v59 = vrot.slane %v3805_v38, %v10639_v39 }
 0x3e6   :  { %v3810_v22 = vrot.slane %v3805_v38, %v10634_v7 }
 0x3e8   :  { %4678 = vmatpush2.bf16.msra.mxu0 %v6786_v36  ;;  %4719 = vmatpush2.bf16.msra.mxu1 %v6818_v37 }
 0x3e9   :  { %4679 = vmatprep.subr.bf16.mxu0 %v6785_v56  ;;  %4720 = vmatprep.subr.bf16.mxu1 %v6817_v28 }
 0x3ec   :  { %4680 = vmatpush2.bf16.msra.mxu0 %v6784_v2  ;;  %4721 = vmatpush2.bf16.msra.mxu1 %v6816_v3 }
 0x3ed   :  { %4681 = vmatprep.subr.bf16.mxu0 %v6783_v23  ;;  %4722 = vmatprep.subr.bf16.mxu1 %v6815_v20 }
 0x3f0   :  { %4682 = vmatpush2.bf16.msra.mxu0 %v6782_v48  ;;  %4723 = vmatpush2.bf16.msra.mxu1 %v6814_v17 }
 0x3f1   :  { %4733 = vmatprep.subr.bf16.mxu0 %v6845_v51  ;;  %v4786_v51 = vunpack.c.l.s4 %v7904_v62 }
 0x3f3   :  { %4684 = vmatmul.mubr.bf16.vlgmr.msra.gmra.mxu0 %v6697_v27  ;;  %4725 = vmatmul.mubr.bf16.vlgmr.msra.gmra.mxu1 %v6699_v8 }
 0x3f4   :  { %4734 = vmatpush1.bf16.msra.mxu0 %v6844_v53  ;;  %4765 = vmatprep.mubr.bf16.mxu0 %v11781_v58 }
 0x3f5   :  { %4735 = vmatprep.subr.bf16.mxu0 %v6843_v55  ;;  %v4787_v55 = vunpack.c.0.s8 %v4786_v51 }
 0x3f8   :  { %4736 = vmatpush1.bf16.msra.mxu0 %v6842_v49 }
 0x3f9   :  { %4737 = vmatprep.subr.bf16.mxu0 %v6841_v25 }
 0x3fc   :  { %4738 = vmatpush1.bf16.msra.mxu0 %v6840_v52  ;;  %v10643_v52 = vsub.s32 %v4787_v55, %v3808_v6 }
 0x3fd   :  { %4739 = vmatprep.subr.bf16.mxu0 %v6839_v21 }
 0x400   :  { %4740 = vmatpush1.bf16.msra.mxu0 %v6838_v32 }
 0x401   :  { %4741 = vmatprep.subr.bf16.mxu0 %v6837_v15 }
 0x404   :  { %4742 = vmatpush1.bf16.msra.mxu0 %v6836_v46 }
 0x405   :  { %4743 = vmatprep.subr.bf16.mxu0 %v6835_v33  ;;  %v11794_v33 = vld [vmem:[#allocation155_spill] sm:$0xff] }
 0x408   :  { %4744 = vmatpush1.bf16.msra.mxu0 %v6834_v12  ;;  %v11795_v12 = vld [vmem:[#allocation154_spill] sm:$0xff] }
 0x409   :  { %4745 = vmatprep.subr.bf16.mxu0 %v6833_v45  ;;  %v6864_v13 = vcombine.high %v11795_v12, %v11794_v33  ;;  %v11797_v45 = vld [vmem:[#allocation186_spill] sm:$0xff]  ;;  %v6863_v11 = vcombine.low %v11795_v12, %v11794_v33 }
 0x40a   :  { %v6895_v42 = vcombine.low %v11797_v45, %v11796_v44 }
 0x40c   :  { %4746 = vmatpush1.bf16.msra.mxu0 %v6832_v10  ;;  %v6896_v10 = vcombine.high %v11797_v45, %v11796_v44 }
 0x40d   :  { %4747 = vmatprep.subr.bf16.mxu0 %v6831_v43 }
 0x410   :  { %4748 = vmatpush1.bf16.msra.mxu0 %v6830_v9 }
 0x413   :  { %4766 = vmatmul.mubr.bf16.vlgmr.msra.gmra.mxu0 %v7788_v40 }
 0x473   :  { %v4603_v26 = vpop.f32.mrf.mxu0  ;;  %v4644_v4 = vpop.f32.mrf.mxu1 }
 0x474   :  { %v4604_v5 = vadd.f32 %v4603_v26, %v3810_v22 }
 0x475   :  { %v4605_v36 = vpop.f32.mrf.mxu0  ;;  %v4646_v37 = vpop.f32.mrf.mxu1 }
 0x476   :  { %v4606_v35 = vadd.f32 %v4605_v36, %v3814_v59  ;;  %v4645_v50 = vadd.f32 %v4644_v4, %v4604_v5 }
 0x477   :  { %v4607_v56 = vpop.f32.mrf.mxu0  ;;  %v4648_v0 = vpop.f32.mrf.mxu1 }
 0x478   :  { %v4647_v34 = vadd.f32 %v4646_v37, %v4606_v35 }
 0x479   :  { %v4608_v28 = vpop.f32.mrf.mxu0  ;;  %v4649_v2 = vpop.f32.mrf.mxu1 }
 0x4b3   :  { %v4685_v3 = vpop.f32.mrf.mxu0  ;;  %v4726_v54 = vpop.f32.mrf.mxu1 }
 0x4b4   :  { %v4686_v17 = vadd.f32 %v4685_v3, %v4645_v50 }
 0x4b5   :  { %v4687_v57 = vpop.f32.mrf.mxu0  ;;  %v4728_v23 = vpop.f32.mrf.mxu1 }
 0x4b6   :  { %v4688_v31 = vadd.f32 %v4687_v57, %v4647_v34  ;;  %v4727_v27 = vadd.f32 %v4726_v54, %v4686_v17 }
 0x4b7   :  { %v4689_v29 = vpop.f32.mrf.mxu0  ;;  %v4730_v60 = vpop.f32.mrf.mxu1 }
 0x4b8   :  { %v4729_v53 = vadd.f32 %v4728_v23, %v4688_v31 }
 0x4b9   :  { %v4690_v20 = vpop.f32.mrf.mxu0  ;;  %v4731_v48 = vpop.f32.mrf.mxu1 }
 0x4d3   :  { %v4767_v8 = vpop.f32.mrf.mxu0 }
 0x4d4   :  { %v4768_v16 = vadd.f32 %v4767_v8, %v4727_v27 }
 0x4d5   :  { %v4769_v41 = vpop.f32.mrf.mxu0 }
 0x4d6   :  { %v4776_v49 = vmul.f32 0.01, %v4768_v16  ;;  %v4770_v61 = vadd.f32 %v4769_v41, %v4729_v53  ;;  %vm4774_vm2 = vcmp.gt.f32.partialorder %v4768_v16, 0.0 }
 0x4d7   :  { %v4771_v63 = vpop.f32.mrf.mxu0 }
 0x4d8   :  { %vm4775_vm4 = vcmp.gt.f32.partialorder %v4770_v61, 0.0  ;;  %v4777_v25 = vmul.f32 0.01, %v4770_v61  ;;  %v4778_v19 = vsel %vm4774_vm2, %v4768_v16, %v4776_v49 }
 0x4d9   :  { %v4772_v18 = vpop.f32.mrf.mxu0 }
 0x4da   :  { %v4779_v21 = vsel %vm4775_vm4, %v4770_v61, %v4777_v25 }
 0x4db   :  { %v6846_v32 = vpack.c.bf16 %v4779_v21, %v4778_v19 }
 0x4dd   :  { %v4791_v1 = vrot.slane %v6846_v32, %v10643_v52 }
 0x4df   :  { %v4798_v14 = vrot.slane %v4791_v1, %v10643_v52  ;;  %6847 = vst.sshfl [vmem:[#allocation4] sm:$0x5 pattern:$0x73625140] %v4791_v1  ;;  %v4801_v15 = vcombine.high %v4791_v1, %v4791_v1 }
 0x4e1   :  { %v4808_v46 = vrot.slane %v4801_v15, %v10643_v52  ;;  %6848 = vst.sshfl [vmem:[#allocation4 + $0x2] sm:$0x5 pattern:$0x73625140] %v4801_v15  ;;  %v4811_v47 = vcombine.high %v4798_v14, %v4798_v14 }
 0x4e3   :  { %4813 = vst [vmem:[#allocation4 + $0x4] sm:$0x3] %v4811_v47  ;;  %v4814_v30 = vcombine.high %v4808_v46, %v4808_v46 }
 0x4e5   :  { %4816 = vst [vmem:[#allocation4 + $0x6] sm:$0x3] %v4814_v30 }
 0x4e6   :  { %7892 = dma.done.wait [#allocation8 + $0x1], 16384 }
 0x4e7   :  { %7893 = vsyncadd [#allocation8 + $0x1], 4294950912  ;;  %v11798_v43 = vld [vmem:[#allocation153_spill] sm:$0xff]  ;;  %v11799_v9 = vld [vmem:[#allocation152_spill] sm:$0xff]  ;;  %5660 = vmatprep.subr.bf16.mxu1 %v6864_v13  ;;  %5701 = vmatprep.subr.bf16.mxu0 %v6896_v10 }
 0x4e8   :  { %v6862_v40 = vcombine.high %v11799_v9, %v11798_v43  ;;  %v11800_v24 = vld [vmem:[#allocation185_spill] sm:$0xff]  ;;  %v11801_v6 = vld [vmem:[#allocation184_spill] sm:$0xff]  ;;  %5661 = vmatpush1.bf16.msra.mxu1 %v6863_v11  ;;  %5702 = vmatpush1.bf16.msra.mxu0 %v6895_v42  ;;  %v6861_v22 = vcombine.low %v11799_v9, %v11798_v43  ;;  %v11802_v26 = vld [vmem:[#allocation151_spill] sm:$0xff] }
 0x4e9   :  { %v6894_v38 = vcombine.high %v11801_v6, %v11800_v24  ;;  %v6893_v59 = vcombine.low %v11801_v6, %v11800_v24  ;;  %v11803_v4 = vld [vmem:[#allocation150_spill] sm:$0xff]  ;;  %v11804_v36 = vld [vmem:[#allocation183_spill] sm:$0xff]  ;;  %v11806_v0 = vld [vmem:[#allocation149_spill] sm:$0xff] }
 0x4ea   :  { %5662 = vmatprep.subr.bf16.mxu1 %v6862_v40  ;;  %v6860_v5 = vcombine.high %v11803_v4, %v11802_v26  ;;  %v11805_v37 = vld [vmem:[#allocation182_spill] sm:$0xff]  ;;  %v6859_v50 = vcombine.low %v11803_v4, %v11802_v26  ;;  %v11807_v34 = vld [vmem:[#allocation148_spill] sm:$0xff]  ;;  %v11808_v2 = vld [vmem:[#allocation181_spill] sm:$0xff] }
 0x4eb   :  { %5703 = vmatprep.subr.bf16.mxu0 %v6894_v38  ;;  %v6892_v35 = vcombine.high %v11805_v37, %v11804_v36  ;;  %v6891_v56 = vcombine.low %v11805_v37, %v11804_v36  ;;  %v6858_v28 = vcombine.high %v11807_v34, %v11806_v0  ;;  %v11809_v3 = vld [vmem:[#allocation180_spill] sm:$0xff]  ;;  %v6857_v57 = vcombine.low %v11807_v34, %v11806_v0  ;;  %v11810_v29 = vld [vmem:[#allocation147_spill] sm:$0xff]  ;;  %v11811_v60 = vld [vmem:[#allocation146_spill] sm:$0xff] }
 0x4ec   :  { %5663 = vmatpush1.bf16.msra.mxu1 %v6861_v22  ;;  %5704 = vmatpush1.bf16.msra.mxu0 %v6893_v59  ;;  %v6890_v54 = vcombine.high %v11809_v3, %v11808_v2  ;;  %v6889_v23 = vcombine.low %v11809_v3, %v11808_v2  ;;  %v6856_v20 = vcombine.high %v11811_v60, %v11810_v29  ;;  %v11812_v48 = vld [vmem:[#allocation179_spill] sm:$0xff]  ;;  %v11813_v17 = vld [vmem:[#allocation178_spill] sm:$0xff]  ;;  %v10688_v27 = vld [vmem:[#allocation4] sm:$0xff] }
 0x4ed   :  { %5664 = vmatprep.subr.bf16.mxu1 %v6860_v5  ;;  %5705 = vmatprep.subr.bf16.mxu0 %v6892_v35  ;;  %v6888_v31 = vcombine.high %v11813_v17, %v11812_v48  ;;  %v6855_v62 = vcombine.low %v11811_v60, %v11810_v29  ;;  %v6887_v51 = vcombine.low %v11813_v17, %v11812_v48  ;;  %v11814_v8 = vld [vmem:[#allocation145_spill] sm:$0xff]  ;;  %v11815_v53 = vld [vmem:[#allocation144_spill] sm:$0xff]  ;;  %v11818_v18 = vld [vmem:[#allocation143_spill] sm:$0xff] }
 0x4ee   :  { %v6854_v16 = vcombine.high %v11815_v53, %v11814_v8  ;;  %v11816_v41 = vld [vmem:[#allocation177_spill] sm:$0xff]  ;;  %v11817_v55 = vld [vmem:[#allocation176_spill] sm:$0xff]  ;;  %v10696_v61 = vrot.slane %v10688_v27, %v10643_v52  ;;  %v6853_v63 = vcombine.low %v11815_v53, %v11814_v8  ;;  %v11819_v19 = vld [vmem:[#allocation142_spill] sm:$0xff] }
 0x4ef   :  { %v6886_v49 = vcombine.high %v11817_v55, %v11816_v41  ;;  %v6885_v25 = vcombine.low %v11817_v55, %v11816_v41  ;;  %v6852_v21 = vcombine.high %v11819_v19, %v11818_v18  ;;  %v11820_v32 = vld [vmem:[#allocation175_spill] sm:$0xff]  ;;  %v11821_v1 = vld [vmem:[#allocation174_spill] sm:$0xff]  ;;  %v6851_v47 = vcombine.low %v11819_v19, %v11818_v18  ;;  %v11822_v33 = vld [vmem:[#allocation141_spill] sm:$0xff] }
 0x4f0   :  { %5665 = vmatpush1.bf16.msra.mxu1 %v6859_v50  ;;  %5706 = vmatpush1.bf16.msra.mxu0 %v6891_v56  ;;  %v6884_v14 = vcombine.high %v11821_v1, %v11820_v32  ;;  %v4978_v15 = vcombine.high %v10696_v61, %v10696_v61  ;;  %v6883_v30 = vcombine.low %v11821_v1, %v11820_v32  ;;  %v11823_v12 = vld [vmem:[#allocation140_spill] sm:$0xff]  ;;  %v11824_v44 = vld [vmem:[#allocation173_spill] sm:$0xff]  ;;  %v11826_v9 = vld [vmem:[#allocation171_spill] sm:$0xff] }
 0x4f1   :  { %5666 = vmatprep.subr.bf16.mxu1 %v6858_v28  ;;  %5707 = vmatprep.subr.bf16.mxu0 %v6890_v54  ;;  %v6850_v13 = vcombine.high %v11823_v12, %v11822_v33  ;;  %v11825_v45 = vld [vmem:[#allocation172_spill] sm:$0xff]  ;;  %v6849_v42 = vcombine.low %v11823_v12, %v11822_v33  ;;  %v11827_v40 = vld [vmem:[#allocation170_spill] sm:$0xff]  ;;  %v11828_v6 = vld [vmem:[#allocation203_spill] sm:$0xff] }
 0x4f2   :  { %v5000_v46 = vrot.slane %v4978_v15, %v10643_v52  ;;  %v6882_v10 = vcombine.high %v11825_v45, %v11824_v44  ;;  %v6881_v43 = vcombine.low %v11825_v45, %v11824_v44  ;;  %v6880_v24 = vcombine.high %v11827_v40, %v11826_v9  ;;  %v11829_v38 = vld [vmem:[#allocation202_spill] sm:$0xff]  ;;  %v11830_v4 = vld [vmem:[#allocation169_spill] sm:$0xff]  ;;  %v11831_v5 = vld [vmem:[#allocation168_spill] sm:$0xff] }
 0x4f3   :  { %v6912_v22 = vcombine.high %v11829_v38, %v11828_v6  ;;  %v6879_v59 = vcombine.low %v11827_v40, %v11826_v9  ;;  %v6911_v26 = vcombine.low %v11829_v38, %v11828_v6  ;;  %v6878_v36 = vcombine.high %v11831_v5, %v11830_v4  ;;  %v11832_v37 = vld [vmem:[#allocation201_spill] sm:$0xff]  ;;  %v11833_v35 = vld [vmem:[#allocation200_spill] sm:$0xff]  ;;  %v11834_v34 = vld [vmem:[#allocation167_spill] sm:$0xff] }
 0x4f4   :  { %5667 = vmatpush1.bf16.msra.mxu1 %v6857_v57  ;;  %5708 = vmatpush1.bf16.msra.mxu0 %v6889_v23  ;;  %v5010_v11 = vcombine.high %v5000_v46, %v5000_v46  ;;  %v6910_v50 = vcombine.high %v11833_v35, %v11832_v37  ;;  %v6877_v56 = vcombine.low %v11831_v5, %v11830_v4  ;;  %v11835_v28 = vld [vmem:[#allocation166_spill] sm:$0xff]  ;;  %v11836_v3 = vld [vmem:[#allocation199_spill] sm:$0xff]  ;;  %v11838_v60 = vld [vmem:[#allocation165_spill] sm:$0xff] }
 0x4f5   :  { %5668 = vmatprep.subr.bf16.mxu1 %v6856_v20  ;;  %5709 = vmatprep.subr.bf16.mxu0 %v6888_v31  ;;  %v6909_v0 = vcombine.low %v11833_v35, %v11832_v37  ;;  %v6876_v2 = vcombine.high %v11835_v28, %v11834_v34  ;;  %v11837_v54 = vld [vmem:[#allocation198_spill] sm:$0xff]  ;;  %v6875_v23 = vcombine.low %v11835_v28, %v11834_v34  ;;  %v11839_v20 = vld [vmem:[#allocation164_spill] sm:$0xff]  ;;  %v11840_v17 = vld [vmem:[#allocation197_spill] sm:$0xff] }
 0x4f6   :  { %5692 = vmatprep.mubr.bf16.mxu1 %v5000_v46  ;;  %5733 = vmatprep.mubr.bf16.mxu0 %v5010_v11  ;;  %v6908_v57 = vcombine.high %v11837_v54, %v11836_v3  ;;  %v6907_v29 = vcombine.low %v11837_v54, %v11836_v3  ;;  %v6874_v48 = vcombine.high %v11839_v20, %v11838_v60  ;;  %v11841_v31 = vld [vmem:[#allocation196_spill] sm:$0xff]  ;;  %v11842_v53 = vld [vmem:[#allocation163_spill] sm:$0xff]  ;;  %v11846_v19 = vld [vmem:[#allocation161_spill] sm:$0xff] }
 0x4f7   :  { %v6905_v8 = vcombine.low %v11841_v31, %v11840_v17  ;;  %v11844_v55 = vld [vmem:[#allocation195_spill] sm:$0xff]  ;;  %v11848_v1 = vld [vmem:[#allocation193_spill] sm:$0xff]  ;;  %v4963_v46 = vcombine.high %v10688_v27, %v10688_v27  ;;  %v11851_v12 = vld [vmem:[#allocation158_spill] sm:$0xff] }
 0x4f8   :  { %5669 = vmatpush1.bf16.msra.mxu1 %v6855_v62  ;;  %5710 = vmatpush1.bf16.msra.mxu0 %v6887_v51  ;;  %v6906_v62 = vcombine.high %v11841_v31, %v11840_v17  ;;  %v6873_v51 = vcombine.low %v11839_v20, %v11838_v60  ;;  %v11850_v33 = vld [vmem:[#allocation159_spill] sm:$0xff]  ;;  %v11853_v45 = vld [vmem:[#allocation190_spill] sm:$0xff]  ;;  %v11855_v9 = vld [vmem:[#allocation156_spill] sm:$0xff] }
 0x4f9   :  { %5670 = vmatprep.subr.bf16.mxu1 %v6854_v16  ;;  %5711 = vmatprep.subr.bf16.mxu0 %v6886_v49  ;;  %v11843_v16 = vld [vmem:[#allocation162_spill] sm:$0xff]  ;;  %v11852_v44 = vld [vmem:[#allocation191_spill] sm:$0xff]  ;;  %v10776_v11 = vrot.slane %v4963_v46, %v10643_v52  ;;  %v6867_v27 = vcombine.low %v11851_v12, %v11850_v33  ;;  %v11857_v6 = vld [vmem:[#allocation188_spill] sm:$0xff] }
 0x4fa   :  { %v6872_v41 = vcombine.high %v11843_v16, %v11842_v53  ;;  %v11845_v49 = vld [vmem:[#allocation194_spill] sm:$0xff]  ;;  %v11858_v5 = vld [vmem:[#allocation219_spill] sm:$0xff]  ;;  %v11863_v3 = vld [vmem:[#allocation216_spill] sm:$0xff] }
 0x4fb   :  { %v6903_v18 = vcombine.low %v11845_v49, %v11844_v55  ;;  %v11860_v35 = vld [vmem:[#allocation251_spill] sm:$0xff]  ;;  %v11867_v31 = vld [vmem:[#allocation214_spill] sm:$0xff] }
 0x4fc   :  { %5671 = vmatpush1.bf16.msra.mxu1 %v6853_v63  ;;  %5712 = vmatpush1.bf16.msra.mxu0 %v6885_v25  ;;  %v6904_v63 = vcombine.high %v11845_v49, %v11844_v55  ;;  %v6871_v25 = vcombine.low %v11843_v16, %v11842_v53  ;;  %v11866_v17 = vld [vmem:[#allocation215_spill] sm:$0xff]  ;;  %v11870_v55 = vld [vmem:[#allocation213_spill] sm:$0xff]  ;;  %v11871_v49 = vld [vmem:[#allocation212_spill] sm:$0xff] }
 0x4fd   :  { %5672 = vmatprep.subr.bf16.mxu1 %v6852_v21  ;;  %5713 = vmatprep.subr.bf16.mxu0 %v6884_v14  ;;  %v11847_v21 = vld [vmem:[#allocation160_spill] sm:$0xff]  ;;  %v6923_v16 = vcombine.low %v11867_v31, %v11866_v17  ;;  %v11876_v46 = vld [vmem:[#allocation243_spill] sm:$0xff] }
 0x4fe   :  { %v6870_v32 = vcombine.high %v11847_v21, %v11846_v19  ;;  %v11849_v14 = vld [vmem:[#allocation192_spill] sm:$0xff] }
 0x4ff   :  { %v6902_v15 = vcombine.high %v11849_v14, %v11848_v1 }
 0x500   :  { %5673 = vmatpush1.bf16.msra.mxu1 %v6851_v47  ;;  %5714 = vmatpush1.bf16.msra.mxu0 %v6883_v30  ;;  %v6869_v47 = vcombine.low %v11847_v21, %v11846_v19  ;;  %v6901_v30 = vcombine.low %v11849_v14, %v11848_v1  ;;  %v6921_v21 = vcombine.low %v11871_v49, %v11870_v55  ;;  %v11874_v1 = vld [vmem:[#allocation211_spill] sm:$0xff]  ;;  %v11875_v14 = vld [vmem:[#allocation210_spill] sm:$0xff] }
 0x501   :  { %5674 = vmatprep.subr.bf16.mxu1 %v6850_v13  ;;  %5715 = vmatprep.subr.bf16.mxu0 %v6882_v10  ;;  %v6868_v13 = vcombine.high %v11851_v12, %v11850_v33  ;;  %v6900_v10 = vcombine.high %v11853_v45, %v11852_v44  ;;  %v6919_v33 = vcombine.low %v11875_v14, %v11874_v1 }
 0x504   :  { %5675 = vmatpush1.bf16.msra.mxu1 %v6849_v42  ;;  %5716 = vmatpush1.bf16.msra.mxu0 %v6881_v43  ;;  %v6899_v42 = vcombine.low %v11853_v45, %v11852_v44  ;;  %v11854_v43 = vld [vmem:[#allocation157_spill] sm:$0xff]  ;;  %v11879_v44 = vld [vmem:[#allocation208_spill] sm:$0xff] }
 0x505   :  { %5676 = vmatprep.subr.bf16.mxu1 %v6880_v24  ;;  %5717 = vmatprep.subr.bf16.mxu0 %v6912_v22  ;;  %v6866_v40 = vcombine.high %v11855_v9, %v11854_v43  ;;  %v11856_v24 = vld [vmem:[#allocation189_spill] sm:$0xff]  ;;  %v4979_v22 = vcombine.high %v10776_v11, %v10776_v11 }
 0x506   :  { %v6898_v38 = vcombine.high %v11857_v6, %v11856_v24  ;;  %v6897_v4 = vcombine.low %v11857_v6, %v11856_v24  ;;  %v11883_v24 = vld [vmem:[#allocation206_spill] sm:$0xff] }
 0x508   :  { %5677 = vmatpush2.bf16.msra.mxu1 %v6879_v59  ;;  %5718 = vmatpush2.bf16.msra.mxu0 %v6911_v26  ;;  %v4986_v59 = vrot.slane %v10696_v61, %v10643_v52  ;;  %v6865_v26 = vcombine.low %v11855_v9, %v11854_v43 }
 0x509   :  { %5678 = vmatprep.subr.bf16.mxu1 %v6878_v36  ;;  %5719 = vmatprep.subr.bf16.mxu0 %v6910_v50  ;;  %v11859_v36 = vld [vmem:[#allocation218_spill] sm:$0xff] }
 0x50a   :  { %v6928_v37 = vcombine.high %v11859_v36, %v11858_v5  ;;  %v11861_v50 = vld [vmem:[#allocation250_spill] sm:$0xff]  ;;  %v5008_v34 = vcombine.high %v4986_v59, %v4986_v59  ;;  %v6927_v61 = vcombine.low %v11859_v36, %v11858_v5  ;;  %v11886_v5 = vld [vmem:[#allocation205_spill] sm:$0xff]  ;;  %v11887_v36 = vld [vmem:[#allocation204_spill] sm:$0xff] }
 0x50b   :  { %v6959_v28 = vcombine.low %v11861_v50, %v11860_v35 }
 0x50c   :  { %5679 = vmatpush2.bf16.msra.mxu1 %v6877_v56  ;;  %5720 = vmatpush2.bf16.msra.mxu0 %v6909_v0  ;;  %v6960_v56 = vcombine.high %v11861_v50, %v11860_v35  ;;  %v5007_v0 = vrot.slane %v4979_v22, %v10643_v52  ;;  %v11885_v22 = vld [vmem:[#allocation238_spill] sm:$0xff]  ;;  %v11888_v35 = vld [vmem:[#allocation237_spill] sm:$0xff]  ;;  %v11889_v50 = vld [vmem:[#allocation236_spill] sm:$0xff] }
 0x50d   :  { %5680 = vmatprep.subr.bf16.mxu1 %v6876_v2  ;;  %5721 = vmatprep.subr.bf16.mxu0 %v6908_v57  ;;  %v11862_v2 = vld [vmem:[#allocation217_spill] sm:$0xff] }
 0x50e   :  { %v6926_v54 = vcombine.high %v11863_v3, %v11862_v2  ;;  %v11864_v57 = vld [vmem:[#allocation249_spill] sm:$0xff]  ;;  %v5011_v60 = vcombine.high %v5007_v0, %v5007_v0  ;;  %v6925_v20 = vcombine.low %v11863_v3, %v11862_v2  ;;  %v11892_v3 = vld [vmem:[#allocation267_spill] sm:$0xff] }
 0x510   :  { %5681 = vmatpush2.bf16.msra.mxu1 %v6875_v23  ;;  %5722 = vmatpush2.bf16.msra.mxu0 %v6907_v29  ;;  %v11865_v23 = vld [vmem:[#allocation248_spill] sm:$0xff] }
 0x511   :  { %5682 = vmatprep.subr.bf16.mxu1 %v6874_v48  ;;  %5723 = vmatprep.subr.bf16.mxu0 %v6906_v62  ;;  %v6958_v29 = vcombine.high %v11865_v23, %v11864_v57  ;;  %v6957_v48 = vcombine.low %v11865_v23, %v11864_v57  ;;  %v6924_v62 = vcombine.high %v11867_v31, %v11866_v17  ;;  %v11896_v17 = vld [vmem:[#allocation265_spill] sm:$0xff]  ;;  %v11897_v31 = vld [vmem:[#allocation264_spill] sm:$0xff] }
 0x514   :  { %5683 = vmatpush2.bf16.msra.mxu1 %v6873_v51  ;;  %5724 = vmatpush2.bf16.msra.mxu0 %v6905_v8  ;;  %v11868_v51 = vld [vmem:[#allocation247_spill] sm:$0xff]  ;;  %v11869_v8 = vld [vmem:[#allocation246_spill] sm:$0xff] }
 0x515   :  { %5684 = vmatprep.subr.bf16.mxu1 %v6872_v41  ;;  %5725 = vmatprep.subr.bf16.mxu0 %v6904_v63  ;;  %v6956_v53 = vcombine.high %v11869_v8, %v11868_v51  ;;  %v6955_v41 = vcombine.low %v11869_v8, %v11868_v51  ;;  %v6922_v63 = vcombine.high %v11871_v49, %v11870_v55  ;;  %v11900_v55 = vld [vmem:[#allocation263_spill] sm:$0xff]  ;;  %v11901_v49 = vld [vmem:[#allocation262_spill] sm:$0xff] }
 0x516   :  { %v6973_v8 = vcombine.low %v11897_v31, %v11896_v17 }
 0x518   :  { %5685 = vmatpush2.bf16.msra.mxu1 %v6871_v25  ;;  %5726 = vmatpush2.bf16.msra.mxu0 %v6903_v18  ;;  %v11872_v25 = vld [vmem:[#allocation245_spill] sm:$0xff]  ;;  %v11873_v18 = vld [vmem:[#allocation244_spill] sm:$0xff] }
 0x519   :  { %5686 = vmatprep.subr.bf16.mxu1 %v6870_v32  ;;  %5727 = vmatprep.subr.bf16.mxu0 %v6902_v15  ;;  %v6954_v19 = vcombine.high %v11873_v18, %v11872_v25  ;;  %v6953_v32 = vcombine.low %v11873_v18, %v11872_v25  ;;  %v6920_v15 = vcombine.high %v11875_v14, %v11874_v1  ;;  %v11904_v1 = vld [vmem:[#allocation261_spill] sm:$0xff]  ;;  %v11905_v14 = vld [vmem:[#allocation260_spill] sm:$0xff] }
 0x51a   :  { %v6971_v18 = vcombine.low %v11901_v49, %v11900_v55 }
 0x51c   :  { %5687 = vmatpush2.bf16.msra.mxu1 %v6869_v47  ;;  %5728 = vmatpush2.bf16.msra.mxu0 %v6901_v30  ;;  %v11877_v47 = vld [vmem:[#allocation242_spill] sm:$0xff] }
 0x51d   :  { %5688 = vmatprep.subr.bf16.mxu1 %v6868_v13  ;;  %5729 = vmatprep.subr.bf16.mxu0 %v6900_v10  ;;  %v6952_v30 = vcombine.high %v11877_v47, %v11876_v46  ;;  %v6951_v12 = vcombine.low %v11877_v47, %v11876_v46  ;;  %v11878_v13 = vld [vmem:[#allocation209_spill] sm:$0xff]  ;;  %v6969_v47 = vcombine.low %v11905_v14, %v11904_v1 }
 0x51e   :  { %v6918_v45 = vcombine.high %v11879_v44, %v11878_v13  ;;  %v11880_v10 = vld [vmem:[#allocation241_spill] sm:$0xff]  ;;  %v6917_v43 = vcombine.low %v11879_v44, %v11878_v13  ;;  %v11908_v13 = vld [vmem:[#allocation259_spill] sm:$0xff]  ;;  %v11909_v44 = vld [vmem:[#allocation258_spill] sm:$0xff] }
 0x520   :  { %5689 = vmatpush2.bf16.msra.mxu1 %v6867_v27  ;;  %5730 = vmatpush2.bf16.msra.mxu0 %v6899_v42  ;;  %v11881_v27 = vld [vmem:[#allocation240_spill] sm:$0xff] }
 0x521   :  { %5690 = vmatprep.subr.bf16.mxu1 %v6866_v40  ;;  %5731 = vmatprep.subr.bf16.mxu0 %v6898_v38  ;;  %v6950_v42 = vcombine.high %v11881_v27, %v11880_v10  ;;  %v6949_v9 = vcombine.low %v11881_v27, %v11880_v10  ;;  %v11882_v40 = vld [vmem:[#allocation207_spill] sm:$0xff]  ;;  %v6967_v27 = vcombine.low %v11909_v44, %v11908_v13 }
 0x522   :  { %v6916_v6 = vcombine.high %v11883_v24, %v11882_v40  ;;  %v11884_v38 = vld [vmem:[#allocation239_spill] sm:$0xff] }
 0x524   :  { %5691 = vmatpush2.bf16.msra.mxu1 %v6865_v26  ;;  %5732 = vmatpush2.bf16.msra.mxu0 %v6897_v4  ;;  %v6915_v26 = vcombine.low %v11883_v24, %v11882_v40  ;;  %v6947_v4 = vcombine.low %v11885_v22, %v11884_v38  ;;  %v11912_v40 = vld [vmem:[#allocation257_spill] sm:$0xff]  ;;  %v11913_v24 = vld [vmem:[#allocation256_spill] sm:$0xff] }
 0x525   :  { %5742 = vmatprep.subr.bf16.mxu1 %v6928_v37  ;;  %5783 = vmatprep.subr.bf16.mxu0 %v6960_v56  ;;  %v6914_v37 = vcombine.high %v11887_v36, %v11886_v5  ;;  %v6946_v56 = vcombine.high %v11889_v50, %v11888_v35 }
 0x527   :  { %5693 = vmatmul.mubr.bf16.vlgmr.msra.gmra.mxu1 %v4986_v59  ;;  %5734 = vmatmul.mubr.bf16.vlgmr.msra.gmra.mxu0 %v5008_v34  ;;  %v6948_v59 = vcombine.high %v11885_v22, %v11884_v38  ;;  %v6945_v34 = vcombine.low %v11889_v50, %v11888_v35  ;;  %v6965_v22 = vcombine.low %v11913_v24, %v11912_v40 }
 0x528   :  { %5743 = vmatpush1.bf16.msra.mxu1 %v6927_v61  ;;  %5784 = vmatpush1.bf16.msra.mxu0 %v6959_v28  ;;  %v11890_v61 = vld [vmem:[#allocation235_spill] sm:$0xff]  ;;  %v11891_v28 = vld [vmem:[#allocation234_spill] sm:$0xff] }
 0x529   :  { %5744 = vmatprep.subr.bf16.mxu1 %v6926_v54  ;;  %5785 = vmatprep.subr.bf16.mxu0 %v6958_v29  ;;  %v6944_v2 = vcombine.high %v11891_v28, %v11890_v61  ;;  %v11893_v54 = vld [vmem:[#allocation266_spill] sm:$0xff]  ;;  %v6943_v23 = vcombine.low %v11891_v28, %v11890_v61  ;;  %v11920_v61 = vld [vmem:[#allocation253_spill] sm:$0xff]  ;;  %v11921_v28 = vld [vmem:[#allocation252_spill] sm:$0xff] }
 0x52a   :  { %5774 = vmatprep.mubr.bf16.mxu1 %v5007_v0  ;;  %5815 = vmatprep.mubr.bf16.mxu0 %v5011_v60  ;;  %v6913_v0 = vcombine.low %v11887_v36, %v11886_v5  ;;  %v6976_v57 = vcombine.high %v11893_v54, %v11892_v3  ;;  %v6975_v29 = vcombine.low %v11893_v54, %v11892_v3  ;;  %v11894_v60 = vld [vmem:[#allocation233_spill] sm:$0xff]  ;;  %v11916_v5 = vld [vmem:[#allocation255_spill] sm:$0xff]  ;;  %v11917_v36 = vld [vmem:[#allocation254_spill] sm:$0xff] }
 0x52b   :  { %v6963_v50 = vcombine.low %v11917_v36, %v11916_v5  ;;  %v4993_v3 = vrot.slane %v10776_v11, %v10643_v52 }
 0x52c   :  { %5745 = vmatpush1.bf16.msra.mxu1 %v6925_v20  ;;  %5786 = vmatpush1.bf16.msra.mxu0 %v6957_v48  ;;  %v11895_v20 = vld [vmem:[#allocation232_spill] sm:$0xff] }
 0x52d   :  { %5746 = vmatprep.subr.bf16.mxu1 %v6924_v62  ;;  %5787 = vmatprep.subr.bf16.mxu0 %v6956_v53  ;;  %v6942_v48 = vcombine.high %v11895_v20, %v11894_v60  ;;  %v6974_v62 = vcombine.high %v11897_v31, %v11896_v17  ;;  %v6941_v51 = vcombine.low %v11895_v20, %v11894_v60  ;;  %v11898_v53 = vld [vmem:[#allocation231_spill] sm:$0xff] }
 0x530   :  { %5747 = vmatpush1.bf16.msra.mxu1 %v6923_v16  ;;  %5788 = vmatpush1.bf16.msra.mxu0 %v6955_v41  ;;  %v11899_v16 = vld [vmem:[#allocation230_spill] sm:$0xff] }
 0x531   :  { %5748 = vmatprep.subr.bf16.mxu1 %v6922_v63  ;;  %5789 = vmatprep.subr.bf16.mxu0 %v6954_v19  ;;  %v6940_v41 = vcombine.high %v11899_v16, %v11898_v53  ;;  %v6972_v63 = vcombine.high %v11901_v49, %v11900_v55  ;;  %v6939_v25 = vcombine.low %v11899_v16, %v11898_v53  ;;  %v11902_v19 = vld [vmem:[#allocation229_spill] sm:$0xff] }
 0x534   :  { %5749 = vmatpush1.bf16.msra.mxu1 %v6921_v21  ;;  %5790 = vmatpush1.bf16.msra.mxu0 %v6953_v32  ;;  %v11903_v21 = vld [vmem:[#allocation228_spill] sm:$0xff] }
 0x535   :  { %5750 = vmatprep.subr.bf16.mxu1 %v6920_v15  ;;  %5791 = vmatprep.subr.bf16.mxu0 %v6952_v30  ;;  %v6938_v32 = vcombine.high %v11903_v21, %v11902_v19  ;;  %v6970_v15 = vcombine.high %v11905_v14, %v11904_v1  ;;  %v6937_v46 = vcombine.low %v11903_v21, %v11902_v19  ;;  %v11906_v30 = vld [vmem:[#allocation227_spill] sm:$0xff] }
 0x538   :  { %5751 = vmatpush1.bf16.msra.mxu1 %v6919_v33  ;;  %5792 = vmatpush1.bf16.msra.mxu0 %v6951_v12  ;;  %v11907_v33 = vld [vmem:[#allocation226_spill] sm:$0xff] }
 0x539   :  { %5752 = vmatprep.subr.bf16.mxu1 %v6918_v45  ;;  %5793 = vmatprep.subr.bf16.mxu0 %v6950_v42  ;;  %v6936_v12 = vcombine.high %v11907_v33, %v11906_v30  ;;  %v6968_v45 = vcombine.high %v11909_v44, %v11908_v13  ;;  %v6935_v10 = vcombine.low %v11907_v33, %v11906_v30  ;;  %v11910_v42 = vld [vmem:[#allocation225_spill] sm:$0xff]  ;;  %v11922_v30 = vld [vmem:[#allocation283_spill] sm:$0xff]  ;;  %v11923_v33 = vld [vmem:[#allocation282_spill] sm:$0xff] }
 0x53a   :  { %v7007_v13 = vcombine.low %v11923_v33, %v11922_v30  ;;  %v11924_v44 = vld [vmem:[#allocation281_spill] sm:$0xff] }
 0x53c   :  { %5753 = vmatpush1.bf16.msra.mxu1 %v6917_v43  ;;  %5794 = vmatpush1.bf16.msra.mxu0 %v6949_v9  ;;  %v11911_v43 = vld [vmem:[#allocation224_spill] sm:$0xff] }
 0x53d   :  { %5754 = vmatprep.subr.bf16.mxu1 %v6916_v6  ;;  %5795 = vmatprep.subr.bf16.mxu0 %v6948_v59  ;;  %v6934_v9 = vcombine.high %v11911_v43, %v11910_v42  ;;  %v6966_v6 = vcombine.high %v11913_v24, %v11912_v40  ;;  %v6933_v38 = vcombine.low %v11911_v43, %v11910_v42  ;;  %v11914_v59 = vld [vmem:[#allocation223_spill] sm:$0xff] }
 0x540   :  { %5755 = vmatpush1.bf16.msra.mxu1 %v6915_v26  ;;  %5796 = vmatpush1.bf16.msra.mxu0 %v6947_v4  ;;  %v11915_v26 = vld [vmem:[#allocation222_spill] sm:$0xff] }
 0x541   :  { %5756 = vmatprep.subr.bf16.mxu1 %v6914_v37  ;;  %5797 = vmatprep.subr.bf16.mxu0 %v6946_v56  ;;  %v6932_v4 = vcombine.high %v11915_v26, %v11914_v59  ;;  %v6964_v37 = vcombine.high %v11917_v36, %v11916_v5  ;;  %v6931_v35 = vcombine.low %v11915_v26, %v11914_v59  ;;  %v11918_v56 = vld [vmem:[#allocation221_spill] sm:$0xff] }
 0x544   :  { %5757 = vmatpush1.bf16.msra.mxu1 %v6913_v0  ;;  %5798 = vmatpush1.bf16.msra.mxu0 %v6945_v34  ;;  %v11919_v0 = vld [vmem:[#allocation220_spill] sm:$0xff] }
 0x545   :  { %5758 = vmatprep.subr.bf16.mxu1 %v6944_v2  ;;  %5799 = vmatprep.subr.bf16.mxu0 %v6976_v57  ;;  %v6930_v34 = vcombine.high %v11919_v0, %v11918_v56  ;;  %v6962_v2 = vcombine.high %v11921_v28, %v11920_v61  ;;  %v6929_v54 = vcombine.low %v11919_v0, %v11918_v56 }
 0x546   :  { %v6961_v57 = vcombine.low %v11921_v28, %v11920_v61 }
 0x548   :  { %5759 = vmatpush2.bf16.msra.mxu1 %v6943_v23  ;;  %5800 = vmatpush2.bf16.msra.mxu0 %v6975_v29  ;;  %v5009_v23 = vcombine.high %v4993_v3, %v4993_v3 }
 0x549   :  { %5760 = vmatprep.subr.bf16.mxu1 %v6942_v48  ;;  %5801 = vmatprep.subr.bf16.mxu0 %v6974_v62  ;;  %v4950_v62 = vld [vmem:[%s11099_s8] sm:$0x3] }
 0x54c   :  { %5761 = vmatpush2.bf16.msra.mxu1 %v6941_v51  ;;  %5802 = vmatpush2.bf16.msra.mxu0 %v6973_v8  ;;  %v4955_v51 = vrot.slane %v4950_v62, %v10634_v7  ;;  %v4959_v8 = vrot.slane %v4950_v62, %v10639_v39 }
 0x54d   :  { %5762 = vmatprep.subr.bf16.mxu1 %v6940_v41  ;;  %5803 = vmatprep.subr.bf16.mxu0 %v6972_v63 }
 0x550   :  { %5763 = vmatpush2.bf16.msra.mxu1 %v6939_v25  ;;  %5804 = vmatpush2.bf16.msra.mxu0 %v6971_v18 }
 0x551   :  { %5764 = vmatprep.subr.bf16.mxu1 %v6938_v32  ;;  %5805 = vmatprep.subr.bf16.mxu0 %v6970_v15 }
 0x554   :  { %5765 = vmatpush2.bf16.msra.mxu1 %v6937_v46  ;;  %5806 = vmatpush2.bf16.msra.mxu0 %v6969_v47 }
 0x555   :  { %5766 = vmatprep.subr.bf16.mxu1 %v6936_v12  ;;  %5807 = vmatprep.subr.bf16.mxu0 %v6968_v45  ;;  %v7008_v12 = vcombine.high %v11923_v33, %v11922_v30  ;;  %v11925_v45 = vld [vmem:[#allocation280_spill] sm:$0xff] }
 0x558   :  { %5767 = vmatpush2.bf16.msra.mxu1 %v6935_v10  ;;  %5808 = vmatpush2.bf16.msra.mxu0 %v6967_v27  ;;  %v7006_v10 = vcombine.high %v11925_v45, %v11924_v44 }
 0x559   :  { %5768 = vmatprep.subr.bf16.mxu1 %v6934_v9  ;;  %5809 = vmatprep.subr.bf16.mxu0 %v6966_v6 }
 0x55c   :  { %5769 = vmatpush2.bf16.msra.mxu1 %v6933_v38  ;;  %5810 = vmatpush2.bf16.msra.mxu0 %v6965_v22 }
 0x55d   :  { %5770 = vmatprep.subr.bf16.mxu1 %v6932_v4  ;;  %5811 = vmatprep.subr.bf16.mxu0 %v6964_v37 }
 0x560   :  { %5771 = vmatpush2.bf16.msra.mxu1 %v6931_v35  ;;  %5812 = vmatpush2.bf16.msra.mxu0 %v6963_v50 }
 0x561   :  { %5772 = vmatprep.subr.bf16.mxu1 %v6930_v34  ;;  %5813 = vmatprep.subr.bf16.mxu0 %v6962_v2 }
 0x564   :  { %5773 = vmatpush2.bf16.msra.mxu1 %v6929_v54  ;;  %5814 = vmatpush2.bf16.msra.mxu0 %v6961_v57 }
 0x567   :  { %5775 = vmatmul.mubr.bf16.vlgmr.msra.gmra.mxu1 %v4993_v3  ;;  %5816 = vmatmul.mubr.bf16.vlgmr.msra.gmra.mxu0 %v5009_v23 }
 0x5e7   :  { %v5694_v29 = vpop.f32.mrf.mxu1  ;;  %v5735_v60 = vpop.f32.mrf.mxu0 }
 0x5e8   :  { %v5695_v53 = vadd.f32 %v5694_v29, %v4955_v51 }
 0x5e9   :  { %v5696_v20 = vpop.f32.mrf.mxu1  ;;  %v5737_v48 = vpop.f32.mrf.mxu0 }
 0x5ea   :  { %v5697_v16 = vadd.f32 %v5696_v20, %v4959_v8  ;;  %v5736_v41 = vadd.f32 %v5735_v60, %v5695_v53 }
 0x5eb   :  { %v5698_v52 = vpop.f32.mrf.mxu1  ;;  %v5739_v11 = vpop.f32.mrf.mxu0 }
 0x5ec   :  { %v5738_v63 = vadd.f32 %v5737_v48, %v5697_v16 }
 0x5ed   :  { %v5699_v17 = vpop.f32.mrf.mxu1  ;;  %v5740_v31 = vpop.f32.mrf.mxu0 }
 0x627   :  { %v5776_v55 = vpop.f32.mrf.mxu1  ;;  %v5817_v49 = vpop.f32.mrf.mxu0 }
 0x628   :  { %v5777_v25 = vadd.f32 %v5776_v55, %v5736_v41 }
 0x629   :  { %v5778_v18 = vpop.f32.mrf.mxu1  ;;  %v5819_v19 = vpop.f32.mrf.mxu0 }
 0x62a   :  { %v10930_v21 = vadd.f32 %v5817_v49, %v5777_v25  ;;  %v5779_v32 = vadd.f32 %v5778_v18, %v5738_v63 }
 0x62b   :  { %v5780_v1 = vpop.f32.mrf.mxu1  ;;  %v5821_v14 = vpop.f32.mrf.mxu0 }
 0x62c   :  { %v5820_v15 = vadd.f32 %v5819_v19, %v5779_v32 }
 0x62d   :  { %v5781_v46 = vpop.f32.mrf.mxu1  ;;  %v5822_v47 = vpop.f32.mrf.mxu0 }
 0x62e   :  { %7894 = dma.done.wait [#allocation8 + $0x2], 4096 }
 0x62f   :  { %7895 = vsyncadd [#allocation8 + $0x2], 4294963200  ;;  %5991 = vmatprep.mubr.bf16.mxu1 %v11781_v58  ;;  %6160 = vmatprep.subr.bf16.mxu0 %v7008_v12  ;;  %v7005_v27 = vcombine.low %v11925_v45, %v11924_v44  ;;  %v11926_v42 = vld [vmem:[#allocation279_spill] sm:$0xff]  ;;  %v11927_v43 = vld [vmem:[#allocation278_spill] sm:$0xff]  ;;  %v5829_v59 = vpack.c.bf16 %v5820_v15, %v5820_v15  ;;  %s11944_s25 = sld [smem:[#allocation301_spill]]  ;;  %v11945_v12 = vmov 0.0  }
 0x630   :  { %6161 = vmatpush1.bf16.msra.mxu0 %v7007_v13  ;;  %v7004_v9 = vcombine.high %v11927_v43, %v11926_v42  ;;  %v7003_v40 = vcombine.low %v11927_v43, %v11926_v42  ;;  %v7790_v24 = vld [vmem:[%s11100_s9 + $0x74] ss:$8 sps:$4 sm:$0xff]   ;;  %v7792_v22 = vld [vmem:[%s11100_s9 + $0x70] ss:$8 sps:$4 sm:$0xff]   ;;  %v7793_v26 = vld [vmem:[%s11100_s9 + $0x64] ss:$8 sps:$4 sm:$0xff]  }
 0x631   :  { %6162 = vmatprep.subr.bf16.mxu0 %v7006_v10  ;;  %v11928_v6 = vld [vmem:[#allocation277_spill] sm:$0xff]  ;;  %v11929_v58 = vld [vmem:[#allocation276_spill] sm:$0xff]  ;;  %5959 = vmatprep.subr.bf16.mxu1 %v7790_v24  ;;  %v11930_v37 = vld [vmem:[#allocation275_spill] sm:$0xff] }
 0x632   :  { %v7002_v38 = vcombine.high %v11929_v58, %v11928_v6  ;;  %5960 = vmatpush1.bf16.msra.mxu1 %v7792_v22  ;;  %v7795_v4 = vld [vmem:[%s11100_s9 + $0x60] ss:$8 sps:$4 sm:$0xff]   ;;  %6192 = vmatprep.mubr.bf16.mxu0 %v5829_v59  ;;  %v7001_v5 = vcombine.low %v11929_v58, %v11928_v6  ;;  %v7796_v36 = vld [vmem:[%s11100_s9 + $0x54] ss:$8 sps:$4 sm:$0xff]   ;;  %v7798_v56 = vld [vmem:[%s11100_s9 + $0x50] ss:$8 sps:$4 sm:$0xff]  }
 0x633   :  { %5961 = vmatprep.subr.bf16.mxu1 %v7793_v26  ;;  %v11931_v35 = vld [vmem:[#allocation274_spill] sm:$0xff]  ;;  %v11932_v61 = vld [vmem:[#allocation273_spill] sm:$0xff]  ;;  %v11933_v28 = vld [vmem:[#allocation272_spill] sm:$0xff] }
 0x634   :  { %6163 = vmatpush1.bf16.msra.mxu0 %v7005_v27  ;;  %v7000_v50 = vcombine.high %v11931_v35, %v11930_v37  ;;  %v6999_v0 = vcombine.low %v11931_v35, %v11930_v37  ;;  %v7799_v34 = vld [vmem:[%s11100_s9 + $0x44] ss:$8 sps:$4 sm:$0xff]   ;;  %v6998_v2 = vcombine.high %v11933_v28, %v11932_v61  ;;  %v7801_v3 = vld [vmem:[%s11100_s9 + $0x40] ss:$8 sps:$4 sm:$0xff]   ;;  %v7802_v54 = vld [vmem:[%s11100_s9 + $0x34] ss:$8 sps:$4 sm:$0xff]   ;;  %v6997_v23 = vcombine.low %v11933_v28, %v11932_v61 }
 0x635   :  { %6164 = vmatprep.subr.bf16.mxu0 %v7004_v9  ;;  %v6228_v57 = vld [vmem:[%s11093_s2] sm:$0x3]  ;;  %v11934_v29 = vld [vmem:[#allocation271_spill] sm:$0xff]  ;;  %v11935_v60 = vld [vmem:[#allocation270_spill] sm:$0xff]  ;;  %v5828_v35 = vpack.c.bf16 %v10930_v21, %v10930_v21 }
 0x636   :  { %5962 = vmatpush1.bf16.msra.mxu1 %v7795_v4  ;;  %v6996_v20 = vcombine.high %v11935_v60, %v11934_v29  ;;  %6230 = vrot.lane.b32.xlu0 %v6228_v57, %s7902_s18  ;;  %v7804_v48 = vld [vmem:[%s11100_s9 + $0x30] ss:$8 sps:$4 sm:$0xff]   ;;  %v6995_v52 = vcombine.low %v11935_v60, %v11934_v29  ;;  %v7805_v11 = vld [vmem:[%s11100_s9 + $0x24] ss:$8 sps:$4 sm:$0xff]   ;;  %v7807_v51 = vld [vmem:[%s11100_s9 + $0x20] ss:$8 sps:$4 sm:$0xff]  }
 0x637   :  { %5963 = vmatprep.subr.bf16.mxu1 %v7796_v36  ;;  %v11936_v17 = vld [vmem:[#allocation269_spill] sm:$0xff]  ;;  %v11937_v31 = vld [vmem:[#allocation268_spill] sm:$0xff]  ;;  %v11938_v16 = vld [vmem:[#allocation299_spill] sm:$0xff] }
 0x638   :  { %6165 = vmatpush1.bf16.msra.mxu0 %v7003_v40  ;;  %v6994_v62 = vcombine.high %v11937_v31, %v11936_v17  ;;  %v6993_v8 = vcombine.low %v11937_v31, %v11936_v17  ;;  %v7808_v53 = vld [vmem:[%s11100_s9 + $0x14] ss:$8 sps:$4 sm:$0xff]   ;;  %v11939_v41 = vld [vmem:[#allocation298_spill] sm:$0xff]  ;;  %v7810_v49 = vld [vmem:[%s11100_s9 + $0x10] ss:$8 sps:$4 sm:$0xff]  }
 0x639   :  { %6166 = vmatprep.subr.bf16.mxu0 %v7002_v38  ;;  %v7024_v55 = vcombine.high %v11939_v41, %v11938_v16  ;;  %v7023_v63 = vcombine.low %v11939_v41, %v11938_v16  ;;  %v7811_v25 = vld [vmem:[%s11100_s9 + $0x4] ss:$8 sps:$4 sm:$0xff]   ;;  %v11941_v19 = vld [vmem:[#allocation296_spill] sm:$0xff]  ;;  %v7813_v1 = vld [vmem:[%s11100_s9] ss:$8 sps:$4 sm:$0xff]  }
 0x63a   :  { %5964 = vmatpush1.bf16.msra.mxu1 %v7798_v56  ;;  %v11940_v18 = vld [vmem:[#allocation297_spill] sm:$0xff]  ;;  %v11942_v15 = vld [vmem:[#allocation295_spill] sm:$0xff]  ;;  %v11943_v46 = vld [vmem:[#allocation294_spill] sm:$0xff] }
 0x63b   :  { %5965 = vmatprep.subr.bf16.mxu1 %v7799_v34  ;;  %v7022_v32 = vcombine.high %v11941_v19, %v11940_v18  ;;  %v7021_v14 = vcombine.low %v11941_v19, %v11940_v18  ;;  %v7020_v47 = vcombine.high %v11943_v46, %v11942_v15  ;;  %v5862_v30 = vld [vmem:[%s11944_s25] sm:$0x1]  ;;  %v7019_v33 = vcombine.low %v11943_v46, %v11942_v15  ;;  %v11947_v44 = vld [vmem:[#allocation292_spill] sm:$0xff]  ;;  %v11948_v27 = vld [vmem:[#allocation291_spill] sm:$0xff] }
 0x63c   :  { %6167 = vmatpush1.bf16.msra.mxu0 %v7001_v5  ;;  %v11946_v13 = vld [vmem:[#allocation293_spill] sm:$0xff]  ;;  %v11949_v42 = vld [vmem:[#allocation290_spill] sm:$0xff]  ;;  %v11951_v24 = vld [vmem:[#allocation288_spill] sm:$0xff] }
 0x63d   :  { %6168 = vmatprep.subr.bf16.mxu0 %v7000_v50  ;;  %v7018_v45 = vcombine.high %v11947_v44, %v11946_v13  ;;  %v7017_v10 = vcombine.low %v11947_v44, %v11946_v13  ;;  %v7016_v43 = vcombine.high %v11949_v42, %v11948_v27  ;;  %v7015_v9 = vcombine.low %v11949_v42, %v11948_v27  ;;  %v11950_v40 = vld [vmem:[#allocation289_spill] sm:$0xff]  ;;  %v11952_v38 = vld [vmem:[#allocation287_spill] sm:$0xff]  ;;  %v11953_v22 = vld [vmem:[#allocation286_spill] sm:$0xff] }
 0x63e   :  { %5966 = vmatpush1.bf16.msra.mxu1 %v7801_v3  ;;  %v7014_v6 = vcombine.high %v11951_v24, %v11950_v40  ;;  %v7013_v58 = vcombine.low %v11951_v24, %v11950_v40  ;;  %v7012_v59 = vcombine.high %v11953_v22, %v11952_v38  ;;  %v7011_v26 = vcombine.low %v11953_v22, %v11952_v38  ;;  %v11954_v4 = vld [vmem:[#allocation285_spill] sm:$0xff]  ;;  %v11955_v5 = vld [vmem:[#allocation284_spill] sm:$0xff]  ;;  %v7816_v16 = vld [vmem:[%s11102_s11 + $0x8] sm:$0xff]  }
 0x63f   :  { %5967 = vmatprep.subr.bf16.mxu1 %v7802_v54  ;;  %v7010_v36 = vcombine.high %v11955_v5, %v11954_v4  ;;  %v7009_v37 = vcombine.low %v11955_v5, %v11954_v4  ;;  %v6201_v61 = vld [vmem:[%s11101_s10] sm:$0x3] }
 0x640   :  { %6169 = vmatpush1.bf16.msra.mxu0 %v6999_v0  ;;  %v6206_v28 = vrot.slane %v6201_v61, %v10634_v7 }
 0x641   :  { %6170 = vmatprep.subr.bf16.mxu0 %v6998_v2 }
 0x642   :  { %5968 = vmatpush1.bf16.msra.mxu1 %v7804_v48 }
 0x643   :  { %5969 = vmatprep.subr.bf16.mxu1 %v7805_v11 }
 0x644   :  { %6171 = vmatpush1.bf16.msra.mxu0 %v6997_v23 }
 0x645   :  { %6172 = vmatprep.subr.bf16.mxu0 %v6996_v20  ;;  %v6210_v20 = vrot.slane %v6201_v61, %v10639_v39  ;;  %v7815_v39 = vld [vmem:[%s11102_s11 + $0x10] sm:$0xff]  }
 0x646   :  { %5970 = vmatpush1.bf16.msra.mxu1 %v7807_v51  ;;  %v7814_v51 = vld [vmem:[%s11102_s11 + $0x18] sm:$0xff]  }
 0x647   :  { %5971 = vmatprep.subr.bf16.mxu1 %v7808_v53 }
 0x648   :  { %6173 = vmatpush1.bf16.msra.mxu0 %v6995_v52 }
 0x649   :  { %6174 = vmatprep.subr.bf16.mxu0 %v6994_v62 }
 0x64a   :  { %5972 = vmatpush1.bf16.msra.mxu1 %v7810_v49 }
 0x64b   :  { %5973 = vmatprep.subr.bf16.mxu1 %v7811_v25 }
 0x64c   :  { %6175 = vmatpush1.bf16.msra.mxu0 %v6993_v8 }
 0x64d   :  { %6176 = vmatprep.subr.bf16.mxu0 %v7024_v55 }
 0x64e   :  { %5974 = vmatpush1.bf16.msra.mxu1 %v7813_v1 }
 0x64f   :  { %7606 = vmatprep.subr.bf16.mxu1 %v11945_v12 }
 0x650   :  { %6177 = vmatpush2.bf16.msra.mxu0 %v7023_v63  ;;  %v7817_v63 = vld [vmem:[%s11102_s11] sm:$0xff]   ;;  %s7905_s11 = smov [#allocation11]  }
 0x651   :  { %6178 = vmatprep.subr.bf16.mxu0 %v7022_v32  ;;  %5992 = vmatmul.mubr.bf16.vlgmr.msra.gmra.mxu1 %v5862_v30  ;;  %s6350_s7 = sshll.u32 %s7905_s11, 4  ;;  %s6351_s7 = int_to_ptr.vmem [resolvable:$true] %s6350_s7 }
 0x652   :  { %7614 = vmatprep.mubr.msk.bf16.mxu1 %vm7901_vm0, %v11945_v12  ;;  %7607 = vmatpush3.bf16.msra.mxu1 %v7814_v51  ;;  %vm6246_vm0 = vcmask 517120   ;;  %s7830_s2 = scalar_lea.vmem %s6351_s7, 32  ;;  %p7835_p1 = scmp.lt.s32.totalorder %s6351_s7, %s6351_s7 }
 0x653   :  { %7608 = vmatprep.subr.bf16.mxu1 %v11945_v12  ;;  %p7831_p0 = scmp.ne.s32.totalorder %s6351_s7, %s7830_s2  ;;  %p7836_p2 = scmp.lt.s32.totalorder %s7830_s2, %s7830_s2 }
 0x654   :  { %6179 = vmatpush2.bf16.msra.mxu0 %v7021_v14 }
 0x655   :  { %6180 = vmatprep.subr.bf16.mxu0 %v7020_v47  ;;  %p7837_p3 = por %p7836_p2, %p7835_p1 }
 0x656   :  { %7609 = vmatpush3.bf16.msra.mxu1 %v7815_v39 }
 0x657   :  { %7610 = vmatprep.subr.bf16.mxu1 %v11945_v12  ;;  %p7838_p4 = pnand %p7837_p3, %p7831_p0 }
 0x658   :  { %6181 = vmatpush2.bf16.msra.mxu0 %v7019_v33 }
 0x659   :  { %6182 = vmatprep.subr.bf16.mxu0 %v7018_v45 }
 0x65a   :  { %7611 = vmatpush3.bf16.msra.mxu1 %v7816_v16 }
 0x65b   :  { %7612 = vmatprep.subr.bf16.mxu1 %v11945_v12 }
 0x65c   :  { %6183 = vmatpush2.bf16.msra.mxu0 %v7017_v10 }
 0x65d   :  { %6184 = vmatprep.subr.bf16.mxu0 %v7016_v43 }
 0x65e   :  { %7613 = vmatpush3.bf16.msra.mxu1 %v7817_v63 }
 0x660   :  { %6185 = vmatpush2.bf16.msra.mxu0 %v7015_v9 }
 0x661   :  { %6186 = vmatprep.subr.bf16.mxu0 %v7014_v6 }
 0x664   :  { %6187 = vmatpush2.bf16.msra.mxu0 %v7013_v58 }
 0x665   :  { %6188 = vmatprep.subr.bf16.mxu0 %v7012_v59 }
 0x668   :  { %6189 = vmatpush2.bf16.msra.mxu0 %v7011_v26 }
 0x669   :  { %6190 = vmatprep.subr.bf16.mxu0 %v7010_v36 }
 0x66c   :  { %6191 = vmatpush2.bf16.msra.mxu0 %v7009_v37 }
 0x66f   :  { %6193 = vmatmul.mubr.bf16.vlgmr.msra.gmra.mxu0 %v5828_v35 }
 0x6a8   :  { %v6231_v53 = vpop.permute.xlu0 %6230 }
 0x711   :  { %v5993_v50 = vpop.f32.mrf.mxu1 }
 0x713   :  { %v5995_v56 = vpop.f32.mrf.mxu1 }
 0x715   :  { %v5997_v0 = vpop.f32.mrf.mxu1 }
 0x717   :  { %v5998_v34 = vpop.f32.mrf.mxu1 }
 0x72f   :  { %v6194_v2 = vpop.f32.mrf.mxu0 }
 0x730   :  { %v6195_v3 = vadd.f32 %v6194_v2, %v5993_v50 }
 0x731   :  { %v6196_v54 = vpop.f32.mrf.mxu0 }
 0x732   :  { %v6213_v57 = vadd.f32 %v6206_v28, %v6195_v3  ;;  %v6197_v21 = vadd.f32 %v6196_v54, %v5995_v56 }
 0x733   :  { %v6198_v23 = vpop.f32.mrf.mxu0 }
 0x734   :  { %v7025_v29 = vmul.f32 -1.442695, %v6213_v57  ;;  %v6214_v48 = vadd.f32 %v6210_v20, %v6197_v21 }
 0x735   :  { %v6199_v60 = vpop.f32.mrf.mxu0 }
 0x736   :  { %7818 = vpow2.f32 %v7025_v29  ;;  %v7026_v7 = vmul.f32 -1.442695, %v6214_v48 }
 0x737   :  { %7820 = vtanh.f32 %v6214_v48 }
 0x743   :  { %v7819_v52 = vpop.eup %7818 }
 0x744   :  { %v6218_v11 = vadd.f32 1.0, %v7819_v52  ;;  %v7821_v17 = vpop.eup %7820 }
 0x746   :  { %7822 = vrcp.f32 %v6218_v11 }
 0x747   :  { %7824 = vpow2.f32 %v7026_v7 }
 0x753   :  { %v7823_v31 = vpop.eup %7822 }
 0x754   :  { %v6234_v62 = vmul.f32 %v7823_v31, %v7821_v17  ;;  %v7825_v8 = vpop.eup %7824  ;;  %v6233_v55 = vmul.f32 %v7823_v31, %v6231_v53 }
 0x755   :  { %v6225_v41 = vadd.f32 1.0, %v7825_v8 }
 0x756   :  { %6236 = vrot.lane.b32.xlu0 %v6234_v62, %s7902_s18 }
 0x757   :  { %7826 = vrcp.f32 %v6225_v41 }
 0x764   :  { %v7827_v18 = vpop.eup %7826 }
 0x7c8   :  { %v6237_v49 = vpop.permute.xlu0 %6236 }
 0x7c9   :  { %v6239_v25 = vadd.f32 %v6237_v49, %v6233_v55 }
 0x7cb   :  { %7828 = vtanh.f32 %v6239_v25  ;;  %6243 = vrot.lane.b32.xlu0 %v6239_v25, %s7902_s18 }
 0x7d8   :  { %v7829_v19 = vpop.eup %7828 }
 0x7d9   :  { %v6241_v32 = vmul.f32 %v7829_v19, %v7827_v18 }
 0x7db   :  { %v6253_v1 = vpack.c.bf16 %v6241_v32, %v6241_v32 }
 0x7dd   :  { %6263 = vrot.lane.b32.xlu1 %v6253_v1, %s7902_s18 }
 0x7e1   :  { %6249 = vrot.lane.b32.xlu1 %v6241_v32, %s7902_s18 }
 0x83d   :  { %v6244_v14 = vpop.permute.xlu0 %6243 }
 0x83e   :  { %6247 = vst.msk [vmem:[#allocation13] sm:$0x3] %vm6246_vm0, %v6244_v14 }
 0x84f   :  { %v6264_v15 = vpop.permute.xlu1 %6263 }
 0x850   :  { %7615 = vmatmul.mubr.msk.bf16.vlgmr.msra.gmra.mxu1 %vm847_vm1, %v6264_v15 }
 0x853   :  { %v6250_v46 = vpop.permute.xlu1 %6249 }
 0x854   :  { %6252 = vst.msk [vmem:[#allocation11] sm:$0x3] %vm6246_vm0, %v6250_v46 }
 0x855   :  { %7841 = shalt.err (!%p7838_p4)
}
 0x856   :  { %6353 = dma.vmem_to_hbm [thread:$0]  %s6351_s7, 32, %s11107_s16, [#allocation12]  }
 0x857   :  { %s7906_s8 = smov [#allocation13]  }
 0x858   :  { %s6360_s30 = sshll.u32 %s7906_s8, 4  ;;  %s6361_s30 = int_to_ptr.vmem [resolvable:$true] %s6360_s30 }
 0x859   :  { %s7850_s19 = scalar_lea.vmem %s6361_s30, 32  ;;  %p7855_p6 = scmp.lt.s32.totalorder %s6361_s30, %s6361_s30 }
 0x85a   :  { %p7851_p5 = scmp.ne.s32.totalorder %s6361_s30, %s7850_s19  ;;  %p7856_p7 = scmp.lt.s32.totalorder %s7850_s19, %s7850_s19 }
 0x85c   :  { %p7857_p8 = por %p7856_p7, %p7855_p6 }
 0x85e   :  { %p7858_p9 = pnand %p7857_p8, %p7851_p5 }
 0x860   :  { %7861 = shalt.err (!%p7858_p9)
}
 0x861   :  { %6363 = dma.vmem_to_hbm [thread:$0]  %s6361_s30, 32, %s11108_s17, [#allocation12]   ;;  %vm6332_vm1 = vcmask 197632  }
 0x862   :  { %s7907_s12 = smov [#allocation9]  }
 0x863   :  { %s6340_s20 = sshll.u32 %s7907_s12, 4  ;;  %s6341_s20 = int_to_ptr.vmem [resolvable:$true] %s6340_s20 }
 0x864   :  { %s7870_s16 = scalar_lea.vmem %s6341_s20, 32  ;;  %p7875_p11 = scmp.lt.s32.totalorder %s6341_s20, %s6341_s20 }
 0x865   :  { %p7871_p10 = scmp.ne.s32.totalorder %s6341_s20, %s7870_s16  ;;  %p7876_p12 = scmp.lt.s32.totalorder %s7870_s16, %s7870_s16 }
 0x867   :  { %p7877_p13 = por %p7876_p12, %p7875_p11 }
 0x869   :  { %p7878_p0 = pnand %p7877_p13, %p7871_p10 }
 0x910   :  { %v6326_v47 = vpop.f32.mrf.mxu1 }
 0x911   :  { %6333 = vst.msk [vmem:[#allocation9] sm:$0x3] %vm6332_vm1, %v6326_v47 }
 0x912   :  { %v7616_v30 = vpop.f32.mrf.mxu1 }
 0x913   :  { %7881 = shalt.err (!%p7878_p0)
}
 0x914   :  { %6343 = dma.vmem_to_hbm [thread:$0]  %s6341_s20, 32, %s11106_s15, [#allocation10]   ;;  %v6329_v33 = vpop.f32.mrf.mxu1 }
 0x916   :  { %v7617_v12 = vpop.f32.mrf.mxu1 }
 0x917   :  { %7896 = dma.done.wait [#allocation10], 32  }
 0x918   :  { %7897 = vsyncadd [#allocation10], 4294967264 }
 0x919   :  { %7898 = dma.done.wait [#allocation12], 64  }
 0x91a   :  { %7899 = vsyncadd [#allocation12], 4294967232 }
 0x91b   :  { %6373 = vsyncpa [#allocation10], 1 }
 0x91c   :  { %6374 = vsyncpa [#allocation12], 1 }
 0x91d   :  { %6375 = vsyncmov [#allocation8] }
 0x920   :  { %s6376_s17 = vpop.sfrf %6375 }
 0x921   :  { %p7032_p1 = scmp.ne.s32.totalorder %s6376_s17, 0 }
 0x923   :  { %6380 = shalt.err (%p7032_p1)  }
 0x924   :  { %6382 = vsyncmov [#allocation8 + $0x1] }
 0x927   :  { %s6383_s4 = vpop.sfrf %6382 }
 0x928   :  { %p7033_p2 = scmp.ne.s32.totalorder %s6383_s4, 0 }
 0x92a   :  { %6387 = shalt.err (%p7033_p2)  }
 0x92b   :  { %6389 = vsyncmov [#allocation8 + $0x2] }
 0x92e   :  { %s6390_s23 = vpop.sfrf %6389 }
 0x92f   :  { %p7034_p3 = scmp.ne.s32.totalorder %s6390_s23, 0 }
 0x931   :  { %6394 = shalt.err (%p7034_p3)  }

</bundles_post_ra>
